<compile_context>
chip_gen: v5e
topology: v5e:2x2
jax: 0.10.0
libtpu: 0.0.40
codegen_flags: <defaults>
</compile_context>

<pallas_src>
import functools

import jax
import jax.numpy as jnp
from jax import lax
from jax.experimental import pallas as pl
from jax.experimental.pallas import tpu as pltpu

LANE = 128


# --------------------------------------------------------------------------- activation
def _mish_fast(x):
    # mish(x) = x * tanh(softplus(x)) = x * (w - 1) / (w + 1),  w = (1 + e^x)^2.
    # One EUP exp + one EUP approx reciprocal (vs exp + log + tanh).  For x > 20 the
    # ratio is 1.0 in f32 anyway, so clamping the exp input only avoids inf/nan.
    e = jnp.exp(jnp.minimum(x, 20.0))
    w = (1.0 + e) * (1.0 + e)
    return x * (w - 1.0) * pl.reciprocal(w + 1.0, approx=True)


def _apply_activation(y, activation):
    if activation == "mish":
        return _mish_fast(y)
    if activation == "relu":
        return jnp.maximum(y, 0.0)
    if activation == "leaky":
        return jnp.where(y >= 0.0, y, 0.1 * y)   # matches PyTorch LeakyReLU(0.1)
    if activation == "linear":
        return y
    raise ValueError(f"unknown activation: {activation}")


# --------------------------------------------------------------------------- staging
def _fill_padded(x_ref, xp_ref, *, pad, H, W, C_in, dtype):
    """Zero only the halo of the padded scratch, then copy the interior once."""
    Wp = W + 2 * pad
    if pad > 0:
        zrow = jnp.zeros((pad, Wp, C_in), dtype)
        zcol = jnp.zeros((H, pad, C_in), dtype)
        xp_ref[:pad, :, :] = zrow                       # top halo rows
        xp_ref[pad + H:, :, :] = zrow                   # bottom halo rows
        xp_ref[pad:pad + H, :pad, :] = zcol             # left halo cols
        xp_ref[pad:pad + H, pad + W:, :] = zcol         # right halo cols
    xp_ref[pad:pad + H, pad:pad + W, :] = x_ref[0]      # interior written exactly once


# --------------------------------------------------------------------------- kernels
def _conv_im2col_kernel(x_ref, w_ref, b_ref, o_ref, xp_ref, col_ref, *,
                        K, pad, H, W, C_in, TCO, CH, activation, dtype):
    # x_ref:   (1, H, W, C_in)       bf16 NHWC input, one batch element
    # w_ref:   (K*K*C_in, TCO)       conv weights with BN scale folded in (bf16)
    # b_ref:   (1, TCO)              folded BN bias (f32)
    # o_ref:   (1, H*W, TCO)         lane-dense output slab (bf16)
    # xp_ref:  (H+2p, W+2p, C_in)    VMEM scratch: zero-padded input
    # col_ref: (H*W, K*K*C_in)       VMEM scratch: im2col patch matrix
    HW = H * W

    # Staging does not depend on the C_out tile -> once per batch element.  The co
    # grid axis is "arbitrary", so the scratch persists across co steps on each core.
    @pl.when(pl.program_id(1) == 0)
    def _stage():
        _fill_padded(x_ref, xp_ref, pad=pad, H=H, W=W, C_in=C_in, dtype=dtype)
        for kh in range(K):
            for kw in range(K):
                tap = kh * K + kw
                col_ref[:, tap * C_in:(tap + 1) * C_in] = (
                    xp_ref[kh:kh + H, kw:kw + W, :].reshape(HW, C_in))

    w = w_ref[...]                                       # hoisted weight load
    bias = jnp.broadcast_to(b_ref[...], (CH, TCO))       # hoisted bias broadcast
    n_chunks = HW // CH

    def chunk_body(c, carry):
        r0 = pl.multiple_of(c * CH, CH)
        patch = col_ref[pl.ds(r0, CH), :]                # (CH, K*K*C_in)
        acc = jnp.dot(patch, w, preferred_element_type=jnp.float32)
        y = _apply_activation(acc + bias, activation)
        o_ref[0, pl.ds(r0, CH), :] = y.astype(o_ref.dtype)
        return carry

    lax.fori_loop(0, n_chunks, chunk_body, 0, unroll=n_chunks <= 8)


def _conv_tap_kernel(x_ref, w_ref, b_ref, o_ref, xp_ref, acc_ref, *,
                     K, pad, H, W, C_in, TCO, CH, activation, dtype):
    # Fallback for large K*K*C_in: per-tap MXU matmuls (full-C_in contraction lanes)
    # accumulated into an f32 VMEM scratch, then a chunked bias+activation epilogue.
    # TODO(synk): on v7x accumulate the taps in the MRB via pltpu.matmul_* instead of
    #             VPU adds into acc_ref.
    HW = H * W

    @pl.when(pl.program_id(1) == 0)
    def _stage():
        _fill_padded(x_ref, xp_ref, pad=pad, H=H, W=W, C_in=C_in, dtype=dtype)

    for kh in range(K):
        for kw in range(K):
            patch = xp_ref[kh:kh + H, kw:kw + W, :].reshape(HW, C_in)
            part = jnp.dot(patch, w_ref[kh, kw], preferred_element_type=jnp.float32)
            if kh == 0 and kw == 0:
                acc_ref[...] = part
            else:
                acc_ref[...] += part

    bias = jnp.broadcast_to(b_ref[...], (CH, TCO))
    n_chunks = HW // CH

    def chunk_body(c, carry):
        r0 = pl.multiple_of(c * CH, CH)
        y = _apply_activation(acc_ref[pl.ds(r0, CH), :] + bias, activation)
        o_ref[0, pl.ds(r0, CH), :] = y.astype(o_ref.dtype)
        return carry

    lax.fori_loop(0, n_chunks, chunk_body, 0, unroll=n_chunks <= 8)


# --------------------------------------------------------------------------- wrapper
def _fold_bn_into_weights(weight_oihw, gamma, beta, mean, var, eps, compute_dtype):
    """Inference-mode BatchNorm folded into the conv: returns (w_hwio*scale, bias)."""
    scale = gamma / jnp.sqrt(var + eps)                                    # (C_out,)
    w_hwio = jnp.transpose(weight_oihw, (2, 3, 1, 0)).astype(jnp.float32)  # OIHW->HWIO
    w_folded = (w_hwio * scale[None, None, None, :]).astype(compute_dtype)
    bias = (beta - mean * scale).astype(jnp.float32)                       # (C_out,)
    return w_folded, bias


def _pick_vmem_limit_bytes():
    # Generation-aware scoped-VMEM budget: leave headroom under v7x's 64 MiB/TC,
    # use most of the 128 MiB on v5e/v6e.
    try:
        phys = pltpu.get_tpu_info().vmem_capacity_bytes
    except Exception:
        phys = 64 * 1024 * 1024
    if phys <= 64 * 1024 * 1024:
        return 40 * 1024 * 1024
    return 100 * 1024 * 1024


def _pick_row_chunk(HW, TCO):
    # Keep the f32 accumulator + Mish temporaries to a handful of vregs per chunk:
    # CH * TCO * 4B <= ~32 KiB  ->  CH <= 8192 / TCO  (CH | HW, CH % 8 == 0).
    if HW % 8 != 0:
        return HW
    ch = max(8, min(HW, (8192 // max(TCO, 1)) // 8 * 8))
    while ch >= 8:
        if HW % ch == 0:
            return ch
        ch -= 8
    return HW


def conv_bn_activation(x_nchw, weight_oihw, bn_gamma, bn_beta, bn_mean, bn_var,
                       *, kernel_size, stride=1, activation="mish", eps=1e-5,
                       co_tile=LANE, compute_dtype=jnp.bfloat16):
    """Matches Conv_Bn_Activation.forward (bn=True, bias=False, eval-mode BN)."""
    # TODO(synk): stride > 1 and even kernel sizes are not implemented.
    assert stride == 1, "kernel implements stride=1 ('same' padding)"
    assert kernel_size % 2 == 1, "kernel implements odd kernel_size (symmetric pad)"
    N, C_in, H, W = x_nchw.shape
    C_out = weight_oihw.shape[0]
    K = kernel_size
    pad = (K - 1) // 2
    HW = H * W

    # Lane-dense output: pad C_out up to a multiple of 128 (sliced off afterwards).
    C_out_pad = -(-C_out // LANE) * LANE
    # co_tile: keep 128 on v5e; 256 is worth trying on v6e (2x256 MXU) when
    # C_out >= 256, and on v7x only after row tiling bounds the accumulator blocks.
    TCO = co_tile if (co_tile % LANE == 0 and C_out_pad % co_tile == 0) else LANE
    n_co = C_out_pad // TCO
    CH = _pick_row_chunk(HW, TCO)

    # NCHW -> NHWC so channels sit on the lane axis.
    # TODO(synk): in a real network hoist this layout conversion to the model boundary.
    x_nhwc = jnp.transpose(x_nchw, (0, 2, 3, 1)).astype(compute_dtype)

    w_folded, bias = _fold_bn_into_weights(weight_oihw, bn_gamma, bn_beta,
                                           bn_mean, bn_var, eps, compute_dtype)
    if C_out_pad != C_out:
        w_folded = jnp.pad(w_folded, ((0, 0), (0, 0), (0, 0), (0, C_out_pad - C_out)))
        bias = jnp.pad(bias, (0, C_out_pad - C_out))
    bias2d = bias.reshape(1, C_out_pad)

    KKC = K * K * C_in
    use_im2col = KKC <= 256   # fits a single MXU contraction (128 v5e, 256 v6e/v7x)

    common = dict(K=K, pad=pad, H=H, W=W, C_in=C_in, TCO=TCO, CH=CH,
                  activation=activation, dtype=compute_dtype)
    xp_scratch = pltpu.VMEM((H + 2 * pad, W + 2 * pad, C_in), compute_dtype)

    if use_im2col:
        kernel = functools.partial(_conv_im2col_kernel, **common)
        w_arg = w_folded.reshape(KKC, C_out_pad)
        w_spec = pl.BlockSpec((KKC, TCO), lambda n, co: (0, co))
        scratch = [xp_scratch, pltpu.VMEM((HW, KKC), compute_dtype)]
    else:
        kernel = functools.partial(_conv_tap_kernel, **common)
        w_arg = w_folded
        w_spec = pl.BlockSpec((K, K, C_in, TCO), lambda n, co: (0, 0, 0, co))
        scratch = [xp_scratch, pltpu.VMEM((HW, TCO), jnp.float32)]

    out_flat = pl.pallas_call(
        kernel,
        out_shape=jax.ShapeDtypeStruct((N, HW, C_out_pad), compute_dtype),
        grid_spec=pltpu.PrefetchScalarGridSpec(
            num_scalar_prefetch=0,
            grid=(N, n_co),
            in_specs=[
                # TODO(synk): pl.Buffered(1) on x (block index only changes with the
                #             batch axis) would reclaim one input buffer on v7x.
                pl.BlockSpec((1, H, W, C_in), lambda n, co: (n, 0, 0, 0)),
                w_spec,
                pl.BlockSpec((1, TCO), lambda n, co: (0, co)),
            ],
            out_specs=pl.BlockSpec((1, HW, TCO), lambda n, co: (n, 0, co)),
            scratch_shapes=scratch,
        ),
        compiler_params=pltpu.CompilerParams(
            # Batch is megacore-parallel; the co axis MUST be "arbitrary" so the
            # once-per-batch staging (pl.when(co == 0)) is valid on every core.
            dimension_semantics=("parallel", "arbitrary"),
            vmem_limit_bytes=_pick_vmem_limit_bytes(),
        ),
    )(x_nhwc, w_arg, bias2d)

    # TODO(synk): spatial row tiling with a (K-1)-row halo is required before this
    #             whole-image version is usable at production H*W on v7x (64 MiB VMEM).

    out_nhwc = out_flat.reshape(N, H, W, C_out_pad)[:, :, :, :C_out]
    return jnp.transpose(out_nhwc, (0, 3, 1, 2))   # NHWC -> NCHW (PyTorch convention)


# --------------------------------------------------------------------------- reference
def _reference(x_nchw, weight_oihw, gamma, beta, mean, var, *,
               kernel_size, eps=1e-5, activation="mish",
               compute_dtype=jnp.bfloat16):
    # Uses the same bf16-quantized inputs / folded weights as the kernel, so the
    # comparison measures accumulation order, the fast-Mish approximation and the
    # final bf16 store rounding only.
    w_folded, bias = _fold_bn_into_weights(weight_oihw, gamma, beta, mean, var,
                                           eps, compute_dtype)
    x_nhwc = jnp.transpose(x_nchw, (0, 2, 3, 1)).astype(compute_dtype)
    y = lax.conv_general_dilated(
        x_nhwc.astype(jnp.float32), w_folded.astype(jnp.float32),
        window_strides=(1, 1), padding="SAME",
        dimension_numbers=("NHWC", "HWIO", "NHWC"))
    y = y + bias.reshape(1, 1, 1, -1)
    if activation == "mish":
        y = y * jnp.tanh(jax.nn.softplus(y))
    elif activation == "relu":
        y = jnp.maximum(y, 0.0)
    elif activation == "leaky":
        y = jnp.where(y >= 0.0, y, 0.1 * y)
    return jnp.transpose(y, (0, 3, 1, 2))


if __name__ == "__main__":
    # Conv_Bn_Activation(in_channels=4, out_channels=8, kernel_size=3,
    #                    stride=1, activation='mish', bn=True, bias=False)
    N, C_in, H, W = 2, 4, 16, 16
    C_out, K = 8, 3

    key = jax.random.PRNGKey(0)
    k_x, k_w, k_g, k_b, k_m, k_v = jax.random.split(key, 6)

    x = jax.random.normal(k_x, (N, C_in, H, W), dtype=jnp.float32)
    weight = jax.random.normal(k_w, (C_out, C_in, K, K), dtype=jnp.float32) * 0.1
    gamma = jax.random.uniform(k_g, (C_out,), minval=0.5, maxval=1.5)
    beta = jax.random.normal(k_b, (C_out,)) * 0.1
    running_mean = jax.random.normal(k_m, (C_out,)) * 0.1
    running_var = jax.random.uniform(k_v, (C_out,), minval=0.5, maxval=1.5)

    out = conv_bn_activation(x, weight, gamma, beta, running_mean, running_var,
                             kernel_size=K, stride=1, activation="mish")
    out = jax.block_until_ready(out)

    ref = _reference(x, weight, gamma, beta, running_mean, running_var,
                     kernel_size=K, activation="mish")

    assert out.shape == (N, C_out, H, W)
    out_f32 = out.astype(jnp.float32)
    assert jnp.allclose(out_f32, ref, atol=3e-2, rtol=3e-2), (
        f"max abs err {jnp.max(jnp.abs(out_f32 - ref))}")

    print("KERNEL_OK")
</pallas_src>

<mosaic_0001>
module attributes {stable_mosaic.version = 11 : i64} {
  func.func @_conv_im2col_kernel(%arg0: i32, %arg1: i32, %arg2: memref<1x16x16x4xbf16, #tpu.memory_space<vmem>>, %arg3: memref<36x128xbf16, #tpu.memory_space<vmem>>, %arg4: memref<1x128xf32, #tpu.memory_space<vmem>>, %arg5: memref<1x256x128xbf16, #tpu.memory_space<vmem>>, %arg6: memref<18x18x4xbf16, #tpu.memory_space<vmem>>, %arg7: memref<256x36xbf16, #tpu.memory_space<vmem>>) attributes {dimension_semantics = [#tpu.dimension_semantics<parallel>, #tpu.dimension_semantics<arbitrary>], iteration_bounds = array<i64: 2, 1>, scalar_prefetch = 0 : i64, scratch_operands = 2 : i64, tpu.core_type = #tpu.core_type<tc>, window_params = [{transform_indices = @transform_0, window_bounds = array<i64: 1, 16, 16, 4>}, {transform_indices = @transform_1, window_bounds = array<i64: 36, 128>}, {transform_indices = @transform_2, window_bounds = array<i64: 1, 128>}, {transform_indices = @transform_3, window_bounds = array<i64: 1, 256, 128>}]} {
    %c0_i32 = arith.constant 0 : i32
    %0 = arith.cmpi eq, %arg1, %c0_i32 : i32
    %1 = arith.extui %0 : i1 to i32
    %c0_i32_0 = arith.constant 0 : i32
    %2 = arith.cmpi ne, %1, %c0_i32_0 : i32
    scf.if %2 {
      %cst_43 = arith.constant 0.000000e+00 : bf16
      %111 = vector.broadcast %cst_43 : bf16 to vector<1x18x4xbf16>
      %cst_44 = arith.constant 0.000000e+00 : bf16
      %112 = vector.broadcast %cst_44 : bf16 to vector<16x1x4xbf16>
      %c0_45 = arith.constant 0 : index
      %c0_46 = arith.constant 0 : index
      %c0_47 = arith.constant 0 : index
      %113 = vector.load %arg6[%c0_45, %c0_46, %c0_47] : memref<18x18x4xbf16, #tpu.memory_space<vmem>>, vector<1x18x4xbf16>
      tpu.vector_store %arg6[%c0_45, %c0_46, %c0_47], %111 {strides = array<i32>} : memref<18x18x4xbf16, #tpu.memory_space<vmem>>, vector<1x18x4xbf16>,
      %c17 = arith.constant 17 : index
      %c0_48 = arith.constant 0 : index
      %c0_49 = arith.constant 0 : index
      %114 = vector.load %arg6[%c17, %c0_48, %c0_49] : memref<18x18x4xbf16, #tpu.memory_space<vmem>>, vector<1x18x4xbf16>
      tpu.vector_store %arg6[%c17, %c0_48, %c0_49], %111 {strides = array<i32>} : memref<18x18x4xbf16, #tpu.memory_space<vmem>>, vector<1x18x4xbf16>,
      %c1 = arith.constant 1 : index
      %c0_50 = arith.constant 0 : index
      %c0_51 = arith.constant 0 : index
      %115 = vector.load %arg6[%c1, %c0_50, %c0_51] : memref<18x18x4xbf16, #tpu.memory_space<vmem>>, vector<16x1x4xbf16>
      tpu.vector_store %arg6[%c1, %c0_50, %c0_51], %112 {strides = array<i32>} : memref<18x18x4xbf16, #tpu.memory_space<vmem>>, vector<16x1x4xbf16>,
      %c1_52 = arith.constant 1 : index
      %c17_53 = arith.constant 17 : index
      %c0_54 = arith.constant 0 : index
      %116 = vector.load %arg6[%c1_52, %c17_53, %c0_54] : memref<18x18x4xbf16, #tpu.memory_space<vmem>>, vector<16x1x4xbf16>
      tpu.vector_store %arg6[%c1_52, %c17_53, %c0_54], %112 {strides = array<i32>} : memref<18x18x4xbf16, #tpu.memory_space<vmem>>, vector<16x1x4xbf16>,
      %c0_55 = arith.constant 0 : index
      %c0_56 = arith.constant 0 : index
      %c0_57 = arith.constant 0 : index
      %c0_58 = arith.constant 0 : index
      %117 = vector.load %arg2[%c0_55, %c0_56, %c0_57, %c0_58] : memref<1x16x16x4xbf16, #tpu.memory_space<vmem>>, vector<1x16x16x4xbf16>
      %118 = vector.shape_cast %117 : vector<1x16x16x4xbf16> to vector<16x16x4xbf16>
      %c1_59 = arith.constant 1 : index
      %c1_60 = arith.constant 1 : index
      %c0_61 = arith.constant 0 : index
      %119 = vector.load %arg6[%c1_59, %c1_60, %c0_61] : memref<18x18x4xbf16, #tpu.memory_space<vmem>>, vector<16x16x4xbf16>
      tpu.vector_store %arg6[%c1_59, %c1_60, %c0_61], %118 {strides = array<i32>} : memref<18x18x4xbf16, #tpu.memory_space<vmem>>, vector<16x16x4xbf16>,
      %c0_62 = arith.constant 0 : index
      %c0_63 = arith.constant 0 : index
      %c0_64 = arith.constant 0 : index
      %120 = vector.load %arg6[%c0_62, %c0_63, %c0_64] : memref<18x18x4xbf16, #tpu.memory_space<vmem>>, vector<16x16x4xbf16>
      %121 = vector.shape_cast %120 : vector<16x16x4xbf16> to vector<256x4xbf16>
      %c0_65 = arith.constant 0 : index
      %c0_66 = arith.constant 0 : index
      %122 = vector.load %arg7[%c0_65, %c0_66] : memref<256x36xbf16, #tpu.memory_space<vmem>>, vector<256x4xbf16>
      tpu.vector_store %arg7[%c0_65, %c0_66], %121 {strides = array<i32>} : memref<256x36xbf16, #tpu.memory_space<vmem>>, vector<256x4xbf16>,
      %c0_67 = arith.constant 0 : index
      %c1_68 = arith.constant 1 : index
      %c0_69 = arith.constant 0 : index
      %123 = vector.load %arg6[%c0_67, %c1_68, %c0_69] : memref<18x18x4xbf16, #tpu.memory_space<vmem>>, vector<16x16x4xbf16>
      %124 = vector.shape_cast %123 : vector<16x16x4xbf16> to vector<256x4xbf16>
      %c0_70 = arith.constant 0 : index
      %c4 = arith.constant 4 : index
      %125 = vector.load %arg7[%c0_70, %c4] : memref<256x36xbf16, #tpu.memory_space<vmem>>, vector<256x4xbf16>
      tpu.vector_store %arg7[%c0_70, %c4], %124 {strides = array<i32>} : memref<256x36xbf16, #tpu.memory_space<vmem>>, vector<256x4xbf16>,
      %c0_71 = arith.constant 0 : index
      %c2 = arith.constant 2 : index
      %c0_72 = arith.constant 0 : index
      %126 = vector.load %arg6[%c0_71, %c2, %c0_72] : memref<18x18x4xbf16, #tpu.memory_space<vmem>>, vector<16x16x4xbf16>
      %127 = vector.shape_cast %126 : vector<16x16x4xbf16> to vector<256x4xbf16>
      %c0_73 = arith.constant 0 : index
      %c8 = arith.constant 8 : index
      %128 = vector.load %arg7[%c0_73, %c8] : memref<256x36xbf16, #tpu.memory_space<vmem>>, vector<256x4xbf16>
      tpu.vector_store %arg7[%c0_73, %c8], %127 {strides = array<i32>} : memref<256x36xbf16, #tpu.memory_space<vmem>>, vector<256x4xbf16>,
      %c1_74 = arith.constant 1 : index
      %c0_75 = arith.constant 0 : index
      %c0_76 = arith.constant 0 : index
      %129 = vector.load %arg6[%c1_74, %c0_75, %c0_76] : memref<18x18x4xbf16, #tpu.memory_space<vmem>>, vector<16x16x4xbf16>
      %130 = vector.shape_cast %129 : vector<16x16x4xbf16> to vector<256x4xbf16>
      %c0_77 = arith.constant 0 : index
      %c12 = arith.constant 12 : index
      %131 = vector.load %arg7[%c0_77, %c12] : memref<256x36xbf16, #tpu.memory_space<vmem>>, vector<256x4xbf16>
      tpu.vector_store %arg7[%c0_77, %c12], %130 {strides = array<i32>} : memref<256x36xbf16, #tpu.memory_space<vmem>>, vector<256x4xbf16>,
      %c1_78 = arith.constant 1 : index
      %c1_79 = arith.constant 1 : index
      %c0_80 = arith.constant 0 : index
      %132 = vector.load %arg6[%c1_78, %c1_79, %c0_80] : memref<18x18x4xbf16, #tpu.memory_space<vmem>>, vector<16x16x4xbf16>
      %133 = vector.shape_cast %132 : vector<16x16x4xbf16> to vector<256x4xbf16>
      %c0_81 = arith.constant 0 : index
      %c16 = arith.constant 16 : index
      %134 = vector.load %arg7[%c0_81, %c16] : memref<256x36xbf16, #tpu.memory_space<vmem>>, vector<256x4xbf16>
      tpu.vector_store %arg7[%c0_81, %c16], %133 {strides = array<i32>} : memref<256x36xbf16, #tpu.memory_space<vmem>>, vector<256x4xbf16>,
      %c1_82 = arith.constant 1 : index
      %c2_83 = arith.constant 2 : index
      %c0_84 = arith.constant 0 : index
      %135 = vector.load %arg6[%c1_82, %c2_83, %c0_84] : memref<18x18x4xbf16, #tpu.memory_space<vmem>>, vector<16x16x4xbf16>
      %136 = vector.shape_cast %135 : vector<16x16x4xbf16> to vector<256x4xbf16>
      %c0_85 = arith.constant 0 : index
      %c20 = arith.constant 20 : index
      %137 = vector.load %arg7[%c0_85, %c20] : memref<256x36xbf16, #tpu.memory_space<vmem>>, vector<256x4xbf16>
      tpu.vector_store %arg7[%c0_85, %c20], %136 {strides = array<i32>} : memref<256x36xbf16, #tpu.memory_space<vmem>>, vector<256x4xbf16>,
      %c2_86 = arith.constant 2 : index
      %c0_87 = arith.constant 0 : index
      %c0_88 = arith.constant 0 : index
      %138 = vector.load %arg6[%c2_86, %c0_87, %c0_88] : memref<18x18x4xbf16, #tpu.memory_space<vmem>>, vector<16x16x4xbf16>
      %139 = vector.shape_cast %138 : vector<16x16x4xbf16> to vector<256x4xbf16>
      %c0_89 = arith.constant 0 : index
      %c24 = arith.constant 24 : index
      %140 = vector.load %arg7[%c0_89, %c24] : memref<256x36xbf16, #tpu.memory_space<vmem>>, vector<256x4xbf16>
      tpu.vector_store %arg7[%c0_89, %c24], %139 {strides = array<i32>} : memref<256x36xbf16, #tpu.memory_space<vmem>>, vector<256x4xbf16>,
      %c2_90 = arith.constant 2 : index
      %c1_91 = arith.constant 1 : index
      %c0_92 = arith.constant 0 : index
      %141 = vector.load %arg6[%c2_90, %c1_91, %c0_92] : memref<18x18x4xbf16, #tpu.memory_space<vmem>>, vector<16x16x4xbf16>
      %142 = vector.shape_cast %141 : vector<16x16x4xbf16> to vector<256x4xbf16>
      %c0_93 = arith.constant 0 : index
      %c28 = arith.constant 28 : index
      %143 = vector.load %arg7[%c0_93, %c28] : memref<256x36xbf16, #tpu.memory_space<vmem>>, vector<256x4xbf16>
      tpu.vector_store %arg7[%c0_93, %c28], %142 {strides = array<i32>} : memref<256x36xbf16, #tpu.memory_space<vmem>>, vector<256x4xbf16>,
      %c2_94 = arith.constant 2 : index
      %c2_95 = arith.constant 2 : index
      %c0_96 = arith.constant 0 : index
      %144 = vector.load %arg6[%c2_94, %c2_95, %c0_96] : memref<18x18x4xbf16, #tpu.memory_space<vmem>>, vector<16x16x4xbf16>
      %145 = vector.shape_cast %144 : vector<16x16x4xbf16> to vector<256x4xbf16>
      %c0_97 = arith.constant 0 : index
      %c32 = arith.constant 32 : index
      %146 = vector.load %arg7[%c0_97, %c32] : memref<256x36xbf16, #tpu.memory_space<vmem>>, vector<256x4xbf16>
      tpu.vector_store %arg7[%c0_97, %c32], %145 {strides = array<i32>} : memref<256x36xbf16, #tpu.memory_space<vmem>>, vector<256x4xbf16>,
    } else {
    }
    %c0 = arith.constant 0 : index
    %c0_1 = arith.constant 0 : index
    %3 = vector.load %arg3[%c0, %c0_1] : memref<36x128xbf16, #tpu.memory_space<vmem>>, vector<36x128xbf16>
    %c0_2 = arith.constant 0 : index
    %c0_3 = arith.constant 0 : index
    %4 = vector.load %arg4[%c0_2, %c0_3] : memref<1x128xf32, #tpu.memory_space<vmem>>, vector<1x128xf32>
    %5 = vector.shape_cast %4 : vector<1x128xf32> to vector<1x128xf32>
    %6 = vector.broadcast %5 : vector<1x128xf32> to vector<64x128xf32>
    %c0_i32_4 = arith.constant 0 : i32
    %c64_i32 = arith.constant 64 : i32
    %7 = arith.muli %c0_i32_4, %c64_i32 : i32
    %8 = tpu.assume_multiple %7, 64 : i32
    %9 = arith.index_cast %8 : i32 to index
    %c0_5 = arith.constant 0 : index
    %10 = vector.load %arg7[%9, %c0_5] : memref<256x36xbf16, #tpu.memory_space<vmem>>, vector<64x36xbf16>
    %cst = arith.constant dense<0.000000e+00> : vector<64x128xf32>
    %11 = tpu.matmul %10, %3, %cst {dimension_numbers = #tpu.dot_dimension_numbers<[1], [0], [0], [1], [0, 0, 1, 1], [], []>} : vector<64x36xbf16>, vector<36x128xbf16>, vector<64x128xf32> -> vector<64x128xf32>
    %12 = arith.addf %11, %6 : vector<64x128xf32>
    %cst_6 = arith.constant 2.000000e+01 : f32
    %13 = vector.broadcast %cst_6 : f32 to vector<64x128xf32>
    %14 = arith.minimumf %12, %13 : vector<64x128xf32>
    %15 = math.exp %14 : vector<64x128xf32>
    %cst_7 = arith.constant 1.000000e+00 : f32
    %16 = vector.broadcast %cst_7 : f32 to vector<64x128xf32>
    %17 = arith.addf %16, %15 : vector<64x128xf32>
    %cst_8 = arith.constant 1.000000e+00 : f32
    %18 = vector.broadcast %cst_8 : f32 to vector<64x128xf32>
    %19 = arith.addf %18, %15 : vector<64x128xf32>
    %20 = arith.mulf %17, %19 : vector<64x128xf32>
    %cst_9 = arith.constant 1.000000e+00 : f32
    %21 = vector.broadcast %cst_9 : f32 to vector<64x128xf32>
    %22 = arith.subf %20, %21 : vector<64x128xf32>
    %23 = arith.mulf %12, %22 : vector<64x128xf32>
    %cst_10 = arith.constant 1.000000e+00 : f32
    %24 = vector.broadcast %cst_10 : f32 to vector<64x128xf32>
    %25 = arith.addf %20, %24 : vector<64x128xf32>
    %26 = tpu.reciprocal %25 {approx = true} : vector<64x128xf32> -> vector<64x128xf32>
    %27 = arith.mulf %23, %26 : vector<64x128xf32>
    %28 = arith.truncf %27 : vector<64x128xf32> to vector<64x128xbf16>
    %c0_11 = arith.constant 0 : index
    %29 = arith.index_cast %8 : i32 to index
    %c0_12 = arith.constant 0 : index
    %30 = vector.load %arg5[%c0_11, %29, %c0_12] : memref<1x256x128xbf16, #tpu.memory_space<vmem>>, vector<1x64x128xbf16>
    %31 = vector.shape_cast %30 : vector<1x64x128xbf16> to vector<64x128xbf16>
    %32 = vector.shape_cast %28 : vector<64x128xbf16> to vector<1x64x128xbf16>
    tpu.vector_store %arg5[%c0_11, %29, %c0_12], %32 {strides = array<i32>} : memref<1x256x128xbf16, #tpu.memory_space<vmem>>, vector<1x64x128xbf16>,
    %c1_i32 = arith.constant 1 : i32
    %c64_i32_13 = arith.constant 64 : i32
    %33 = arith.muli %c1_i32, %c64_i32_13 : i32
    %34 = tpu.assume_multiple %33, 64 : i32
    %35 = arith.index_cast %34 : i32 to index
    %c0_14 = arith.constant 0 : index
    %36 = vector.load %arg7[%35, %c0_14] : memref<256x36xbf16, #tpu.memory_space<vmem>>, vector<64x36xbf16>
    %cst_15 = arith.constant dense<0.000000e+00> : vector<64x128xf32>
    %37 = tpu.matmul %36, %3, %cst_15 {dimension_numbers = #tpu.dot_dimension_numbers<[1], [0], [0], [1], [0, 0, 1, 1], [], []>} : vector<64x36xbf16>, vector<36x128xbf16>, vector<64x128xf32> -> vector<64x128xf32>
    %38 = arith.addf %37, %6 : vector<64x128xf32>
    %cst_16 = arith.constant 2.000000e+01 : f32
    %39 = vector.broadcast %cst_16 : f32 to vector<64x128xf32>
    %40 = arith.minimumf %38, %39 : vector<64x128xf32>
    %41 = math.exp %40 : vector<64x128xf32>
    %cst_17 = arith.constant 1.000000e+00 : f32
    %42 = vector.broadcast %cst_17 : f32 to vector<64x128xf32>
    %43 = arith.addf %42, %41 : vector<64x128xf32>
    %cst_18 = arith.constant 1.000000e+00 : f32
    %44 = vector.broadcast %cst_18 : f32 to vector<64x128xf32>
    %45 = arith.addf %44, %41 : vector<64x128xf32>
    %46 = arith.mulf %43, %45 : vector<64x128xf32>
    %cst_19 = arith.constant 1.000000e+00 : f32
    %47 = vector.broadcast %cst_19 : f32 to vector<64x128xf32>
    %48 = arith.subf %46, %47 : vector<64x128xf32>
    %49 = arith.mulf %38, %48 : vector<64x128xf32>
    %cst_20 = arith.constant 1.000000e+00 : f32
    %50 = vector.broadcast %cst_20 : f32 to vector<64x128xf32>
    %51 = arith.addf %46, %50 : vector<64x128xf32>
    %52 = tpu.reciprocal %51 {approx = true} : vector<64x128xf32> -> vector<64x128xf32>
    %53 = arith.mulf %49, %52 : vector<64x128xf32>
    %54 = arith.truncf %53 : vector<64x128xf32> to vector<64x128xbf16>
    %c0_21 = arith.constant 0 : index
    %55 = arith.index_cast %34 : i32 to index
    %c0_22 = arith.constant 0 : index
    %56 = vector.load %arg5[%c0_21, %55, %c0_22] : memref<1x256x128xbf16, #tpu.memory_space<vmem>>, vector<1x64x128xbf16>
    %57 = vector.shape_cast %56 : vector<1x64x128xbf16> to vector<64x128xbf16>
    %58 = vector.shape_cast %54 : vector<64x128xbf16> to vector<1x64x128xbf16>
    tpu.vector_store %arg5[%c0_21, %55, %c0_22], %58 {strides = array<i32>} : memref<1x256x128xbf16, #tpu.memory_space<vmem>>, vector<1x64x128xbf16>,
    %c2_i32 = arith.constant 2 : i32
    %c64_i32_23 = arith.constant 64 : i32
    %59 = arith.muli %c2_i32, %c64_i32_23 : i32
    %60 = tpu.assume_multiple %59, 64 : i32
    %61 = arith.index_cast %60 : i32 to index
    %c0_24 = arith.constant 0 : index
    %62 = vector.load %arg7[%61, %c0_24] : memref<256x36xbf16, #tpu.memory_space<vmem>>, vector<64x36xbf16>
    %cst_25 = arith.constant dense<0.000000e+00> : vector<64x128xf32>
    %63 = tpu.matmul %62, %3, %cst_25 {dimension_numbers = #tpu.dot_dimension_numbers<[1], [0], [0], [1], [0, 0, 1, 1], [], []>} : vector<64x36xbf16>, vector<36x128xbf16>, vector<64x128xf32> -> vector<64x128xf32>
    %64 = arith.addf %63, %6 : vector<64x128xf32>
    %cst_26 = arith.constant 2.000000e+01 : f32
    %65 = vector.broadcast %cst_26 : f32 to vector<64x128xf32>
    %66 = arith.minimumf %64, %65 : vector<64x128xf32>
    %67 = math.exp %66 : vector<64x128xf32>
    %cst_27 = arith.constant 1.000000e+00 : f32
    %68 = vector.broadcast %cst_27 : f32 to vector<64x128xf32>
    %69 = arith.addf %68, %67 : vector<64x128xf32>
    %cst_28 = arith.constant 1.000000e+00 : f32
    %70 = vector.broadcast %cst_28 : f32 to vector<64x128xf32>
    %71 = arith.addf %70, %67 : vector<64x128xf32>
    %72 = arith.mulf %69, %71 : vector<64x128xf32>
    %cst_29 = arith.constant 1.000000e+00 : f32
    %73 = vector.broadcast %cst_29 : f32 to vector<64x128xf32>
    %74 = arith.subf %72, %73 : vector<64x128xf32>
    %75 = arith.mulf %64, %74 : vector<64x128xf32>
    %cst_30 = arith.constant 1.000000e+00 : f32
    %76 = vector.broadcast %cst_30 : f32 to vector<64x128xf32>
    %77 = arith.addf %72, %76 : vector<64x128xf32>
    %78 = tpu.reciprocal %77 {approx = true} : vector<64x128xf32> -> vector<64x128xf32>
    %79 = arith.mulf %75, %78 : vector<64x128xf32>
    %80 = arith.truncf %79 : vector<64x128xf32> to vector<64x128xbf16>
    %c0_31 = arith.constant 0 : index
    %81 = arith.index_cast %60 : i32 to index
    %c0_32 = arith.constant 0 : index
    %82 = vector.load %arg5[%c0_31, %81, %c0_32] : memref<1x256x128xbf16, #tpu.memory_space<vmem>>, vector<1x64x128xbf16>
    %83 = vector.shape_cast %82 : vector<1x64x128xbf16> to vector<64x128xbf16>
    %84 = vector.shape_cast %80 : vector<64x128xbf16> to vector<1x64x128xbf16>
    tpu.vector_store %arg5[%c0_31, %81, %c0_32], %84 {strides = array<i32>} : memref<1x256x128xbf16, #tpu.memory_space<vmem>>, vector<1x64x128xbf16>,
    %c3_i32 = arith.constant 3 : i32
    %c64_i32_33 = arith.constant 64 : i32
    %85 = arith.muli %c3_i32, %c64_i32_33 : i32
    %86 = tpu.assume_multiple %85, 64 : i32
    %87 = arith.index_cast %86 : i32 to index
    %c0_34 = arith.constant 0 : index
    %88 = vector.load %arg7[%87, %c0_34] : memref<256x36xbf16, #tpu.memory_space<vmem>>, vector<64x36xbf16>
    %cst_35 = arith.constant dense<0.000000e+00> : vector<64x128xf32>
    %89 = tpu.matmul %88, %3, %cst_35 {dimension_numbers = #tpu.dot_dimension_numbers<[1], [0], [0], [1], [0, 0, 1, 1], [], []>} : vector<64x36xbf16>, vector<36x128xbf16>, vector<64x128xf32> -> vector<64x128xf32>
    %90 = arith.addf %89, %6 : vector<64x128xf32>
    %cst_36 = arith.constant 2.000000e+01 : f32
    %91 = vector.broadcast %cst_36 : f32 to vector<64x128xf32>
    %92 = arith.minimumf %90, %91 : vector<64x128xf32>
    %93 = math.exp %92 : vector<64x128xf32>
    %cst_37 = arith.constant 1.000000e+00 : f32
    %94 = vector.broadcast %cst_37 : f32 to vector<64x128xf32>
    %95 = arith.addf %94, %93 : vector<64x128xf32>
    %cst_38 = arith.constant 1.000000e+00 : f32
    %96 = vector.broadcast %cst_38 : f32 to vector<64x128xf32>
    %97 = arith.addf %96, %93 : vector<64x128xf32>
    %98 = arith.mulf %95, %97 : vector<64x128xf32>
    %cst_39 = arith.constant 1.000000e+00 : f32
    %99 = vector.broadcast %cst_39 : f32 to vector<64x128xf32>
    %100 = arith.subf %98, %99 : vector<64x128xf32>
    %101 = arith.mulf %90, %100 : vector<64x128xf32>
    %cst_40 = arith.constant 1.000000e+00 : f32
    %102 = vector.broadcast %cst_40 : f32 to vector<64x128xf32>
    %103 = arith.addf %98, %102 : vector<64x128xf32>
    %104 = tpu.reciprocal %103 {approx = true} : vector<64x128xf32> -> vector<64x128xf32>
    %105 = arith.mulf %101, %104 : vector<64x128xf32>
    %106 = arith.truncf %105 : vector<64x128xf32> to vector<64x128xbf16>
    %c0_41 = arith.constant 0 : index
    %107 = arith.index_cast %86 : i32 to index
    %c0_42 = arith.constant 0 : index
    %108 = vector.load %arg5[%c0_41, %107, %c0_42] : memref<1x256x128xbf16, #tpu.memory_space<vmem>>, vector<1x64x128xbf16>
    %109 = vector.shape_cast %108 : vector<1x64x128xbf16> to vector<64x128xbf16>
    %110 = vector.shape_cast %106 : vector<64x128xbf16> to vector<1x64x128xbf16>
    tpu.vector_store %arg5[%c0_41, %107, %c0_42], %110 {strides = array<i32>} : memref<1x256x128xbf16, #tpu.memory_space<vmem>>, vector<1x64x128xbf16>,
    %c4_i32 = arith.constant 4 : i32
    return
  }
  func.func @transform_0(%arg0: i32, %arg1: i32) -> (i32, i32, i32, i32) {
    %c0_i32 = arith.constant 0 : i32
    %c0_i32_0 = arith.constant 0 : i32
    %c0_i32_1 = arith.constant 0 : i32
    %c0_i32_2 = arith.constant 0 : i32
    return %arg0, %c0_i32, %c0_i32_0, %c0_i32_1 : i32, i32, i32, i32
  }
  func.func @transform_1(%arg0: i32, %arg1: i32) -> (i32, i32) {
    %c0_i32 = arith.constant 0 : i32
    %c0_i32_0 = arith.constant 0 : i32
    return %c0_i32, %arg1 : i32, i32
  }
  func.func @transform_2(%arg0: i32, %arg1: i32) -> (i32, i32) {
    %c0_i32 = arith.constant 0 : i32
    %c0_i32_0 = arith.constant 0 : i32
    return %c0_i32, %arg1 : i32, i32
  }
  func.func @transform_3(%arg0: i32, %arg1: i32) -> (i32, i32, i32) {
    %c0_i32 = arith.constant 0 : i32
    %c0_i32_0 = arith.constant 0 : i32
    return %arg0, %c0_i32, %arg1 : i32, i32, i32
  }
}

</mosaic_0001>

<bundles_post_ra>
// kernel: tpu_custom_call.1
= control target key start
LH: loop header
LB: loop body
LE: loop exit
PB: predicated region body
PF: predicated region fallthrough
CT: control target
= control target key end

     0   :  { %8 = vsyncpa [#allocation5], 0  ;;  %s7378_s0 = inlined_call_operand.vmem [shape: bf16[2,16,16,4], index: 0, kind: input, shape index: {}]   ;;  %s7379_s1 = inlined_call_operand.vmem [shape: bf16[36,128], index: 1, kind: input, shape index: {}]   ;;  %s7380_s2 = inlined_call_operand.vmem [shape: f32[1,128], index: 2, kind: input, shape index: {}]   ;;  %s7381_s3 = inlined_call_operand.hbm [shape: bf16[2,256,128], index: 3, kind: output, shape index: {}]  }
   0x1   :  { %10 = vsyncpa [#allocation5 + $0x1], 0  ;;  %s5386_s12 = smov 0   ;;  %s5388_s13 = smov 0  }
   0x2   :  { %s5390_s14 = smov 0   ;;  %s5392_s15 = smov 0  }
   0x3   :  { %s5394_s16 = smov 0   ;;  %s5396_s17 = smov 0  }
   0x4 LB: > { %s4760_s18 = sadd.s32 4294967295, %s5354_s17   ;;  %s4761_s19 = sadd.s32 4294967294, %s5354_s17   ;;  %s5354_s17 = sphi %s5396_s17, %s16_s17   ;;  %s5350_s16 = sphi %s5394_s16, %s7400_s16   ;;  %s5346_s15 = sphi %s5392_s15, %s7399_s15   ;;  %s5342_s14 = sphi %s5390_s14, %s7398_s14   ;;  %s5338_s13 = sphi %s5388_s13, %s7397_s13   ;;  %s5334_s12 = sphi %s5386_s12, %s7396_s12  }
   0x5   : > { %s28_s20 = sadd.s32 1, %s5350_s16  ;;  %s115_s21 = sadd.s32 1, %s5342_s14 }
   0x6   : > { %p30_p0 = scmp.ge.s32.totalorder %s28_s20, 2  ;;  %p125_p1 = scmp.ne.s32.totalorder %s5342_s14, %s5338_s13 }
   0x7   : > { %p126_p2 = scmp.eq.s32.totalorder %s4760_s18, 1  ;;  %p131_p3 = scmp.ne.s32.totalorder %s5338_s13, %s5334_s12 }
   0x8   : > { %s7402_s20 = smov (%p30_p0, %s28_s20), 0  ;;  %p132_p5 = scmp.eq.s32.totalorder %s4761_s19, 1 }
   0x9   : > { %p5426_p4 = por %p126_p2, %p125_p1  ;;  %s110_s23 = ssub.s32 %s5350_s16, %s7402_s20 }
   0xa   : > { %p4766_p6 = scmp.ge.s32.totalorder %s5354_s17, 1  ;;  %p113_p7 = scmp.eq.s32.totalorder %s110_s23, 0 }
   0xb   : > { %p5433_p8 = por %p132_p5, %p131_p3  ;;  %p171_p9 = scmp.lt.s32.totalorder %s5354_s17, 3 }
   0xc   : > { %s5439_s25 = scalar_select %p113_p7, %s5342_s14, %s115_s21  }
   0xd   : > { %p172_p10 = pnand %p4766_p6, %p171_p9 }
   0xe   : > { %p202_p11 = scmp.lt.s32.totalorder (!%p172_p10), %s5346_s15, 1  ;;  %s5357_s4 = smov (!%p172_p10), 4  }
   0xf   : > { %175 = sbr.rel (%p172_p10) target bundleno = 1053 (0x41d), region = 32  ;;  %s5358_s5 = smov (!%p172_p10), 8  }
  0x10   : > { %s5359_s6 = smov (!%p172_p10), 12   ;;  %s5360_s7 = smov (!%p172_p10), 16  }
  0x11   : > { %s5361_s8 = smov (!%p172_p10), 20   ;;  %s5362_s9 = smov (!%p172_p10), 24  }
  0x12   : > { %s5363_s10 = smov (!%p172_p10), 28   ;;  %s5364_s11 = smov (!%p172_p10), 32  }
  0x14   : > { %vm219_vm0 = vcmask 27648   ;;  %v5356_v0 = vmov 0   ;;  %vm222_vm1 = vcmask 24576   ;;  %vm230_vm2 = vsmask.f32 256  ;;  %s203_s26 = scalar_select %p202_p11, %s5346_s15, 1 }
  0x15   : > { %220 = vst.msk [vmem:[#allocation2] sm:$0xf] %vm219_vm0, %v5356_v0  ;;  %vm5445_vm3 = vmand %vm222_vm1, %vm230_vm2  ;;  %vm910_vm4 = vsmask.f32 3328  ;;  %vm911_vm5 = vsmask.f32 7440 }
  0x16   : > { %221 = vst.msk [vmem:[#allocation2 + $0x4] sm:$0xf] %vm219_vm0, %v5356_v0  ;;  %vm280_vm6 = vsmask.f32 7938  ;;  %v232_v2 = vld [vmem:[#allocation2 + $0xc] sm:$0x1]  ;;  %vm5494_vm11 = vmor %vm910_vm4, %vm911_vm5 }
  0x17   : > { %225 = vst.msk [vmem:[#allocation2 + $0xcc] sm:$0xf] %vm219_vm0, %v5356_v0  ;;  %vm5454_vm7 = vmand %vm222_vm1, %vm280_vm6  ;;  %v233_v4 = vsel %vm5445_vm3, 0, %v232_v2  ;;  %v238_v5 = vld [vmem:[#allocation2 + $0x24] sm:$0x1]  ;;  %s4967_s27 = sshll.u32 %s203_s26, 7 }
  0x18   : > { %226 = vst.msk [vmem:[#allocation2 + $0xd0] sm:$0xf] %vm219_vm0, %v5356_v0  ;;  %vm362_vm8 = vsmask.f32 4368  ;;  %v282_v6 = vld [vmem:[#allocation2 + $0x14] sm:$0x1]  ;;  %s5468_s30 = scalar_lea.vmem %s7378_s0, %s4967_s27  ;;  %vm5481_vm9 = vmand %vm219_vm0, %vm280_vm6 }
  0x19   : > { %223 = vst.msk [vmem:[#allocation2 + $0x8] sm:$0x1] %vm222_vm1, %v5356_v0  ;;  %v239_v7 = vsel %vm5445_vm3, 0, %v238_v5  ;;  %v291_v8 = vld [vmem:[#allocation2 + $0x38] sm:$0x1]  ;;  %v283_v9 = vsel %vm5454_vm7, 0, %v282_v6  ;;  %vm5487_vm10 = vmor %vm230_vm2, %vm362_vm8 }
  0x1a   : > { %227 = vst.msk [vmem:[#allocation2 + $0xd4] sm:$0x1] %vm222_vm1, %v5356_v0  ;;  %v292_v10 = vsel %vm5454_vm7, 0, %v291_v8  ;;  %v288_v11 = vld [vmem:[#allocation2 + $0x2c] sm:$0x1]  ;;  %vm1522_vm12 = vcmask 1042432  }
  0x1b   : > { %234 = vst [vmem:[#allocation2 + $0xc] sm:$0x1] %v233_v4  ;;  %v330_v13 = vld [vmem:[%s5468_s30] sm:$0xf]  ;;  %v331_v14 = vld [vmem:[%s5468_s30 + $0x4] sm:$0xf] }
  0x1c   : > { %v862_v12 = vld [vmem:[#allocation2] sm:$0xf]  ;;  %v365_v18 = vshrl.u32 %v330_v13, 16  ;;  %v368_v19 = vshll.u32 %v330_v13, 16  ;;  %v373_v22 = vshrl.u32 %v331_v14, 16  ;;  %v376_v23 = vshll.u32 %v331_v14, 16 }
  0x1d   : > { %v863_v15 = vld [vmem:[#allocation2 + $0x4] sm:$0xf]  ;;  %v914_v16 = vshrl.u32 %v862_v12, 16  ;;  %v917_v17 = vshll.u32 %v862_v12, 16  ;;  %240 = vst [vmem:[#allocation2 + $0x24] sm:$0x1] %v239_v7 }
  0x1e   : > { %v923_v20 = vshll.u32 %v863_v15, 16  ;;  %v927_v21 = vshrl.u32 %v863_v15, 16  ;;  %v367_v26 = vrot.slane %v365_v18, 7  ;;  %v334_v27 = vld [vmem:[%s5468_s30 + $0x10] sm:$0xf]  ;;  %v289_v28 = vsel %vm5454_vm7, 0, %v288_v11 }
  0x1f   : > { %v916_v24 = vrot.slane %v914_v16, 4  ;;  %v919_v25 = vrot.slane %v917_v17, 5  ;;  %v375_v33 = vrot.slane %v373_v22, 7  ;;  %v399_v34 = vshrl.u32 %v334_v27, 16  ;;  %v335_v40 = vld [vmem:[%s5468_s30 + $0x14] sm:$0xf] }
  0x20   : > { %v925_v29 = vrot.slane %v923_v20, 5  ;;  %v929_v30 = vrot.slane %v927_v21, 4  ;;  %v864_v32 = vld [vmem:[#allocation2 + $0x8] sm:$0x1]  ;;  %v370_v38 = vor.u32 %v368_v19, %v367_v26  ;;  %v371_v39 = vrot.slane %v367_v26, 4  ;;  %s5296_s27 = scalar_lea.hbm %s7381_s3, 256 }
  0x21   : > { %v920_v35 = vor.u32 %v919_v25, %v916_v24  ;;  %v933_v36 = vshll.u32 %v864_v32, 16  ;;  %284 = vst [vmem:[#allocation2 + $0x14] sm:$0x1] %v283_v9  ;;  %v378_v42 = vor.u32 %v376_v23, %v375_v33  ;;  %v401_v44 = vrot.slane %v399_v34, 7  ;;  %v5501_v50 = vld [vmem:[%s5468_s30 + $0x18] sm:$0xf] }
  0x22   : > { %v686_v43 = vld [vmem:[#allocation2 + $0xc] sm:$0xf]  ;;  %v402_v45 = vshll.u32 %v334_v27, 16  ;;  %293 = vst [vmem:[#allocation2 + $0x38] sm:$0x1] %v292_v10  ;;  %v930_v47 = vor.u32 %v929_v30, %v925_v29  ;;  %v407_v49 = vshrl.u32 %v335_v40, 16 }
  0x23   : > { %v921_v46 = vrot.slane %v920_v35, 4  ;;  %v687_v48 = vsel %vm5481_vm9, %v370_v38, %v686_v43  ;;  %v935_v51 = vrot.slane %v933_v36, 5  ;;  %v379_v52 = vsel %vm5487_vm10, %v371_v39, %v378_v42  ;;  %v337_v55 = vld [vmem:[%s5468_s30 + $0x1c] sm:$0xf]  ;;  %290 = vst [vmem:[#allocation2 + $0x2c] sm:$0x1] %v289_v28 }
  0x24   : > { %688 = vst [vmem:[#allocation2 + $0xc] sm:$0xf] %v687_v48  ;;  %v404_v53 = vor.u32 %v402_v45, %v401_v44  ;;  %v405_v54 = vrot.slane %v401_v44, 4  ;;  %v409_v57 = vrot.slane %v407_v49, 7  ;;  %v410_v58 = vshll.u32 %v335_v40, 16 }
  0x25   : > { %v926_v56 = vsel %vm5494_vm11, %v921_v46, %v925_v29  ;;  %689 = vst.msk [vmem:[#allocation2 + $0x10] sm:$0xf] %vm219_vm0, %v379_v52  ;;  %v700_v59 = vld [vmem:[#allocation2 + $0x24] sm:$0xf]  ;;  %v380_v61 = vrot.slane %v375_v33, 4  ;;  %v416_v62 = vshrl.u32 %v5501_v50, 16 }
  0x26   : > { %1297 = vrot.lane.b32.xlu0 %v926_v56, %s5357_s4  ;;  %v701_v60 = vsel %vm5481_vm9, %v404_v53, %v700_v59  ;;  %v247_v63 = vld [vmem:[#allocation2 + $0x48] sm:$0x1]  ;;  %v931_v0 = vrot.slane %v930_v47, 4  ;;  %v412_v2 = vor.u32 %v410_v58, %v409_v57  ;;  %v424_v4 = vshrl.u32 %v337_v55, 16  ;;  %v341_v29 = vld [vmem:[%s5468_s30 + $0x2c] sm:$0xf] }
  0x27   : > { %702 = vst [vmem:[#allocation2 + $0x24] sm:$0xf] %v701_v60  ;;  %v427_v5 = vshll.u32 %v337_v55, 16  ;;  %v5513_v7 = vrot.slane %v416_v62, 7  ;;  %v248_v8 = vsel %vm5445_vm3, 0, %v247_v63  ;;  %v414_v14 = vrot.slane %v409_v57, 4 }
  0x28   : > { %v690_v6 = vld [vmem:[#allocation2 + $0x14] sm:$0x1]  ;;  %v413_v9 = vsel %vm5487_vm10, %v405_v54, %v412_v2  ;;  %v426_v11 = vrot.slane %v424_v4, 7  ;;  %249 = vst [vmem:[#allocation2 + $0x48] sm:$0x1] %v248_v8  ;;  %v936_v16 = vsel %vm5494_vm11, %v931_v0, %v935_v51  ;;  %v458_v44 = vshrl.u32 %v341_v29, 16 }
  0x29   : > { %v691_v10 = vsel %vm5445_vm3, %v380_v61, %v690_v6  ;;  %v711_v12 = vld [vmem:[#allocation2 + $0x38] sm:$0x1]  ;;  %703 = vst.msk [vmem:[#allocation2 + $0x28] sm:$0xf] %vm219_vm0, %v413_v9  ;;  %v422_v13 = vrot.slane %v5513_v7, 4  ;;  %v461_v51 = vshll.u32 %v341_v29, 16 }
  0x2a   : > { %v340_v15 = vld [vmem:[%s5468_s30 + $0x28] sm:$0xf]  ;;  %692 = vst [vmem:[#allocation2 + $0x14] sm:$0x1] %v691_v10  ;;  %v429_v18 = vor.u32 %v427_v5, %v426_v11  ;;  %v431_v19 = vrot.slane %v426_v11, 4  ;;  %v5537_v2 = vrot.slane %v458_v44, 7 }
  0x2b   : > { %v865_v17 = vld [vmem:[#allocation2 + $0xc] sm:$0xf]  ;;  %v450_v23 = vshrl.u32 %v340_v15, 16  ;;  %v453_v43 = vshll.u32 %v340_v15, 16  ;;  %v235_v45 = vld [vmem:[#allocation2 + $0x18] sm:$0x1] }
  0x2c   : > { %v866_v20 = vld [vmem:[#allocation2 + $0x10] sm:$0xf]  ;;  %v938_v21 = vshrl.u32 %v865_v17, 16  ;;  %v941_v22 = vshll.u32 %v865_v17, 16  ;;  %v430_v26 = vsel %vm5487_vm10, %v422_v13, %v429_v18  ;;  %v712_v27 = vsel %vm5445_vm3, %v431_v19, %v711_v12  ;;  %v704_v28 = vld [vmem:[#allocation2 + $0x2c] sm:$0x1] }
  0x2d   : > { %v947_v24 = vshll.u32 %v866_v20, 16  ;;  %v951_v25 = vshrl.u32 %v866_v20, 16  ;;  %710 = vst.msk [vmem:[#allocation2 + $0x34] sm:$0xf] %vm219_vm0, %v430_v26  ;;  %v705_v34 = vsel %vm5445_vm3, %v414_v14, %v704_v28  ;;  %v452_v42 = vrot.slane %v450_v23, 7 }
  0x2e   : > { %1299 = vrot.lane.b32.xlu0 %v936_v16, %s5357_s4  ;;  %v940_v30 = vrot.slane %v938_v21, 4  ;;  %v943_v32 = vrot.slane %v941_v22, 5  ;;  %v871_v33 = vld [vmem:[#allocation2 + $0x24] sm:$0xf]  ;;  %713 = vst [vmem:[#allocation2 + $0x38] sm:$0x1] %v712_v27  ;;  %v463_v14 = vor.u32 %v461_v51, %v5537_v2 }
  0x2f   : > { %v949_v35 = vrot.slane %v947_v24, 5  ;;  %v953_v36 = vrot.slane %v951_v25, 4  ;;  %v986_v38 = vshrl.u32 %v871_v33, 16  ;;  %v989_v39 = vshll.u32 %v871_v33, 16  ;;  %706 = vst [vmem:[#allocation2 + $0x2c] sm:$0x1] %v705_v34 }
  0x30   : > { %v944_v40 = vor.u32 %v943_v32, %v940_v30  ;;  %v872_v46 = vld [vmem:[#allocation2 + $0x28] sm:$0xf]  ;;  %v455_v56 = vor.u32 %v453_v43, %v452_v42  ;;  %v456_v60 = vrot.slane %v452_v42, 4  ;;  %v236_v10 = vsel %vm5445_vm3, 0, %v235_v45  ;;  %v333_v23 = vld [vmem:[%s5468_s30 + $0xc] sm:$0xf] }
  0x31   : > { %v988_v47 = vrot.slane %v986_v38, 4  ;;  %v991_v48 = vrot.slane %v989_v39, 5  ;;  %v954_v49 = vor.u32 %v953_v36, %v949_v35  ;;  %v995_v53 = vshll.u32 %v872_v46, 16  ;;  %v867_v55 = vld [vmem:[#allocation2 + $0x14] sm:$0x1] }
  0x32   : > { %v945_v52 = vrot.slane %v944_v40, 4  ;;  %v999_v54 = vshrl.u32 %v872_v46, 16  ;;  %v957_v59 = vshll.u32 %v867_v55, 16  ;;  %v721_v61 = vld [vmem:[#allocation2 + $0x48] sm:$0xf]  ;;  %v464_v25 = vsel %vm5487_vm10, %v456_v60, %v463_v14 }
  0x33   : > { %v992_v57 = vor.u32 %v991_v48, %v988_v47  ;;  %v955_v58 = vrot.slane %v954_v49, 4  ;;  %v997_v63 = vrot.slane %v995_v53, 5  ;;  %v332_v4 = vld [vmem:[%s5468_s30 + $0x8] sm:$0xf]  ;;  %v722_v9 = vsel %vm5481_vm9, %v455_v56, %v721_v61  ;;  %237 = vst [vmem:[#allocation2 + $0x18] sm:$0x1] %v236_v10 }
  0x34   : > { %v950_v62 = vsel %vm5494_vm11, %v945_v52, %v949_v35  ;;  %v1001_v0 = vrot.slane %v999_v54, 4  ;;  %v959_v6 = vrot.slane %v957_v59, 5  ;;  %v875_v8 = vld [vmem:[#allocation2 + $0x34] sm:$0xf]  ;;  %723 = vst [vmem:[#allocation2 + $0x48] sm:$0xf] %v722_v9 }
  0x35   : > { %1301 = vrot.lane.b32.xlu1 %v950_v62, %s5357_s4  ;;  %v993_v5 = vrot.slane %v992_v57, 4  ;;  %v876_v11 = vld [vmem:[#allocation2 + $0x38] sm:$0x1]  ;;  %v1019_v12 = vshll.u32 %v875_v8, 16  ;;  %v1023_v13 = vshrl.u32 %v875_v8, 16  ;;  %v382_v19 = vshrl.u32 %v332_v4, 16 }
  0x36   : > { %v1029_v16 = vshll.u32 %v876_v11, 16  ;;  %v873_v17 = vld [vmem:[#allocation2 + $0x2c] sm:$0x1]  ;;  %v1002_v18 = vor.u32 %v1001_v0, %v997_v63  ;;  %v960_v20 = vsel %vm5494_vm11, %v955_v58, %v959_v6  ;;  %v385_v27 = vshll.u32 %v332_v4, 16  ;;  %v244_v28 = vld [vmem:[#allocation2 + $0x3c] sm:$0x1] }
  0x37   : > { %v998_v15 = vsel %vm5494_vm11, %v993_v5, %v997_v63  ;;  %v5551_v21 = vrot.slane %v1019_v12, 5  ;;  %v1025_v22 = vrot.slane %v1023_v13, 4  ;;  %v1005_v24 = vshll.u32 %v873_v17, 16  ;;  %724 = vst.msk [vmem:[#allocation2 + $0x4c] sm:$0xf] %vm219_vm0, %v464_v25 }
  0x38   : > { %1309 = vrot.lane.b32.xlu0 %v998_v15, %s5357_s4  ;;  %v384_v26 = vrot.slane %v382_v19, 7  ;;  %v1031_v30 = vrot.slane %v1029_v16, 5  ;;  %v390_v32 = vshrl.u32 %v333_v23, 16  ;;  %v393_v33 = vshll.u32 %v333_v23, 16  ;;  %v338_v38 = vld [vmem:[%s5468_s30 + $0x20] sm:$0xf] }
  0x39   : > { %v1026_v29 = vor.u32 %v1025_v22, %v5551_v21  ;;  %v1003_v34 = vrot.slane %v1002_v18, 4  ;;  %v245_v36 = vsel %vm5445_vm3, 0, %v244_v28  ;;  %v339_v39 = vld [vmem:[%s5468_s30 + $0x24] sm:$0xf]  ;;  %v433_v44 = vshrl.u32 %v338_v38, 16 }
  0x3a   : > { %v387_v35 = vor.u32 %v385_v27, %v384_v26  ;;  %v388_v42 = vrot.slane %v384_v26, 4  ;;  %v5562_v43 = vrot.slane %v390_v32, 7  ;;  %246 = vst [vmem:[#allocation2 + $0x3c] sm:$0x1] %v245_v36  ;;  %v1007_v45 = vrot.slane %v1005_v24, 5 }
  0x3b   : > { %v1027_v40 = vrot.slane %v1026_v29, 4  ;;  %v880_v46 = vld [vmem:[#allocation2 + $0x48] sm:$0xf]  ;;  %v436_v47 = vshll.u32 %v338_v38, 16  ;;  %v441_v48 = vshrl.u32 %v339_v39, 16  ;;  %v444_v49 = vshll.u32 %v339_v39, 16 }
  0x3c   : > { %v1058_v52 = vshrl.u32 %v880_v46, 16  ;;  %v1061_v53 = vshll.u32 %v880_v46, 16  ;;  %v395_v54 = vor.u32 %v393_v33, %v5562_v43  ;;  %v693_v55 = vld [vmem:[#allocation2 + $0x18] sm:$0xf]  ;;  %v300_v56 = vld [vmem:[#allocation2 + $0x5c] sm:$0x1]  ;;  %v1008_v11 = vsel %vm5494_vm11, %v1003_v34, %v1007_v45 }
  0x3d   : > { %1303 = vrot.lane.b32.xlu1 %v960_v20, %s5357_s4  ;;  %v1032_v51 = vsel %vm5494_vm11, %v1027_v40, %v1031_v30  ;;  %v694_v57 = vsel %vm5481_vm9, %v387_v35, %v693_v55  ;;  %v435_v58 = vrot.slane %v433_v44, 7  ;;  %v5570_v59 = vrot.slane %v441_v48, 7  ;;  %v5575_v61 = vld [vmem:[%s5468_s30 + $0x30] sm:$0xf]  ;;  %v343_v4 = vld [vmem:[%s5468_s30 + $0x34] sm:$0xf] }
  0x3e   : > { %v301_v60 = vsel %vm5454_vm7, 0, %v300_v56  ;;  %v1060_v62 = vrot.slane %v1058_v52, 4  ;;  %v1063_v63 = vrot.slane %v1061_v53, 5  ;;  %v396_v0 = vsel %vm5487_vm10, %v388_v42, %v395_v54  ;;  %695 = vst [vmem:[#allocation2 + $0x18] sm:$0xf] %v694_v57 }
  0x3f   : > { %v881_v5 = vld [vmem:[#allocation2 + $0x4c] sm:$0xf]  ;;  %696 = vst.msk [vmem:[#allocation2 + $0x1c] sm:$0xf] %vm219_vm0, %v396_v0  ;;  %v438_v6 = vor.u32 %v436_v47, %v435_v58  ;;  %v439_v8 = vrot.slane %v435_v58, 4  ;;  %v446_v9 = vor.u32 %v444_v49, %v5570_v59  ;;  %v467_v10 = vshrl.u32 %v5575_v61, 16 }
  0x40   : > { %1315 = vrot.lane.b32.xlu0 %v1032_v51, %s5357_s4  ;;  %v1064_v12 = vor.u32 %v1063_v63, %v1060_v62  ;;  %v1067_v13 = vshll.u32 %v881_v5, 16  ;;  %v1071_v14 = vshrl.u32 %v881_v5, 16  ;;  %302 = vst [vmem:[#allocation2 + $0x5c] sm:$0x1] %v301_v60  ;;  %v475_v18 = vshrl.u32 %v343_v4, 16 }
  0x41   : > { %v447_v15 = vsel %vm5487_vm10, %v439_v8, %v446_v9  ;;  %v714_v16 = vld [vmem:[#allocation2 + $0x3c] sm:$0xf]  ;;  %v5588_v17 = vrot.slane %v467_v10, 7  ;;  %v478_v19 = vshll.u32 %v343_v4, 16  ;;  %v285_v24 = vld [vmem:[#allocation2 + $0x20] sm:$0x1] }
  0x42   : > { %v1065_v20 = vrot.slane %v1064_v12, 4  ;;  %v1069_v22 = vrot.slane %v1067_v13, 5  ;;  %v715_v23 = vsel %vm5481_vm9, %v438_v6, %v714_v16  ;;  %717 = vst.msk [vmem:[#allocation2 + $0x40] sm:$0xf] %vm219_vm0, %v447_v15  ;;  %v419_v25 = vshll.u32 %v5501_v50, 16 }
  0x43   : > { %716 = vst [vmem:[#allocation2 + $0x3c] sm:$0xf] %v715_v23  ;;  %v473_v26 = vrot.slane %v5588_v17, 4  ;;  %v477_v27 = vrot.slane %v475_v18, 7  ;;  %v286_v28 = vsel %vm5454_vm7, 0, %v285_v24  ;;  %v465_v32 = vrot.slane %v5537_v2, 4 }
  0x44   : > { %v1070_v29 = vsel %vm5494_vm11, %v1065_v20, %v1069_v22  ;;  %287 = vst [vmem:[#allocation2 + $0x20] sm:$0x1] %v286_v28  ;;  %v297_v30 = vld [vmem:[#allocation2 + $0x50] sm:$0x1]  ;;  %v1073_v33 = vrot.slane %v1071_v14, 4  ;;  %v397_v54 = vrot.slane %v5562_v43, 4 }
  0x45   : > { %1311 = vrot.lane.b32.xlu1 %v1008_v11, %s5357_s4  ;;  %v868_v34 = vld [vmem:[#allocation2 + $0x18] sm:$0xf]  ;;  %v480_v35 = vor.u32 %v478_v19, %v477_v27  ;;  %v482_v36 = vrot.slane %v477_v27, 4  ;;  %v298_v38 = vsel %vm5454_vm7, 0, %v297_v30  ;;  %v256_v39 = vld [vmem:[#allocation2 + $0x6c] sm:$0x1] }
  0x46   : > { %v869_v40 = vld [vmem:[#allocation2 + $0x1c] sm:$0xf]  ;;  %v962_v42 = vshrl.u32 %v868_v34, 16  ;;  %v965_v44 = vshll.u32 %v868_v34, 16  ;;  %299 = vst [vmem:[#allocation2 + $0x50] sm:$0x1] %v298_v38  ;;  %v1074_v45 = vor.u32 %v1073_v33, %v1069_v22 }
  0x47   : > { %v971_v46 = vshll.u32 %v869_v40, 16  ;;  %v975_v47 = vshrl.u32 %v869_v40, 16  ;;  %v481_v2 = vsel %vm5487_vm10, %v473_v26, %v480_v35  ;;  %v732_v48 = vld [vmem:[#allocation2 + $0x5c] sm:$0x1]  ;;  %v257_v49 = vsel %vm5445_vm3, 0, %v256_v39 }
  0x48   : > { %1321 = vrot.lane.b32.xlu0 %v1070_v29, %s5357_s4  ;;  %v964_v51 = vrot.slane %v962_v42, 4  ;;  %v967_v52 = vrot.slane %v965_v44, 5  ;;  %731 = vst.msk [vmem:[#allocation2 + $0x58] sm:$0xf] %vm219_vm0, %v481_v2  ;;  %v733_v53 = vsel %vm5445_vm3, %v482_v36, %v732_v48  ;;  %v5615_v63 = vrot.slane %v1074_v45, 4 }
  0x49   : > { %v973_v55 = vrot.slane %v971_v46, 5  ;;  %v977_v56 = vrot.slane %v975_v47, 4  ;;  %v5612_v57 = vld [vmem:[#allocation2 + $0x40] sm:$0xf]  ;;  %734 = vst [vmem:[#allocation2 + $0x5c] sm:$0x1] %v733_v53 }
  0x4a   : > { %v968_v58 = vor.u32 %v967_v52, %v964_v51  ;;  %v877_v60 = vld [vmem:[#allocation2 + $0x3c] sm:$0xf]  ;;  %v1043_v62 = vshll.u32 %v5612_v57, 16  ;;  %258 = vst [vmem:[#allocation2 + $0x6c] sm:$0x1] %v257_v49  ;;  %vm1523_vm13 = vcmask 1046532  }
  0x4b   : > { %v1034_v0 = vshrl.u32 %v877_v60, 16  ;;  %v1037_v4 = vshll.u32 %v877_v60, 16  ;;  %v697_v5 = vld [vmem:[#allocation2 + $0x20] sm:$0x1]  ;;  %v978_v6 = vor.u32 %v977_v56, %v973_v55  ;;  %v347_v11 = vld [vmem:[%s5468_s30 + $0x44] sm:$0xf]  ;;  %vm5900_vm14 = vmor %vm1522_vm12, %vm1523_vm13 }
  0x4c   : > { %v346_v8 = vld [vmem:[%s5468_s30 + $0x40] sm:$0xf]  ;;  %v969_v9 = vrot.slane %v968_v58, 4  ;;  %v5618_v43 = vrot.slane %v1043_v62, 5  ;;  %v698_v10 = vsel %vm5445_vm3, %v397_v54, %v697_v5  ;;  %v509_v22 = vshrl.u32 %v347_v11, 16 }
  0x4d   : > { %v501_v12 = vshrl.u32 %v346_v8, 16  ;;  %v1036_v13 = vrot.slane %v1034_v0, 4  ;;  %v1039_v14 = vrot.slane %v1037_v4, 5  ;;  %699 = vst [vmem:[#allocation2 + $0x20] sm:$0x1] %v698_v10  ;;  %v5623_v15 = vrot.slane %v978_v6, 4 }
  0x4e   : > { %v504_v16 = vshll.u32 %v346_v8, 16  ;;  %v974_v18 = vsel %vm5494_vm11, %v969_v9, %v973_v55  ;;  %v725_v19 = vld [vmem:[#allocation2 + $0x50] sm:$0x1]  ;;  %v512_v23 = vshll.u32 %v347_v11, 16  ;;  %v253_v29 = vld [vmem:[#allocation2 + $0x60] sm:$0x1] }
  0x4f   : > { %v503_v20 = vrot.slane %v501_v12, 7  ;;  %1305 = vrot.lane.b32.xlu2 %v974_v18, %s5357_s4  ;;  %v1040_v24 = vor.u32 %v1039_v14, %v1036_v13  ;;  %v884_v26 = vld [vmem:[#allocation2 + $0x58] sm:$0xf]  ;;  %v726_v27 = vsel %vm5445_vm3, %v465_v32, %v725_v19  ;;  %v241_v28 = vld [vmem:[#allocation2 + $0x30] sm:$0x1]  ;;  %v5630_v40 = vrot.slane %v509_v22, 7 }
  0x50   : > { %v885_v30 = vld [vmem:[#allocation2 + $0x5c] sm:$0x1]  ;;  %v1091_v33 = vshll.u32 %v884_v26, 16  ;;  %v1095_v34 = vshrl.u32 %v884_v26, 16  ;;  %727 = vst [vmem:[#allocation2 + $0x50] sm:$0x1] %v726_v27 }
  0x51   : > { %v506_v35 = vor.u32 %v504_v16, %v503_v20  ;;  %v1041_v36 = vrot.slane %v1040_v24, 4  ;;  %v1101_v38 = vshll.u32 %v885_v30, 16  ;;  %v507_v39 = vrot.slane %v503_v20, 4  ;;  %v742_v42 = vld [vmem:[#allocation2 + $0x6c] sm:$0xf] }
  0x52   : > { %v5632_v44 = vrot.slane %v1091_v33, 5  ;;  %v1097_v45 = vrot.slane %v1095_v34, 4  ;;  %v242_v46 = vsel %vm5445_vm3, 0, %v241_v28  ;;  %v344_v47 = vld [vmem:[%s5468_s30 + $0x38] sm:$0xf]  ;;  %v514_v49 = vor.u32 %v512_v23, %v5630_v40 }
  0x53   : > { %v743_v32 = vsel %vm5481_vm9, %v506_v35, %v742_v42  ;;  %v1046_v2 = vsel %vm5494_vm11, %v1041_v36, %v5618_v43  ;;  %v1103_v48 = vrot.slane %v1101_v38, 5  ;;  %v254_v51 = vsel %vm5445_vm3, 0, %v253_v29  ;;  %v345_v52 = vld [vmem:[%s5468_s30 + $0x3c] sm:$0xf]  ;;  %243 = vst [vmem:[#allocation2 + $0x30] sm:$0x1] %v242_v46 }
  0x54   : > { %744 = vst [vmem:[#allocation2 + $0x6c] sm:$0xf] %v743_v32  ;;  %1317 = vrot.lane.b32.xlu1 %v1046_v2, %s5357_s4  ;;  %v1098_v53 = vor.u32 %v1097_v45, %v5632_v44  ;;  %v870_v54 = vld [vmem:[#allocation2 + $0x20] sm:$0x1]  ;;  %v484_v55 = vshrl.u32 %v344_v47, 16  ;;  %v487_v56 = vshll.u32 %v344_v47, 16  ;;  %v515_v60 = vsel %vm5487_vm10, %v507_v39, %v514_v49 }
  0x55   : > { %v981_v58 = vshll.u32 %v870_v54, 16  ;;  %255 = vst [vmem:[#allocation2 + $0x60] sm:$0x1] %v254_v51  ;;  %v492_v62 = vshrl.u32 %v345_v52, 16  ;;  %v495_v0 = vshll.u32 %v345_v52, 16  ;;  %v1047_v8 = vshrl.u32 %v5612_v57, 16 }
  0x56   : > { %v1099_v4 = vrot.slane %v1098_v53, 4  ;;  %745 = vst.msk [vmem:[#allocation2 + $0x70] sm:$0xf] %vm219_vm0, %v515_v60  ;;  %v486_v5 = vrot.slane %v484_v55, 7  ;;  %v309_v6 = vld [vmem:[#allocation2 + $0x80] sm:$0x1]  ;;  %v421_v16 = vor.u32 %v419_v25, %v5513_v7 }
  0x57   : > { %v983_v9 = vrot.slane %v981_v58, 5  ;;  %v882_v10 = vld [vmem:[#allocation2 + $0x50] sm:$0x1]  ;;  %v5652_v11 = vrot.slane %v492_v62, 7  ;;  %v310_v12 = vsel %vm5454_vm7, 0, %v309_v6  ;;  %v1049_v42 = vrot.slane %v1047_v8, 4 }
  0x58   : > { %v1104_v13 = vsel %vm5494_vm11, %v1099_v4, %v1103_v48  ;;  %v1077_v14 = vshll.u32 %v882_v10, 16  ;;  %v490_v18 = vrot.slane %v486_v5, 4  ;;  %311 = vst [vmem:[#allocation2 + $0x80] sm:$0x1] %v310_v12  ;;  %v5662_v19 = vld [vmem:[%s5468_s30 + $0x48] sm:$0xf]  ;;  %v489_v20 = vor.u32 %v487_v56, %v486_v5 }
  0x59   : > { %1327 = vrot.lane.b32.xlu0 %v1104_v13, %s5357_s4  ;;  %v984_v57 = vsel %vm5494_vm11, %v5623_v15, %v983_v9  ;;  %v497_v22 = vor.u32 %v495_v0, %v5652_v11  ;;  %v349_v23 = vld [vmem:[%s5468_s30 + $0x4c] sm:$0xf]  ;;  %v518_v24 = vshrl.u32 %v5662_v19, 16  ;;  %v294_v26 = vld [vmem:[#allocation2 + $0x44] sm:$0x1]  ;;  %v1050_v56 = vor.u32 %v1049_v42, %v5618_v43 }
  0x5a   : > { %1307 = vrot.lane.b32.xlu2 %v984_v57, %s5357_s4  ;;  %v1079_v50 = vrot.slane %v1077_v14, 5  ;;  %v526_v25 = vshrl.u32 %v349_v23, 16  ;;  %v529_v27 = vshll.u32 %v349_v23, 16  ;;  %v295_v28 = vsel %vm5454_vm7, 0, %v294_v26  ;;  %v707_v33 = vld [vmem:[#allocation2 + $0x30] sm:$0xf] }
  0x5b   : > { %v889_v7 = vld [vmem:[#allocation2 + $0x6c] sm:$0xf]  ;;  %v498_v15 = vsel %vm5487_vm10, %v490_v18, %v497_v22  ;;  %v5676_v34 = vrot.slane %v518_v24, 7  ;;  %v708_v36 = vsel %vm5481_vm9, %v421_v16, %v707_v33  ;;  %296 = vst [vmem:[#allocation2 + $0x44] sm:$0x1] %v295_v28  ;;  %v470_v62 = vshll.u32 %v5575_v61, 16 }
  0x5c   : > { %v1130_v29 = vshrl.u32 %v889_v7, 16  ;;  %v1133_v30 = vshll.u32 %v889_v7, 16  ;;  %v1080_v35 = vsel %vm5494_vm11, %v5615_v63, %v1079_v50  ;;  %v735_v38 = vld [vmem:[#allocation2 + $0x60] sm:$0xf]  ;;  %738 = vst.msk [vmem:[#allocation2 + $0x64] sm:$0xf] %vm219_vm0, %v498_v15 }
  0x5d   : > { %v528_v39 = vrot.slane %v526_v25, 7  ;;  %1323 = vrot.lane.b32.xlu1 %v1080_v35, %s5357_s4  ;;  %v890_v45 = vld [vmem:[#allocation2 + $0x70] sm:$0xf]  ;;  %709 = vst [vmem:[#allocation2 + $0x30] sm:$0xf] %v708_v36  ;;  %v736_v47 = vsel %vm5481_vm9, %v489_v20, %v735_v38  ;;  %v524_v63 = vrot.slane %v5676_v34, 4 }
  0x5e   : > { %v1132_v32 = vrot.slane %v1130_v29, 4  ;;  %v1135_v46 = vrot.slane %v1133_v30, 5  ;;  %v1139_v2 = vshll.u32 %v890_v45, 16  ;;  %737 = vst [vmem:[#allocation2 + $0x60] sm:$0xf] %v736_v47  ;;  %v1143_v51 = vshrl.u32 %v890_v45, 16 }
  0x5f   : > { %v531_v48 = vor.u32 %v529_v27, %v528_v39  ;;  %v533_v52 = vrot.slane %v528_v39, 4  ;;  %v753_v53 = vld [vmem:[#allocation2 + $0x80] sm:$0x1]  ;;  %v306_v58 = vld [vmem:[#allocation2 + $0x74] sm:$0x1]  ;;  %v448_v6 = vrot.slane %v5570_v59, 4 }
  0x60   : > { %v1136_v49 = vor.u32 %v1135_v46, %v1132_v32  ;;  %v5688_v54 = vrot.slane %v1139_v2, 5  ;;  %v265_v60 = vld [vmem:[#allocation2 + $0x90] sm:$0x1]  ;;  %v307_v5 = vsel %vm5454_vm7, 0, %v306_v58  ;;  %v352_v43 = vld [vmem:[%s5468_s30 + $0x58] sm:$0xf] }
  0x61   : > { %v532_v55 = vsel %vm5487_vm10, %v524_v63, %v531_v48  ;;  %v754_v4 = vsel %vm5445_vm3, %v533_v52, %v753_v53  ;;  %v266_v8 = vsel %vm5445_vm3, 0, %v265_v60  ;;  %308 = vst [vmem:[#allocation2 + $0x74] sm:$0x1] %v307_v5  ;;  %v516_v12 = vrot.slane %v5630_v40, 4  ;;  %v353_v29 = vld [vmem:[%s5468_s30 + $0x5c] sm:$0xf] }
  0x62   : > { %v1137_v0 = vrot.slane %v1136_v49, 4  ;;  %752 = vst.msk [vmem:[#allocation2 + $0x7c] sm:$0xf] %vm219_vm0, %v532_v55  ;;  %v5709_v13 = vrot.slane %v1143_v51, 4  ;;  %v5714_v18 = vrot.slane %v1050_v56, 4  ;;  %v552_v57 = vshrl.u32 %v352_v43, 16 }
  0x63   : > { %755 = vst [vmem:[#allocation2 + $0x80] sm:$0x1] %v754_v4  ;;  %v5706_v10 = vld [vmem:[#allocation2 + $0x64] sm:$0xf]  ;;  %v555_v30 = vshll.u32 %v352_v43, 16  ;;  %v560_v49 = vshrl.u32 %v353_v29, 16 }
  0x64   : > { %v1142_v9 = vsel %vm5494_vm11, %v1137_v0, %v5688_v54  ;;  %v874_v14 = vld [vmem:[#allocation2 + $0x30] sm:$0xf]  ;;  %v1115_v59 = vshll.u32 %v5706_v10, 16  ;;  %v1119_v16 = vshrl.u32 %v5706_v10, 16  ;;  %267 = vst [vmem:[#allocation2 + $0x90] sm:$0x1] %v266_v8 }
  0x65   : > { %1333 = vrot.lane.b32.xlu0 %v1142_v9, %s5357_s4  ;;  %v1010_v20 = vshrl.u32 %v874_v14, 16  ;;  %v1013_v22 = vshll.u32 %v874_v14, 16  ;;  %v886_v23 = vld [vmem:[#allocation2 + $0x60] sm:$0xf]  ;;  %v718_v50 = vld [vmem:[#allocation2 + $0x44] sm:$0x1] }
  0x66   : > { %v1106_v24 = vshrl.u32 %v886_v23, 16  ;;  %v1109_v26 = vshll.u32 %v886_v23, 16  ;;  %v5716_v40 = vrot.slane %v1115_v59, 5  ;;  %v554_v7 = vrot.slane %v552_v57, 7  ;;  %v250_v36 = vld [vmem:[#allocation2 + $0x54] sm:$0x1] }
  0x67   : > { %v1012_v25 = vrot.slane %v1010_v20, 4  ;;  %v1015_v27 = vrot.slane %v1013_v22, 5  ;;  %v719_v28 = vsel %vm5445_vm3, %v448_v6, %v718_v50  ;;  %v262_v46 = vld [vmem:[#allocation2 + $0x84] sm:$0x1]  ;;  %v350_v56 = vld [vmem:[%s5468_s30 + $0x50] sm:$0xf] }
  0x68   : > { %v1108_v33 = vrot.slane %v1106_v24, 4  ;;  %v1111_v15 = vrot.slane %v1109_v26, 5  ;;  %720 = vst [vmem:[#allocation2 + $0x44] sm:$0x1] %v719_v28  ;;  %v557_v32 = vor.u32 %v555_v30, %v554_v7  ;;  %v746_v63 = vld [vmem:[#allocation2 + $0x74] sm:$0x1]  ;;  %v1146_v24 = vor.u32 %v5709_v13, %v5688_v54 }
  0x69   : > { %v893_v35 = vld [vmem:[#allocation2 + $0x7c] sm:$0xf]  ;;  %v1016_v38 = vor.u32 %v1015_v27, %v1012_v25  ;;  %v558_v48 = vrot.slane %v554_v7, 4  ;;  %v747_v55 = vsel %vm5445_vm3, %v516_v12, %v746_v63  ;;  %v5726_v0 = vrot.slane %v560_v49, 7  ;;  %v351_v12 = vld [vmem:[%s5468_s30 + $0x54] sm:$0xf] }
  0x6a   : > { %v894_v39 = vld [vmem:[#allocation2 + $0x80] sm:$0x1]  ;;  %v1163_v42 = vshll.u32 %v893_v35, 16  ;;  %v1167_v45 = vshrl.u32 %v893_v35, 16  ;;  %v1112_v47 = vor.u32 %v1111_v15, %v1108_v33  ;;  %748 = vst [vmem:[#allocation2 + $0x74] sm:$0x1] %v747_v55  ;;  %v472_v33 = vor.u32 %v470_v62, %v5588_v17 }
  0x6b   : > { %v1173_v2 = vshll.u32 %v894_v39, 16  ;;  %v1017_v51 = vrot.slane %v1016_v38, 4  ;;  %v563_v4 = vshll.u32 %v353_v29, 16  ;;  %v763_v8 = vld [vmem:[#allocation2 + $0x90] sm:$0xf]  ;;  %v251_v43 = vsel %vm5445_vm3, 0, %v250_v36 }
  0x6c   : > { %v5721_v52 = vrot.slane %v1163_v42, 5  ;;  %v1169_v53 = vrot.slane %v1167_v45, 4  ;;  %v1113_v58 = vrot.slane %v1112_v47, 4  ;;  %v263_v9 = vsel %vm5445_vm3, 0, %v262_v46  ;;  %252 = vst [vmem:[#allocation2 + $0x54] sm:$0x1] %v251_v43 }
  0x6d   : > { %v1175_v60 = vrot.slane %v1173_v2, 5  ;;  %v1022_v5 = vsel %vm5494_vm11, %v1017_v51, %v5551_v21  ;;  %v565_v59 = vor.u32 %v563_v4, %v5726_v0  ;;  %v764_v21 = vsel %vm5481_vm9, %v557_v32, %v763_v8  ;;  %v318_v20 = vld [vmem:[#allocation2 + $0xa4] sm:$0x1]  ;;  %264 = vst [vmem:[#allocation2 + $0x84] sm:$0x1] %v263_v9 }
  0x6e   : > { %v1170_v6 = vor.u32 %v1169_v53, %v5721_v52  ;;  %1313 = vrot.lane.b32.xlu2 %v1022_v5, %s5357_s4  ;;  %v1118_v14 = vsel %vm5494_vm11, %v1113_v58, %v5716_v40  ;;  %v535_v57 = vshrl.u32 %v350_v56, 16  ;;  %765 = vst [vmem:[#allocation2 + $0x90] sm:$0xf] %v764_v21  ;;  %v538_v26 = vshll.u32 %v350_v56, 16  ;;  %v5755_v54 = vld [vmem:[%s5468_s30 + $0x60] sm:$0xf] }
  0x6f   : > { %1329 = vrot.lane.b32.xlu1 %v1118_v14, %s5357_s4  ;;  %v879_v23 = vld [vmem:[#allocation2 + $0x44] sm:$0x1]  ;;  %v566_v7 = vsel %vm5487_vm10, %v558_v48, %v565_v59  ;;  %v543_v27 = vshrl.u32 %v351_v12, 16  ;;  %v546_v29 = vshll.u32 %v351_v12, 16  ;;  %v319_v30 = vsel %vm5454_vm7, 0, %v318_v20 }
  0x70   : > { %v1171_v22 = vrot.slane %v1170_v6, 4  ;;  %v1053_v50 = vshll.u32 %v879_v23, 16  ;;  %v537_v25 = vrot.slane %v535_v57, 7  ;;  %766 = vst.msk [vmem:[#allocation2 + $0x94] sm:$0xf] %vm219_vm0, %v566_v7  ;;  %v1147_v38 = vrot.slane %v1146_v24, 4 }
  0x71   : > { %v5761_v35 = vrot.slane %v543_v27, 7  ;;  %320 = vst [vmem:[#allocation2 + $0xa4] sm:$0x1] %v319_v30  ;;  %v891_v36 = vld [vmem:[#allocation2 + $0x74] sm:$0x1]  ;;  %v569_v45 = vshrl.u32 %v5755_v54, 16 }
  0x72   : > { %v1176_v28 = vsel %vm5494_vm11, %v1171_v22, %v1175_v60  ;;  %v1055_v13 = vrot.slane %v1053_v50, 5  ;;  %v541_v15 = vrot.slane %v537_v25, 4  ;;  %v540_v39 = vor.u32 %v538_v26, %v537_v25  ;;  %v355_v42 = vld [vmem:[%s5468_s30 + $0x64] sm:$0xf]  ;;  %v303_v61 = vld [vmem:[#allocation2 + $0x68] sm:$0x1] }
  0x73   : > { %1339 = vrot.lane.b32.xlu0 %v1176_v28, %s5357_s4  ;;  %v1149_v46 = vshll.u32 %v891_v36, 16  ;;  %v548_v47 = vor.u32 %v546_v29, %v5761_v35  ;;  %v577_v2 = vshrl.u32 %v355_v42, 16  ;;  %v728_v17 = vld [vmem:[#allocation2 + $0x54] sm:$0xf]  ;;  %v5769_v62 = vrot.slane %v569_v45, 7 }
  0x74   : > { %v1056_v32 = vsel %vm5494_vm11, %v5714_v18, %v1055_v13  ;;  %v580_v63 = vshll.u32 %v355_v42, 16  ;;  %v304_v48 = vsel %vm5454_vm7, 0, %v303_v61  ;;  %v1121_v49 = vrot.slane %v1119_v16, 4  ;;  %v315_v51 = vld [vmem:[#allocation2 + $0x98] sm:$0x1] }
  0x75   : > { %v1151_v53 = vrot.slane %v1149_v46, 5  ;;  %v898_v18 = vld [vmem:[#allocation2 + $0x90] sm:$0xf]  ;;  %v729_v55 = vsel %vm5481_vm9, %v472_v33, %v728_v17  ;;  %v549_v56 = vsel %vm5487_vm10, %v541_v15, %v548_v47  ;;  %v579_v58 = vrot.slane %v577_v2, 7  ;;  %305 = vst [vmem:[#allocation2 + $0x68] sm:$0x1] %v304_v48 }
  0x76   : > { %1319 = vrot.lane.b32.xlu2 %v1056_v32, %s5357_s4  ;;  %v1202_v60 = vshrl.u32 %v898_v18, 16  ;;  %v1205_v4 = vshll.u32 %v898_v18, 16  ;;  %730 = vst [vmem:[#allocation2 + $0x54] sm:$0xf] %v729_v55  ;;  %v756_v5 = vld [vmem:[#allocation2 + $0x84] sm:$0xf]  ;;  %v1122_v10 = vor.u32 %v1121_v49, %v5716_v40 }
  0x77   : > { %v1152_v16 = vsel %vm5494_vm11, %v1147_v38, %v1151_v53  ;;  %v899_v6 = vld [vmem:[#allocation2 + $0x94] sm:$0xf]  ;;  %v757_v8 = vsel %vm5481_vm9, %v540_v39, %v756_v5  ;;  %759 = vst.msk [vmem:[#allocation2 + $0x88] sm:$0xf] %vm219_vm0, %v549_v56  ;;  %v575_v43 = vrot.slane %v5769_v62, 4  ;;  %v582_v9 = vor.u32 %v580_v63, %v579_v58 }
  0x78   : > { %v521_v12 = vshll.u32 %v5662_v19, 16  ;;  %1335 = vrot.lane.b32.xlu1 %v1152_v16, %s5357_s4  ;;  %v1204_v14 = vrot.slane %v1202_v60, 4  ;;  %v1207_v59 = vrot.slane %v1205_v4, 5  ;;  %v1211_v40 = vshll.u32 %v899_v6, 16  ;;  %758 = vst [vmem:[#allocation2 + $0x84] sm:$0xf] %v757_v8 }
  0x79   : > { %v583_v21 = vsel %vm5487_vm10, %v575_v43, %v582_v9  ;;  %v584_v57 = vrot.slane %v579_v58, 4  ;;  %v774_v20 = vld [vmem:[#allocation2 + $0xa4] sm:$0x1]  ;;  %v499_v22 = vrot.slane %v5652_v11, 4  ;;  %v316_v23 = vsel %vm5454_vm7, 0, %v315_v51 }
  0x7a   : > { %v1208_v24 = vor.u32 %v1207_v59, %v1204_v14  ;;  %v5794_v26 = vrot.slane %v1211_v40, 5  ;;  %v1215_v50 = vshrl.u32 %v899_v6, 16  ;;  %773 = vst.msk [vmem:[#allocation2 + $0xa0] sm:$0xf] %vm219_vm0, %v583_v21  ;;  %v5797_v7 = vrot.slane %v1122_v10, 4 }
  0x7b   : > { %v775_v25 = vsel %vm5445_vm3, %v584_v57, %v774_v20  ;;  %317 = vst [vmem:[#allocation2 + $0x98] sm:$0x1] %v316_v23  ;;  %v274_v27 = vld [vmem:[#allocation2 + $0xb4] sm:$0x1]  ;;  %v358_v28 = vld [vmem:[%s5468_s30 + $0x70] sm:$0xf] }
  0x7c   : > { %v1209_v29 = vrot.slane %v1208_v24, 4  ;;  %776 = vst [vmem:[#allocation2 + $0xa4] sm:$0x1] %v775_v25  ;;  %v739_v11 = vld [vmem:[#allocation2 + $0x68] sm:$0x1]  ;;  %v275_v30 = vsel %vm5445_vm3, 0, %v274_v27 }
  0x7d   : > { %v883_v13 = vld [vmem:[#allocation2 + $0x54] sm:$0xf]  ;;  %v740_v33 = vsel %vm5445_vm3, %v499_v22, %v739_v11  ;;  %276 = vst [vmem:[#allocation2 + $0xb4] sm:$0x1] %v275_v30  ;;  %v567_v46 = vrot.slane %v5726_v0, 4  ;;  %v5815_v47 = vrot.slane %v1215_v50, 4 }
  0x7e   : > { %v359_v15 = vld [vmem:[%s5468_s30 + $0x74] sm:$0xf]  ;;  %v1214_v36 = vsel %vm5494_vm11, %v1209_v29, %v5794_v26  ;;  %v1082_v38 = vshrl.u32 %v883_v13, 16  ;;  %v1085_v39 = vshll.u32 %v883_v13, 16  ;;  %v5810_v42 = vld [vmem:[#allocation2 + $0x88] sm:$0xf] }
  0x7f   : > { %741 = vst [vmem:[#allocation2 + $0x68] sm:$0x1] %v740_v33  ;;  %1345 = vrot.lane.b32.xlu0 %v1214_v36, %s5357_s4  ;;  %v895_v45 = vld [vmem:[#allocation2 + $0x84] sm:$0xf]  ;;  %v1187_v32 = vshll.u32 %v5810_v42, 16  ;;  %v603_v2 = vshrl.u32 %v358_v28, 16 }
  0x80   : > { %v1084_v61 = vrot.slane %v1082_v38, 4  ;;  %v1087_v17 = vrot.slane %v1085_v39, 5  ;;  %v1178_v63 = vshrl.u32 %v895_v45, 16  ;;  %v1181_v48 = vshll.u32 %v895_v45, 16  ;;  %v259_v49 = vld [vmem:[#allocation2 + $0x78] sm:$0x1] }
  0x81   : > { %v5817_v51 = vrot.slane %v1187_v32, 5  ;;  %v902_v53 = vld [vmem:[#allocation2 + $0xa0] sm:$0xf]  ;;  %v605_v18 = vrot.slane %v603_v2, 7  ;;  %v606_v55 = vshll.u32 %v358_v28, 16  ;;  %v611_v56 = vshrl.u32 %v359_v15, 16 }
  0x82   : > { %v1088_v58 = vor.u32 %v1087_v17, %v1084_v61  ;;  %v1180_v60 = vrot.slane %v1178_v63, 4  ;;  %v1183_v4 = vrot.slane %v1181_v48, 5  ;;  %v1235_v5 = vshll.u32 %v902_v53, 16  ;;  %v767_v10 = vld [vmem:[#allocation2 + $0x98] sm:$0x1] }
  0x83   : > { %v903_v0 = vld [vmem:[#allocation2 + $0xa4] sm:$0x1]  ;;  %v1239_v16 = vshrl.u32 %v902_v53, 16  ;;  %v768_v6 = vsel %vm5445_vm3, %v567_v46, %v767_v10  ;;  %v608_v8 = vor.u32 %v606_v55, %v605_v18  ;;  %v609_v43 = vrot.slane %v605_v18, 4  ;;  %v271_v9 = vld [vmem:[#allocation2 + $0xa8] sm:$0x1] }
  0x84   : > { %v1089_v14 = vrot.slane %v1088_v58, 4  ;;  %v1184_v59 = vor.u32 %v1183_v4, %v1180_v60  ;;  %v5821_v40 = vrot.slane %v1235_v5, 5  ;;  %v1245_v21 = vshll.u32 %v903_v0, 16  ;;  %769 = vst [vmem:[#allocation2 + $0x98] sm:$0x1] %v768_v6 }
  0x85   : > { %v1241_v57 = vrot.slane %v1239_v16, 4  ;;  %v5823_v22 = vrot.slane %v611_v56, 7  ;;  %v614_v23 = vshll.u32 %v359_v15, 16  ;;  %v260_v24 = vsel %vm5445_vm3, 0, %v259_v49  ;;  %v784_v29 = vld [vmem:[#allocation2 + $0xb4] sm:$0xf] }
  0x86   : > { %v888_v20 = vld [vmem:[#allocation2 + $0x68] sm:$0x1]  ;;  %v1094_v50 = vsel %vm5494_vm11, %v1089_v14, %v5632_v44  ;;  %v1185_v25 = vrot.slane %v1184_v59, 4  ;;  %v1247_v27 = vrot.slane %v1245_v21, 5  ;;  %v785_v13 = vsel %vm5481_vm9, %v608_v8, %v784_v29  ;;  %261 = vst [vmem:[#allocation2 + $0x78] sm:$0x1] %v260_v24 }
  0x87   : > { %v1125_v28 = vshll.u32 %v888_v20, 16  ;;  %1325 = vrot.lane.b32.xlu2 %v1094_v50, %s5357_s4  ;;  %v1242_v11 = vor.u32 %v1241_v57, %v5821_v40  ;;  %v616_v30 = vor.u32 %v614_v23, %v5823_v22  ;;  %v272_v33 = vsel %vm5445_vm3, 0, %v271_v9  ;;  %v356_v15 = vld [vmem:[%s5468_s30 + $0x68] sm:$0xf]  ;;  %786 = vst [vmem:[#allocation2 + $0xb4] sm:$0xf] %v785_v13 }
  0x88   : > { %v1190_v44 = vsel %vm5494_vm11, %v1185_v25, %v5817_v51  ;;  %v1218_v38 = vor.u32 %v5815_v47, %v5794_v26  ;;  %v357_v39 = vld [vmem:[%s5468_s30 + $0x6c] sm:$0xf]  ;;  %v586_v45 = vshrl.u32 %v356_v15, 16  ;;  %273 = vst [vmem:[#allocation2 + $0xa8] sm:$0x1] %v272_v33  ;;  %v589_v2 = vshll.u32 %v356_v15, 16 }
  0x89   : > { %v1127_v36 = vrot.slane %v1125_v28, 5  ;;  %1341 = vrot.lane.b32.xlu1 %v1190_v44, %s5357_s4  ;;  %v1243_v32 = vrot.slane %v1242_v11, 4  ;;  %v617_v46 = vsel %vm5487_vm10, %v609_v43, %v616_v30  ;;  %v594_v61 = vshrl.u32 %v357_v39, 16  ;;  %v312_v58 = vld [vmem:[#allocation2 + $0x8c] sm:$0x1] }
  0x8a   : > { %787 = vst.msk [vmem:[#allocation2 + $0xb8] sm:$0xf] %vm219_vm0, %v617_v46  ;;  %v588_v17 = vrot.slane %v586_v45, 7  ;;  %v597_v63 = vshll.u32 %v357_v39, 16  ;;  %v523_v47 = vor.u32 %v521_v12, %v5676_v34  ;;  %v1219_v18 = vrot.slane %v1218_v38, 4 }
  0x8b   : > { %v1248_v48 = vsel %vm5494_vm11, %v1243_v32, %v1247_v27  ;;  %v900_v26 = vld [vmem:[#allocation2 + $0x98] sm:$0x1]  ;;  %v5853_v49 = vrot.slane %v594_v61, 7  ;;  %v1128_v53 = vsel %vm5494_vm11, %v5797_v7, %v1127_v36  ;;  %v313_v5 = vsel %vm5454_vm7, 0, %v312_v58  ;;  %v324_v19 = vld [vmem:[#allocation2 + $0xbc] sm:$0x1] }
  0x8c   : > { %1351 = vrot.lane.b32.xlu0 %v1248_v48, %s5357_s4  ;;  %v1221_v55 = vshll.u32 %v900_v26, 16  ;;  %v592_v56 = vrot.slane %v588_v17, 4  ;;  %v591_v60 = vor.u32 %v589_v2, %v588_v17  ;;  %314 = vst [vmem:[#allocation2 + $0x8c] sm:$0x1] %v313_v5  ;;  %v5869_v9 = vld [vmem:[#allocation2 + $0x4] sm:$0xf] }
  0x8d   : > { %v599_v4 = vor.u32 %v597_v63, %v5853_v49  ;;  %v749_v12 = vld [vmem:[#allocation2 + $0x78] sm:$0xf]  ;;  %v325_v21 = vsel %vm5454_vm7, 0, %v324_v19  ;;  %v550_v24 = vrot.slane %v5761_v35, 4  ;;  %v572_v50 = vshll.u32 %v5755_v54, 16 }
  0x8e   : > { %v1223_v34 = vrot.slane %v1221_v55, 5  ;;  %v907_v10 = vld [vmem:[#allocation2 + $0xb4] sm:$0xf]  ;;  %v750_v7 = vsel %vm5481_vm9, %v523_v47, %v749_v12  ;;  %326 = vst [vmem:[#allocation2 + $0xbc] sm:$0x1] %v325_v21  ;;  %v1191_v29 = vshrl.u32 %v5810_v42, 16 }
  0x8f   : > { %1331 = vrot.lane.b32.xlu2 %v1128_v53, %s5357_s4  ;;  %v600_v0 = vsel %vm5487_vm10, %v592_v56, %v599_v4  ;;  %v1274_v6 = vshrl.u32 %v907_v10, 16  ;;  %v1277_v8 = vshll.u32 %v907_v10, 16  ;;  %751 = vst [vmem:[#allocation2 + $0x78] sm:$0xf] %v750_v7  ;;  %v777_v43 = vld [vmem:[#allocation2 + $0xa8] sm:$0xf]  ;;  %v574_v42 = vor.u32 %v572_v50, %v5769_v62 }
  0x90   : > { %v1224_v16 = vsel %vm5494_vm11, %v1219_v18, %v1223_v34  ;;  %v778_v59 = vsel %vm5481_vm9, %v591_v60, %v777_v43  ;;  %780 = vst.msk [vmem:[#allocation2 + $0xac] sm:$0xf] %vm219_vm0, %v600_v0  ;;  %v268_v28 = vld [vmem:[#allocation2 + $0x9c] sm:$0x1]  ;;  %v1527_v11 = vrot.slane %v5869_v9, 5  ;;  %v618_v44 = vrot.slane %v5823_v22, 4 }
  0x91   : > { %1347 = vrot.lane.b32.xlu1 %v1224_v16, %s5357_s4  ;;  %v908_v14 = vld [vmem:[#allocation2 + $0xb8] sm:$0xf]  ;;  %v1276_v57 = vrot.slane %v1274_v6, 4  ;;  %v1279_v20 = vrot.slane %v1277_v8, 5  ;;  %779 = vst [vmem:[#allocation2 + $0xa8] sm:$0xf] %v778_v59 }
  0x92   : > { %v1283_v23 = vshll.u32 %v908_v14, 16  ;;  %v269_v13 = vsel %vm5445_vm3, 0, %v268_v28  ;;  %v1428_v15 = vld [vmem:[#allocation2 + $0x8] sm:$0x1]  ;;  %v1287_v38 = vshrl.u32 %v908_v14, 16  ;;  %v1529_v61 = vrot.slane %v1527_v11, 4 }
  0x93   : > { %v1280_v25 = vor.u32 %v1279_v20, %v1276_v57  ;;  %v760_v30 = vld [vmem:[#allocation2 + $0x8c] sm:$0x1]  ;;  %270 = vst [vmem:[#allocation2 + $0x9c] sm:$0x1] %v269_v13  ;;  %v1530_v22 = vrot.slane %v1428_v15, 5  ;;  %v1193_v17 = vrot.slane %v1191_v29, 4 }
  0x94   : > { %v5879_v27 = vrot.slane %v1283_v23, 5  ;;  %v761_v35 = vsel %vm5445_vm3, %v550_v24, %v760_v30  ;;  %v321_v55 = vld [vmem:[#allocation2 + $0xb0] sm:$0x1]  ;;  %v1289_v4 = vrot.slane %v1287_v38, 4  ;;  %v1432_v5 = vld [vmem:[#allocation2 + $0x18] sm:$0xe] }
  0x95   : > { %v1281_v33 = vrot.slane %v1280_v25, 4  ;;  %762 = vst [vmem:[#allocation2 + $0x8c] sm:$0x1] %v761_v35  ;;  %v788_v53 = vld [vmem:[#allocation2 + $0xbc] sm:$0x1]  ;;  %v1531_v19 = vsel %vm5900_vm14, %v1529_v61, %v1530_v22  ;;  %v1194_v34 = vor.u32 %v1193_v17, %v5817_v51  ;;  %v322_v7 = vsel %vm5454_vm7, 0, %v321_v55 }
  0x96   : > { %v892_v54 = vld [vmem:[#allocation2 + $0x78] sm:$0xf]  ;;  %v789_v18 = vsel %vm5445_vm3, %v618_v44, %v788_v53  ;;  %v5909_v12 = vld [vmem:[#allocation2 + $0x1c] sm:$0xf]  ;;  %323 = vst [vmem:[#allocation2 + $0xb0] sm:$0x1] %v322_v7  ;;  %v1290_v21 = vor.u32 %v1289_v4, %v5879_v27 }
  0x97   : > { %v1286_v36 = vsel %vm5494_vm11, %v1281_v33, %v5879_v27  ;;  %v1154_v39 = vshrl.u32 %v892_v54, 16  ;;  %v1157_v45 = vshll.u32 %v892_v54, 16  ;;  %v5892_v32 = vld [vmem:[#allocation2 + $0xac] sm:$0xf]  ;;  %790 = vst [vmem:[#allocation2 + $0xbc] sm:$0x1] %v789_v18 }
  0x98   : > { %1357 = vrot.lane.b32.xlu0 %v1286_v36, %s5357_s4  ;;  %v904_v46 = vld [vmem:[#allocation2 + $0xa8] sm:$0xf]  ;;  %v1259_v2 = vshll.u32 %v5892_v32, 16  ;;  %v1195_v57 = vrot.slane %v1194_v34, 4  ;;  %v4772_v20 = vrot.slane %v1432_v5, 9  ;;  %v1541_v23 = vrot.slane %v5909_v12, 5  ;;  %v1298_v24 = vpop.permute.xlu0 %1297 }
  0x99   : > { %v1156_v62 = vrot.slane %v1154_v39, 4  ;;  %v1159_v63 = vrot.slane %v1157_v45, 5  ;;  %v1250_v48 = vshrl.u32 %v904_v46, 16  ;;  %v1253_v26 = vshll.u32 %v904_v46, 16  ;;  %v798_v28 = vld [vmem:[#allocation2] sm:$0xf] }
  0x9a   : > { %v770_v10 = vld [vmem:[#allocation2 + $0x9c] sm:$0xf]  ;;  %v5913_v6 = vrot.slane %v1259_v2, 5  ;;  %vm1393_vm15 = vcmask 60448   ;;  %v5929_v29 = vld [vmem:[#allocation2 + $0x28] sm:$0xf] }
  0x9b   : > { %v1160_v56 = vor.u32 %v1159_v63, %v1156_v62  ;;  %v1252_v58 = vrot.slane %v1250_v48, 4  ;;  %v1255_v60 = vrot.slane %v1253_v26, 5  ;;  %v771_v43 = vsel %vm5481_vm9, %v574_v42, %v770_v10  ;;  %830 = vst.msk [vmem:[#allocation3] sm:$0xf] %vm219_vm0, %v798_v28  ;;  %v1437_v45 = vld [vmem:[#allocation2 + $0x2c] sm:$0x1] }
  0x9c   : > { %v897_v8 = vld [vmem:[#allocation2 + $0x8c] sm:$0x1]  ;;  %772 = vst [vmem:[#allocation2 + $0x9c] sm:$0xf] %v771_v43  ;;  %v1291_v30 = vrot.slane %v1290_v21, 4  ;;  %v1263_v33 = vshrl.u32 %v5892_v32, 16 }
  0x9d   : > { %v1161_v0 = vrot.slane %v1160_v56, 4  ;;  %v1256_v16 = vor.u32 %v1255_v60, %v1252_v58  ;;  %v1197_v14 = vshll.u32 %v897_v8, 16  ;;  %1394 = vst.msk [vmem:[#allocation3] sm:$0xf] %vm1393_vm15, %v1298_v24  ;;  %v781_v15 = vld [vmem:[#allocation2 + $0xb0] sm:$0x1] }
  0x9e   : > { %v909_v27 = vld [vmem:[#allocation2 + $0xbc] sm:$0x1]  ;;  %v1548_v42 = vrot.slane %v5929_v29, 5  ;;  %v1429_v46 = vld [vmem:[#allocation2 + $0xc] sm:$0xe]  ;;  %v1551_v26 = vrot.slane %v1437_v45, 5 }
  0x9f   : > { %v1166_v51 = vsel %vm5494_vm11, %v1161_v0, %v5721_v52  ;;  %v1257_v59 = vrot.slane %v1256_v16, 4  ;;  %v1199_v25 = vrot.slane %v1197_v14, 5  ;;  %v601_v52 = vrot.slane %v5853_v49, 4  ;;  %v5945_v2 = vld [vmem:[#allocation2 + $0x10] sm:$0xf] }
  0xa0   : > { %1337 = vrot.lane.b32.xlu2 %v1166_v51, %s5357_s4  ;;  %1639 = vrot.lane.b32.xlu0 %v1531_v19, %s5358_s5  ;;  %v1293_v13 = vshll.u32 %v909_v27, 16  ;;  %v1542_v49 = vsel %vm5900_vm14, %v4772_v20, %v1541_v23  ;;  %v799_v17 = vld [vmem:[#allocation2 + $0x4] sm:$0xf]  ;;  %v1300_v62 = vpop.permute.xlu0 %1299  ;;  %v802_v63 = vld [vmem:[#allocation2 + $0x18] sm:$0xf]  ;;  %v1550_v48 = vrot.slane %v1548_v42, 4 }
  0xa1   : > { %v1262_v50 = vsel %vm5494_vm11, %v1257_v59, %v5913_v6  ;;  %v1200_v35 = vsel %vm5494_vm11, %v1195_v57, %v1199_v25  ;;  %v782_v36 = vsel %vm5445_vm3, %v601_v52, %v781_v15  ;;  %v1265_v53 = vrot.slane %v1263_v33, 4  ;;  %831 = vst.msk [vmem:[#allocation3 + $0x4] sm:$0xf] %vm219_vm0, %v799_v17  ;;  %v800_v58 = vld [vmem:[#allocation2 + $0xc] sm:$0xf] }
  0xa2   : > { %1353 = vrot.lane.b32.xlu1 %v1262_v50, %s5357_s4  ;;  %v1295_v54 = vrot.slane %v1293_v13, 5  ;;  %783 = vst [vmem:[#allocation2 + $0xb0] sm:$0x1] %v782_v36  ;;  %v4771_v60 = vrot.slane %v1429_v46, 9  ;;  %v1534_v4 = vrot.slane %v5945_v2, 5  ;;  %v1552_v19 = vsel %vm5900_vm14, %v1550_v48, %v1551_v26 }
  0xa3   : > { %v901_v44 = vld [vmem:[#allocation2 + $0x9c] sm:$0xf]  ;;  %1395 = vst.msk [vmem:[#allocation3 + $0x4] sm:$0xf] %vm1393_vm15, %v1300_v62  ;;  %v1266_v10 = vor.u32 %v1265_v53, %v5913_v6  ;;  %v5964_v8 = vld [vmem:[#allocation2 + $0x40] sm:$0xf] }
  0xa4   : > { %v1226_v38 = vshrl.u32 %v901_v44, 16  ;;  %v1229_v39 = vshll.u32 %v901_v44, 16  ;;  %v1296_v32 = vsel %vm5494_vm11, %v1291_v30, %v1295_v54  ;;  %834 = vst.msk [vmem:[#allocation3 + $0x10] sm:$0xf] %vm219_vm0, %v802_v63  ;;  %v1441_v7 = vld [vmem:[#allocation2 + $0x3c] sm:$0xe]  ;;  %v1535_v43 = vsel %vm5900_vm14, %v4771_v60, %v1534_v4 }
  0xa5   : > { %832 = vst.msk [vmem:[#allocation3 + $0x8] sm:$0xf] %vm219_vm0, %v800_v58  ;;  %v1434_v6 = vld [vmem:[#allocation2 + $0x20] sm:$0x1]  ;;  %v804_v51 = vld [vmem:[#allocation2 + $0x24] sm:$0xf] }
  0xa6   : > { %v1228_v61 = vrot.slane %v1226_v38, 4  ;;  %v1231_v22 = vrot.slane %v1229_v39, 5  ;;  %v803_v59 = vld [vmem:[#allocation2 + $0x1c] sm:$0xf]  ;;  %v1267_v21 = vrot.slane %v1266_v10, 4  ;;  %v4775_v57 = vrot.slane %v1441_v7, 9 }
  0xa7   : > { %v1302_v56 = vpop.permute.xlu1 %1301  ;;  %v1562_v20 = vrot.slane %v5964_v8, 5  ;;  %836 = vst.msk [vmem:[#allocation3 + $0x18] sm:$0xf] %vm219_vm0, %v804_v51  ;;  %v5976_v24 = vld [vmem:[#allocation2 + $0x4c] sm:$0xf]  ;;  %v1543_v52 = vrot.slane %v1541_v23, 4 }
  0xa8   : > { %1343 = vrot.lane.b32.xlu2 %v1200_v35, %s5357_s4  ;;  %1645 = vrot.lane.b32.xlu0 %v1542_v49, %s5358_s5  ;;  %v1232_v55 = vor.u32 %v1231_v22, %v1228_v61  ;;  %1396 = vst.msk [vmem:[#allocation3 + $0x8] sm:$0xf] %vm1393_vm15, %v1302_v56  ;;  %v801_v50 = vld [vmem:[#allocation2 + $0x10] sm:$0xf]  ;;  %v1544_v28 = vrot.slane %v1434_v6, 5  ;;  %v1569_v33 = vrot.slane %v5976_v24, 5 }
  0xa9   : > { %v1306_v18 = vpop.permute.xlu2 %1305  ;;  %v906_v34 = vld [vmem:[#allocation2 + $0xb0] sm:$0x1]  ;;  %835 = vst.msk [vmem:[#allocation3 + $0x14] sm:$0xf] %vm219_vm0, %v803_v59  ;;  %v1563_v13 = vsel %vm5900_vm14, %v4775_v57, %v1562_v20  ;;  %v1426_v49 = vld [vmem:[#allocation2] sm:$0xe] }
  0xaa   : > { %1359 = vrot.lane.b32.xlu1 %v1296_v32, %s5357_s4  ;;  %v1233_v5 = vrot.slane %v1232_v55, 4  ;;  %1398 = vst.msk [vmem:[#allocation3 + $0x10] sm:$0xf] %vm1393_vm15, %v1306_v18  ;;  %v1269_v16 = vshll.u32 %v906_v34, 16  ;;  %v1310_v14 = vpop.permute.xlu0 %1309  ;;  %v1446_v15 = vld [vmem:[#allocation2 + $0x50] sm:$0x1]  ;;  %v1545_v12 = vsel %vm5900_vm14, %v1543_v52, %v1544_v28 }
  0xab   : > { %1400 = vst.msk [vmem:[#allocation3 + $0x18] sm:$0xf] %vm1393_vm15, %v1310_v14  ;;  %v1438_v23 = vld [vmem:[#allocation2 + $0x30] sm:$0xe]  ;;  %v5994_v35 = vld [vmem:[#allocation2 + $0x34] sm:$0xf] }
  0xac   : > { %v1238_v0 = vsel %vm5494_vm11, %v1233_v5, %v5821_v40  ;;  %v1271_v40 = vrot.slane %v1269_v16, 5  ;;  %833 = vst.msk [vmem:[#allocation3 + $0xc] sm:$0xf] %vm219_vm0, %v801_v50  ;;  %v807_v54 = vld [vmem:[#allocation2 + $0x34] sm:$0xf]  ;;  %v4770_v38 = vrot.slane %v1426_v49, 9 }
  0xad   : > { %v806_v36 = vld [vmem:[#allocation2 + $0x30] sm:$0xf]  ;;  %v1571_v39 = vrot.slane %v1569_v33, 4  ;;  %v1572_v45 = vrot.slane %v1446_v15, 5  ;;  %839 = vst.msk [vmem:[#allocation3 + $0x24] sm:$0xf] %vm219_vm0, %v807_v54 }
  0xae   : > { %v1272_v30 = vsel %vm5494_vm11, %v1267_v21, %v1271_v40  ;;  %v805_v32 = vld [vmem:[#allocation2 + $0x28] sm:$0xf]  ;;  %v4774_v61 = vrot.slane %v1438_v23, 9  ;;  %v1555_v22 = vrot.slane %v5994_v35, 5  ;;  %838 = vst.msk [vmem:[#allocation3 + $0x20] sm:$0xf] %vm219_vm0, %v806_v36  ;;  %v1528_v17 = vsel %vm5900_vm14, %v4770_v38, %v1527_v11 }
  0xaf   : > { %v1304_v25 = vpop.permute.xlu1 %1303  ;;  %837 = vst.msk [vmem:[#allocation3 + $0x1c] sm:$0xf] %vm219_vm0, %v805_v32  ;;  %v1573_v62 = vsel %vm5900_vm14, %v1571_v39, %v1572_v45  ;;  %v1431_v63 = vld [vmem:[#allocation2 + $0x14] sm:$0x1]  ;;  %v1450_v48 = vld [vmem:[#allocation2 + $0x60] sm:$0xe] }
  0xb0   : > { %1349 = vrot.lane.b32.xlu2 %v1238_v0, %s5357_s4  ;;  %1651 = vrot.lane.b32.xlu0 %v1552_v19, %s5358_s5  ;;  %1397 = vst.msk [vmem:[#allocation3 + $0xc] sm:$0xf] %vm1393_vm15, %v1304_v25  ;;  %v6011_v26 = vld [vmem:[#allocation2 + $0x64] sm:$0xf]  ;;  %v1556_v53 = vsel %vm5900_vm14, %v4774_v61, %v1555_v22  ;;  %v810_v11 = vld [vmem:[#allocation2 + $0x48] sm:$0xf] }
  0xb1   : > { %v1443_v9 = vld [vmem:[#allocation2 + $0x44] sm:$0x1]  ;;  %v809_v55 = vld [vmem:[#allocation2 + $0x40] sm:$0xf]  ;;  %v1536_v56 = vrot.slane %v1534_v4, 4  ;;  %v1537_v58 = vrot.slane %v1431_v63, 5 }
  0xb2   : > { %1641 = vrot.lane.b32.xlu1 %v1535_v43, %s5358_s5  ;;  %v1316_v44 = vpop.permute.xlu0 %1315  ;;  %v4778_v60 = vrot.slane %v1450_v48, 9  ;;  %v1583_v5 = vrot.slane %v6011_v26, 5  ;;  %842 = vst.msk [vmem:[#allocation3 + $0x30] sm:$0xf] %vm219_vm0, %v810_v11  ;;  %v6024_v19 = vld [vmem:[#allocation2 + $0x70] sm:$0xf] }
  0xb3   : > { %1403 = vst.msk [vmem:[#allocation3 + $0x24] sm:$0xf] %vm1393_vm15, %v1316_v44  ;;  %v808_v34 = vld [vmem:[#allocation2 + $0x3c] sm:$0xf]  ;;  %v1564_v10 = vrot.slane %v1562_v20, 4  ;;  %v1565_v7 = vrot.slane %v1443_v9, 5  ;;  %v1538_v4 = vsel %vm5900_vm14, %v1536_v56, %v1537_v58 }
  0xb4   : > { %v1308_v27 = vpop.permute.xlu2 %1307  ;;  %841 = vst.msk [vmem:[#allocation3 + $0x2c] sm:$0xf] %vm219_vm0, %v809_v55  ;;  %v1584_v0 = vsel %vm5900_vm14, %v4778_v60, %v1583_v5  ;;  %v1590_v16 = vrot.slane %v6024_v19, 5  ;;  %v1435_v8 = vld [vmem:[#allocation2 + $0x24] sm:$0xe]  ;;  %v1557_v38 = vrot.slane %v1555_v22, 4 }
  0xb5   : > { %1399 = vst.msk [vmem:[#allocation3 + $0x14] sm:$0xf] %vm1393_vm15, %v1308_v27  ;;  %v1455_v43 = vld [vmem:[#allocation2 + $0x74] sm:$0x1]  ;;  %v1566_v14 = vsel %vm5900_vm14, %v1564_v10, %v1565_v7  ;;  %v1447_v51 = vld [vmem:[#allocation2 + $0x54] sm:$0xe] }
  0xb6   : > { %840 = vst.msk [vmem:[#allocation3 + $0x28] sm:$0xf] %vm219_vm0, %v808_v34  ;;  %v6040_v59 = vld [vmem:[#allocation2 + $0x58] sm:$0xf]  ;;  %v812_v40 = vld [vmem:[#allocation2 + $0x54] sm:$0xf] }
  0xb7   : > { %v1312_v46 = vpop.permute.xlu1 %1311  ;;  %v813_v21 = vld [vmem:[#allocation2 + $0x58] sm:$0xf]  ;;  %v4773_v57 = vrot.slane %v1435_v8, 9  ;;  %v1592_v20 = vrot.slane %v1590_v16, 4  ;;  %v1593_v50 = vrot.slane %v1455_v43, 5  ;;  %v4777_v28 = vrot.slane %v1447_v51, 9 }
  0xb8   : > { %1355 = vrot.lane.b32.xlu2 %v1272_v30, %s5357_s4  ;;  %1657 = vrot.lane.b32.xlu0 %v1563_v13, %s5358_s5  ;;  %1401 = vst.msk [vmem:[#allocation3 + $0x1c] sm:$0xf] %vm1393_vm15, %v1312_v46  ;;  %v811_v52 = vld [vmem:[#allocation2 + $0x4c] sm:$0xf]  ;;  %v1576_v27 = vrot.slane %v6040_v59, 5  ;;  %vm1733_vm1 = vcmask 93248  }
  0xb9   : > { %845 = vst.msk [vmem:[#allocation3 + $0x3c] sm:$0xf] %vm219_vm0, %v813_v21  ;;  %v1549_v30 = vsel %vm5900_vm14, %v4773_v57, %v1548_v42  ;;  %v1594_v13 = vsel %vm5900_vm14, %v1592_v20, %v1593_v50  ;;  %v1440_v49 = vld [vmem:[#allocation2 + $0x38] sm:$0x1]  ;;  %v6056_v23 = vld [vmem:[#allocation2 + $0x88] sm:$0xf] }
  0xba   : > { %1647 = vrot.lane.b32.xlu1 %v1545_v12, %s5358_s5  ;;  %v1322_v18 = vpop.permute.xlu0 %1321  ;;  %844 = vst.msk [vmem:[#allocation3 + $0x38] sm:$0xf] %vm219_vm0, %v812_v40  ;;  %v1459_v12 = vld [vmem:[#allocation2 + $0x84] sm:$0xe]  ;;  %v1577_v44 = vsel %vm5900_vm14, %v4777_v28, %v1576_v27  ;;  %v1452_v29 = vld [vmem:[#allocation2 + $0x68] sm:$0x1] }
  0xbb   : > { %1406 = vst.msk [vmem:[#allocation3 + $0x30] sm:$0xf] %vm1393_vm15, %v1322_v18  ;;  %v816_v42 = vld [vmem:[#allocation2 + $0x6c] sm:$0xf]  ;;  %v815_v36 = vld [vmem:[#allocation2 + $0x64] sm:$0xf] }
  0xbc   : > { %843 = vst.msk [vmem:[#allocation3 + $0x34] sm:$0xf] %vm219_vm0, %v811_v52  ;;  %v1558_v39 = vrot.slane %v1440_v49, 5  ;;  %v4781_v45 = vrot.slane %v1459_v12, 9  ;;  %v1604_v32 = vrot.slane %v6056_v23, 5  ;;  %vm2487_vm2 = vcmask 158848  }
  0xbd   : > { %848 = vst.msk [vmem:[#allocation3 + $0x48] sm:$0xf] %vm219_vm0, %v816_v42  ;;  %v6069_v46 = vld [vmem:[#allocation2 + $0x94] sm:$0xf]  ;;  %v814_v61 = vld [vmem:[#allocation2 + $0x60] sm:$0xf] }
  0xbe   : > { %847 = vst.msk [vmem:[#allocation3 + $0x44] sm:$0xf] %vm219_vm0, %v815_v36  ;;  %v1559_v35 = vsel %vm5900_vm14, %v1557_v38, %v1558_v39  ;;  %v1605_v22 = vsel %vm5900_vm14, %v4781_v45, %v1604_v32  ;;  %v1611_v48 = vrot.slane %v6069_v46, 5  ;;  %v1444_v26 = vld [vmem:[#allocation2 + $0x48] sm:$0xe]  ;;  %v1606_v52 = vrot.slane %v1604_v32, 4 }
  0xbf   : > { %846 = vst.msk [vmem:[#allocation3 + $0x40] sm:$0xf] %vm219_vm0, %v814_v61  ;;  %v1456_v11 = vld [vmem:[#allocation2 + $0x78] sm:$0xe]  ;;  %v6083_v18 = vld [vmem:[#allocation2 + $0x7c] sm:$0xf] }
  0xc0   : > { %1637 = vrot.lane.b32.xlu2 %v1528_v17, %s5358_s5  ;;  %1663 = vrot.lane.b32.xlu0 %v1573_v62, %s5358_s5  ;;  %v1585_v17 = vrot.slane %v1583_v5, 4  ;;  %v1586_v62 = vrot.slane %v1452_v29, 5  ;;  %v819_v55 = vld [vmem:[#allocation2 + $0x7c] sm:$0xf]  ;;  %v818_v56 = vld [vmem:[#allocation2 + $0x78] sm:$0xf] }
  0xc1   : > { %v4776_v58 = vrot.slane %v1444_v26, 9  ;;  %v1613_v60 = vrot.slane %v1611_v48, 4  ;;  %851 = vst.msk [vmem:[#allocation3 + $0x54] sm:$0xf] %vm219_vm0, %v819_v55  ;;  %v4780_v34 = vrot.slane %v1456_v11, 9  ;;  %v1597_v10 = vrot.slane %v6083_v18, 5 }
  0xc2   : > { %1653 = vrot.lane.b32.xlu1 %v1556_v53, %s5358_s5  ;;  %v1464_v53 = vld [vmem:[#allocation2 + $0x98] sm:$0x1]  ;;  %v1587_v9 = vsel %vm5900_vm14, %v1585_v17, %v1586_v62  ;;  %850 = vst.msk [vmem:[#allocation3 + $0x50] sm:$0xf] %vm219_vm0, %v818_v56  ;;  %v817_v7 = vld [vmem:[#allocation2 + $0x70] sm:$0xf] }
  0xc3   : > { %v1614_v5 = vrot.slane %v1464_v53, 5  ;;  %849 = vst.msk [vmem:[#allocation3 + $0x4c] sm:$0xf] %vm219_vm0, %v817_v7  ;;  %v1468_v8 = vld [vmem:[#allocation2 + $0xa8] sm:$0xe]  ;;  %vm3018_vm4 = vcmask 224448  }
  0xc4   : > { %v6098_v43 = vld [vmem:[#allocation2 + $0xac] sm:$0xf]  ;;  %v822_v21 = vld [vmem:[#allocation2 + $0x90] sm:$0xf]  ;;  %v4784_v40 = vrot.slane %v1468_v8, 9  ;;  %vm4014_vm5 = vcmask 1041408  }
  0xc5   : > { %v1625_v57 = vrot.slane %v6098_v43, 5  ;;  %v821_v20 = vld [vmem:[#allocation2 + $0x88] sm:$0xf]  ;;  %v6110_v50 = vld [vmem:[#allocation2 + $0xb8] sm:$0xf]  ;;  %vm3579_vm6 = vcmask 257248  }
  0xc6   : > { %v1318_v2 = vpop.permute.xlu1 %1317  ;;  %854 = vst.msk [vmem:[#allocation3 + $0x60] sm:$0xf] %vm219_vm0, %v822_v21  ;;  %v1473_v12 = vld [vmem:[#allocation2 + $0xbc] sm:$0x1]  ;;  %v1465_v29 = vld [vmem:[#allocation2 + $0x9c] sm:$0xe] }
  0xc7   : > { %1404 = vst.msk [vmem:[#allocation3 + $0x28] sm:$0xf] %vm1393_vm15, %v1318_v2  ;;  %v1449_v2 = vld [vmem:[#allocation2 + $0x5c] sm:$0x1]  ;;  %v1626_v49 = vsel %vm5900_vm14, %v4784_v40, %v1625_v57  ;;  %v1466_v42 = vld [vmem:[#allocation2 + $0xa0] sm:$0xf] }
  0xc8   : > { %v1314_v6 = vpop.permute.xlu2 %1313  ;;  %1643 = vrot.lane.b32.xlu2 %v1538_v4, %s5358_s5  ;;  %1669 = vrot.lane.b32.xlu0 %v1584_v0, %s5358_s5  ;;  %v1570_v4 = vsel %vm5900_vm14, %v4776_v58, %v1569_v33  ;;  %v1615_v0 = vsel %vm5900_vm14, %v1613_v60, %v1614_v5  ;;  %v1579_v51 = vrot.slane %v1449_v2, 5  ;;  %v1461_v33 = vld [vmem:[#allocation2 + $0x8c] sm:$0x1]  ;;  %853 = vst.msk [vmem:[#allocation3 + $0x5c] sm:$0xf] %vm219_vm0, %v821_v20  ;;  %v1635_v39 = vrot.slane %v1473_v12, 5 }
  0xc9   : > { %1402 = vst.msk [vmem:[#allocation3 + $0x20] sm:$0xf] %vm1393_vm15, %v1314_v6  ;;  %v1598_v6 = vsel %vm5900_vm14, %v4780_v34, %v1597_v10  ;;  %v1607_v28 = vrot.slane %v1461_v33, 5  ;;  %v825_v36 = vld [vmem:[#allocation2 + $0xa0] sm:$0xf]  ;;  %v4783_v61 = vrot.slane %v1465_v29, 9 }
  0xca   : > { %1659 = vrot.lane.b32.xlu1 %v1566_v14, %s5358_s5  ;;  %v1578_v14 = vrot.slane %v1576_v27, 4  ;;  %v820_v27 = vld [vmem:[#allocation2 + $0x84] sm:$0xf]  ;;  %v824_v32 = vld [vmem:[#allocation2 + $0x9c] sm:$0xf]  ;;  %v1618_v17 = vrot.slane %v1466_v42, 5 }
  0xcb   : > { %v1328_v25 = vpop.permute.xlu0 %1327  ;;  %852 = vst.msk [vmem:[#allocation3 + $0x58] sm:$0xf] %vm219_vm0, %v820_v27  ;;  %v1608_v23 = vsel %vm5900_vm14, %v1606_v52, %v1607_v28  ;;  %v823_v62 = vld [vmem:[#allocation2 + $0x94] sm:$0xf]  ;;  %v1470_v53 = vld [vmem:[#allocation2 + $0xb0] sm:$0x1] }
  0xcc   : > { %1409 = vst.msk [vmem:[#allocation3 + $0x3c] sm:$0xf] %vm1393_vm15, %v1328_v25  ;;  %v1619_v26 = vsel %vm5900_vm14, %v4783_v61, %v1618_v17  ;;  %v828_v11 = vld [vmem:[#allocation2 + $0xb4] sm:$0xf]  ;;  %v827_v19 = vld [vmem:[#allocation2 + $0xac] sm:$0xf] }
  0xcd   : > { %857 = vst.msk [vmem:[#allocation3 + $0x6c] sm:$0xf] %vm219_vm0, %v825_v36  ;;  %v1627_v56 = vrot.slane %v1625_v57, 4  ;;  %v1628_v58 = vrot.slane %v1470_v53, 5  ;;  %v826_v60 = vld [vmem:[#allocation2 + $0xa8] sm:$0xf] }
  0xce   : > { %856 = vst.msk [vmem:[#allocation3 + $0x68] sm:$0xf] %vm219_vm0, %v824_v32  ;;  %v1768_v34 = vld [vmem:[#allocation2 + $0x18] sm:$0xf]  ;;  %v1462_v18 = vld [vmem:[#allocation2 + $0x90] sm:$0xe] }
  0xcf   : > { %v1324_v15 = vpop.permute.xlu1 %1323  ;;  %855 = vst.msk [vmem:[#allocation3 + $0x64] sm:$0xf] %vm219_vm0, %v823_v62  ;;  %v4782_v7 = vrot.slane %v1462_v18, 9  ;;  %v1771_v43 = vld [vmem:[#allocation2 + $0x28] sm:$0xf]  ;;  %vm4001_vm8 = vcmask 293888  }
  0xd0   : > { %v1320_v54 = vpop.permute.xlu2 %1319  ;;  %1407 = vst.msk [vmem:[#allocation3 + $0x34] sm:$0xf] %vm1393_vm15, %v1324_v15  ;;  %1649 = vrot.lane.b32.xlu2 %v1549_v30, %s5358_s5  ;;  %1675 = vrot.lane.b32.xlu0 %v1594_v13, %s5358_s5  ;;  %v1453_v30 = vld [vmem:[#allocation2 + $0x6c] sm:$0xe]  ;;  %v1580_v13 = vsel %vm5900_vm14, %v1578_v14, %v1579_v51  ;;  %v1632_v15 = vrot.slane %v6110_v50, 5 }
  0xd1   : > { %1405 = vst.msk [vmem:[#allocation3 + $0x2c] sm:$0xf] %vm1393_vm15, %v1320_v54  ;;  %v4779_v54 = vrot.slane %v1453_v30, 9  ;;  %v1612_v8 = vsel %vm5900_vm14, %v4782_v7, %v1611_v48  ;;  %v1467_v14 = vld [vmem:[#allocation2 + $0xa4] sm:$0x1] }
  0xd2   : > { %1665 = vrot.lane.b32.xlu1 %v1577_v44, %s5358_s5  ;;  %v1634_v38 = vrot.slane %v1632_v15, 4  ;;  %860 = vst.msk [vmem:[#allocation3 + $0x78] sm:$0xf] %vm219_vm0, %v828_v11  ;;  %v1766_v51 = vld [vmem:[#allocation2 + $0xc] sm:$0xf] }
  0xd3   : > { %859 = vst.msk [vmem:[#allocation3 + $0x74] sm:$0xf] %vm219_vm0, %v827_v19  ;;  %v1774_v21 = vld [vmem:[#allocation2 + $0x3c] sm:$0xf]  ;;  %v1471_v40 = vld [vmem:[#allocation2 + $0xb4] sm:$0xe] }
  0xd4   : > { %858 = vst.msk [vmem:[#allocation3 + $0x70] sm:$0xf] %vm219_vm0, %v826_v60  ;;  %v1769_v57 = vld [vmem:[#allocation2 + $0x1c] sm:$0xf]  ;;  %v4785_v20 = vrot.slane %v1471_v40, 9 }
  0xd5   : > { %v1777_v27 = vld [vmem:[#allocation2 + $0x4c] sm:$0xf]  ;;  %v1772_v30 = vld [vmem:[#allocation2 + $0x30] sm:$0xf]  ;;  %v1770_v42 = vld [vmem:[#allocation2 + $0x24] sm:$0xf] }
  0xd6   : > { %v1633_v28 = vsel %vm5900_vm14, %v4785_v20, %v1632_v15  ;;  %v1767_v50 = vld [vmem:[#allocation2 + $0x10] sm:$0xf]  ;;  %v1780_v15 = vld [vmem:[#allocation2 + $0x60] sm:$0xf]  ;;  %v1773_v62 = vld [vmem:[#allocation2 + $0x34] sm:$0xf] }
  0xd7   : > { %v1334_v63 = vpop.permute.xlu0 %1333  ;;  %v1783_v36 = vld [vmem:[#allocation2 + $0x70] sm:$0xf]  ;;  %v277_v32 = vld [vmem:[#allocation2 + $0xc0] sm:$0x1]  ;;  %v1959_v18 = vld [vmem:[#allocation2 + $0xc] sm:$0xf] }
  0xd8   : > { %1412 = vst.msk [vmem:[#allocation3 + $0x48] sm:$0xf] %vm1393_vm15, %v1334_v63  ;;  %1655 = vrot.lane.b32.xlu2 %v1559_v35, %s5358_s5  ;;  %1681 = vrot.lane.b32.xlu0 %v1605_v22, %s5358_s5  ;;  %v1591_v63 = vsel %vm5900_vm14, %v4779_v54, %v1590_v16  ;;  %v1636_v35 = vsel %vm5900_vm14, %v1634_v38, %v1635_v39  ;;  %v1458_v22 = vld [vmem:[#allocation2 + $0x80] sm:$0x1]  ;;  %v1599_v16 = vrot.slane %v1597_v10, 4  ;;  %v278_v61 = vsel %vm5445_vm3, 0, %v277_v32 }
  0xd9   : > { %v1600_v55 = vrot.slane %v1458_v22, 5  ;;  %v1629_v10 = vsel %vm5900_vm14, %v1627_v56, %v1628_v58  ;;  %v1778_v38 = vld [vmem:[#allocation2 + $0x54] sm:$0xf]  ;;  %279 = vst [vmem:[#allocation2 + $0xc0] sm:$0x1] %v278_v61 }
  0xda   : > { %1671 = vrot.lane.b32.xlu1 %v1587_v9, %s5358_s5  ;;  %v1781_v22 = vld [vmem:[#allocation2 + $0x64] sm:$0xf]  ;;  %v1776_v56 = vld [vmem:[#allocation2 + $0x48] sm:$0xf]  ;;  %v1789_v58 = vld [vmem:[#allocation2 + $0x94] sm:$0xf] }
  0xdb   : > { %v1601_v5 = vsel %vm5900_vm14, %v1599_v16, %v1600_v55  ;;  %v1779_v31 = vld [vmem:[#allocation2 + $0x58] sm:$0xf] }
  0xe0   : > { %1661 = vrot.lane.b32.xlu2 %v1570_v4, %s5358_s5  ;;  %1687 = vrot.lane.b32.xlu0 %v1615_v0, %s5358_s5  ;;  %v829_v0 = vld [vmem:[#allocation2 + $0xb8] sm:$0xf]  ;;  %v791_v60 = vld [vmem:[#allocation2 + $0xc0] sm:$0xf] }
  0xe1   : > { %v1330_v59 = vpop.permute.xlu1 %1329  ;;  %v1326_v24 = vpop.permute.xlu2 %1325  ;;  %861 = vst.msk [vmem:[#allocation3 + $0x7c] sm:$0xf] %vm219_vm0, %v829_v0  ;;  %v2011_v0 = vshll.u32 %v1959_v18, 16 }
  0xe2   : > { %1410 = vst.msk [vmem:[#allocation3 + $0x40] sm:$0xf] %vm1393_vm15, %v1330_v59  ;;  %1677 = vrot.lane.b32.xlu1 %v1598_v6, %s5358_s5  ;;  %v1620_v59 = vrot.slane %v1618_v17, 4 }
  0xe3   : > { %1408 = vst.msk [vmem:[#allocation3 + $0x38] sm:$0xf] %vm1393_vm15, %v1326_v24  ;;  %v1621_v24 = vrot.slane %v1467_v14, 5  ;;  %v2013_v14 = vrot.slane %v2011_v0, 5 }
  0xe5   : > { %v1340_v25 = vpop.permute.xlu0 %1339  ;;  %v1622_v48 = vsel %vm5900_vm14, %v1620_v59, %v1621_v24  ;;  %v1960_v59 = vld [vmem:[#allocation2 + $0x10] sm:$0xf] }
  0xe6   : > { %1415 = vst.msk [vmem:[#allocation3 + $0x54] sm:$0xf] %vm1393_vm15, %v1340_v25 }
  0xe8   : > { %1667 = vrot.lane.b32.xlu2 %v1580_v13, %s5358_s5  ;;  %1693 = vrot.lane.b32.xlu0 %v1626_v49, %s5358_s5 }
  0xe9   : > { %v1332_v44 = vpop.permute.xlu2 %1331 }
  0xea   : > { %1411 = vst.msk [vmem:[#allocation3 + $0x44] sm:$0xf] %vm1393_vm15, %v1332_v44  ;;  %v1336_v45 = vpop.permute.xlu1 %1335  ;;  %1683 = vrot.lane.b32.xlu1 %v1608_v23, %s5358_s5  ;;  %v1775_v23 = vld [vmem:[#allocation2 + $0x40] sm:$0xf] }
  0xeb   : > { %1413 = vst.msk [vmem:[#allocation3 + $0x4c] sm:$0xf] %vm1393_vm15, %v1336_v45 }
  0xf0   : > { %1673 = vrot.lane.b32.xlu2 %v1591_v63, %s5358_s5  ;;  %1699 = vrot.lane.b32.xlu0 %v1636_v35, %s5358_s5  ;;  %v1786_v63 = vld [vmem:[#allocation2 + $0x84] sm:$0xf]  ;;  %v360_v35 = vld [vmem:[%s5468_s30 + $0x78] sm:$0xf] }
  0xf1   : > { %v1346_v9 = vpop.permute.xlu0 %1345  ;;  %v623_v53 = vshll.u32 %v360_v35, 16 }
  0xf2   : > { %1418 = vst.msk [vmem:[#allocation3 + $0x60] sm:$0xf] %vm1393_vm15, %v1346_v9  ;;  %1689 = vrot.lane.b32.xlu1 %v1619_v26, %s5358_s5  ;;  %v620_v26 = vshrl.u32 %v360_v35, 16  ;;  %v2021_v35 = vshrl.u32 %v1960_v59, 16 }
  0xf4   : > { %v622_v9 = vrot.slane %v620_v26, 7 }
  0xf6   : > { %v625_v16 = vor.u32 %v623_v53, %v622_v9 }
  0xf8   : > { %1679 = vrot.lane.b32.xlu2 %v1601_v5, %s5358_s5  ;;  %1834 = vrot.lane.b32.xlu0 %v1768_v34, %s5359_s6  ;;  %v1784_v5 = vld [vmem:[#allocation2 + $0x78] sm:$0xf]  ;;  %v792_v34 = vsel %vm5481_vm9, %v625_v16, %v791_v60 }
  0xf9   : > { %793 = vst [vmem:[#allocation2 + $0xc0] sm:$0xf] %v792_v34 }
  0xfa   : > { %v1338_v2 = vpop.permute.xlu2 %1337  ;;  %1695 = vrot.lane.b32.xlu1 %v1629_v10, %s5358_s5 }
  0xfb   : > { %v1342_v4 = vpop.permute.xlu1 %1341  ;;  %1414 = vst.msk [vmem:[#allocation3 + $0x50] sm:$0xf] %vm1393_vm15, %v1338_v2 }
  0xfc   : > { %1416 = vst.msk [vmem:[#allocation3 + $0x58] sm:$0xf] %vm1393_vm15, %v1342_v4  ;;  %v2008_v4 = vshrl.u32 %v1959_v18, 16 }
  0xfe   : > { %v1352_v6 = vpop.permute.xlu0 %1351 }
  0xff   : > { %1421 = vst.msk [vmem:[#allocation3 + $0x6c] sm:$0xf] %vm1393_vm15, %v1352_v6  ;;  %v2010_v6 = vrot.slane %v2008_v4, 4 }
 0x100   : > { %1685 = vrot.lane.b32.xlu2 %v1612_v8, %s5358_s5  ;;  %1840 = vrot.lane.b32.xlu0 %v1771_v43, %s5359_s6  ;;  %v1792_v8 = vld [vmem:[#allocation2 + $0xa8] sm:$0xf] }
 0x101   : > { %v1787_v43 = vld [vmem:[#allocation2 + $0x88] sm:$0xf]  ;;  %v2014_v20 = vor.u32 %v2013_v14, %v2010_v6 }
 0x102   : > { %v1344_v33 = vpop.permute.xlu2 %1343  ;;  %1830 = vrot.lane.b32.xlu1 %v1766_v51, %s5359_s6  ;;  %v361_v51 = vld [vmem:[%s5468_s30 + $0x7c] sm:$0xf]  ;;  %s199_s30 = sand.u32 1, %s5338_s13  }
 0x103   : > { %v1348_v46 = vpop.permute.xlu1 %1347  ;;  %1417 = vst.msk [vmem:[#allocation3 + $0x5c] sm:$0xf] %vm1393_vm15, %v1344_v33  ;;  %v628_v24 = vshrl.u32 %v361_v51, 16  ;;  %s4645_s18 = scalar_lea.sflag [#allocation5], %s199_s30 }
 0x104   : > { %1419 = vst.msk [vmem:[#allocation3 + $0x64] sm:$0xf] %vm1393_vm15, %v1348_v46 }
 0x108   : > { %1691 = vrot.lane.b32.xlu2 %v1622_v48, %s5358_s5  ;;  %1846 = vrot.lane.b32.xlu0 %v1774_v21, %s5359_s6  ;;  %v1963_v48 = vld [vmem:[#allocation2 + $0x1c] sm:$0xf]  ;;  %v6221_v21 = vrot.slane %v628_v24, 7 }
 0x10a   : > { %v1350_v25 = vpop.permute.xlu2 %1349  ;;  %1836 = vrot.lane.b32.xlu1 %v1769_v57, %s5359_s6  ;;  %v1358_v52 = vpop.permute.xlu0 %1357  ;;  %v1782_v57 = vld [vmem:[#allocation2 + $0x6c] sm:$0xf] }
 0x10b   : > { %1420 = vst.msk [vmem:[#allocation3 + $0x68] sm:$0xf] %vm1393_vm15, %v1350_v25  ;;  %v2017_v25 = vshll.u32 %v1960_v59, 16 }
 0x10c   : > { %1424 = vst.msk [vmem:[#allocation3 + $0x78] sm:$0xf] %vm1393_vm15, %v1358_v52  ;;  %v631_v52 = vshll.u32 %v361_v51, 16 }
 0x110   : > { %1697 = vrot.lane.b32.xlu2 %v1633_v28, %s5358_s5  ;;  %1852 = vrot.lane.b32.xlu0 %v1777_v27, %s5359_s6  ;;  %v1795_v28 = vld [vmem:[#allocation2 + $0xb8] sm:$0xf]  ;;  %v2041_v27 = vshll.u32 %v1963_v48, 16  ;;  %s4767_s5 = sshll.u32 %s199_s30, 7 }
 0x112   : > { %v1356_v13 = vpop.permute.xlu2 %1355  ;;  %1842 = vrot.lane.b32.xlu1 %v1772_v30, %s5359_s6  ;;  %v1640_v49 = vpop.permute.xlu0 %1639  ;;  %v2045_v30 = vshrl.u32 %v1963_v48, 16 }
 0x113   : > { %1423 = vst.msk [vmem:[#allocation3 + $0x74] sm:$0xf] %vm1393_vm15, %v1356_v13  ;;  %v626_v13 = vrot.slane %v622_v9, 4 }
 0x114   : > { %v1354_v12 = vpop.permute.xlu1 %1353  ;;  %1735 = vst.msk [vmem:[#allocation3 + $0x4] sm:$0xf] %vm1733_vm1, %v1640_v49  ;;  %v633_v49 = vor.u32 %v631_v52, %v6221_v21 }
 0x115   : > { %1422 = vst.msk [vmem:[#allocation3 + $0x70] sm:$0xf] %vm1393_vm15, %v1354_v12  ;;  %v1790_v12 = vld [vmem:[#allocation2 + $0x9c] sm:$0xf] }
 0x118   : > { %1832 = vrot.lane.b32.xlu2 %v1767_v50, %s5359_s6  ;;  %1858 = vrot.lane.b32.xlu0 %v1780_v15, %s5359_s6  ;;  %v2015_v50 = vrot.slane %v2014_v20, 4  ;;  %v6228_v15 = vrot.slane %v2017_v25, 5  ;;  %v1977_v20 = vld [vmem:[#allocation2 + $0x54] sm:$0xf] }
 0x11a   : > { %v1638_v54 = vpop.permute.xlu2 %1637  ;;  %1848 = vrot.lane.b32.xlu1 %v1775_v23, %s5359_s6  ;;  %v1646_v44 = vpop.permute.xlu0 %1645  ;;  %v634_v23 = vsel %vm5487_vm10, %v626_v13, %v633_v49  ;;  %v2020_v37 = vsel %vm5494_vm11, %v2015_v50, %v6228_v15  ;;  %v1791_v49 = vld [vmem:[#allocation2 + $0xa0] sm:$0xf]  ;;  %v2152_v50 = vshrl.u32 %v1977_v20, 16 }
 0x11b   : > { %1734 = vst.msk [vmem:[#allocation3] sm:$0xf] %vm1733_vm1, %v1638_v54  ;;  %v6232_v54 = vrot.slane %v2041_v27, 5 }
 0x11c   : > { %v1360_v29 = vpop.permute.xlu1 %1359  ;;  %1738 = vst.msk [vmem:[#allocation3 + $0x10] sm:$0xf] %vm1733_vm1, %v1646_v44  ;;  %v2047_v44 = vrot.slane %v2045_v30, 4 }
 0x11d   : > { %1425 = vst.msk [vmem:[#allocation3 + $0x7c] sm:$0xf] %vm1393_vm15, %v1360_v29 }
 0x11e   : > { %794 = vst.msk [vmem:[#allocation2 + $0xc4] sm:$0xf] %vm219_vm0, %v634_v23  ;;  %v2048_v32 = vor.u32 %v2047_v44, %v6232_v54  ;;  %vm1926_vm0 = vcmask 126048  }
 0x120   : > { %1838 = vrot.lane.b32.xlu2 %v1770_v42, %s5359_s6  ;;  %1864 = vrot.lane.b32.xlu0 %v1783_v36, %s5359_s6  ;;  %v1964_v36 = vld [vmem:[#allocation2 + $0x20] sm:$0x1] }
 0x121   : > { %v2051_v61 = vshll.u32 %v1964_v36, 16 }
 0x122   : > { %v1644_v39 = vpop.permute.xlu2 %1643  ;;  %1854 = vrot.lane.b32.xlu1 %v1778_v38, %s5359_s6  ;;  %v1652_v45 = vpop.permute.xlu0 %1651  ;;  %v1968_v38 = vld [vmem:[#allocation2 + $0x30] sm:$0xf] }
 0x123   : > { %1737 = vst.msk [vmem:[#allocation3 + $0xc] sm:$0xf] %vm1733_vm1, %v1644_v39  ;;  %v2053_v26 = vrot.slane %v2051_v61, 5 }
 0x124   : > { %v1642_v17 = vpop.permute.xlu1 %1641  ;;  %1741 = vst.msk [vmem:[#allocation3 + $0x1c] sm:$0xf] %vm1733_vm1, %v1652_v45  ;;  %v1785_v45 = vld [vmem:[#allocation2 + $0x7c] sm:$0xf] }
 0x125   : > { %1736 = vst.msk [vmem:[#allocation3 + $0x8] sm:$0xf] %vm1733_vm1, %v1642_v17  ;;  %v2080_v17 = vshrl.u32 %v1968_v38, 16 }
 0x127   : > { %v2082_v53 = vrot.slane %v2080_v17, 4 }
 0x128   : > { %1844 = vrot.lane.b32.xlu2 %v1773_v62, %s5359_s6  ;;  %1870 = vrot.lane.b32.xlu0 %v1786_v63, %s5359_s6  ;;  %v2083_v62 = vshll.u32 %v1968_v38, 16  ;;  %v1793_v63 = vld [vmem:[#allocation2 + $0xac] sm:$0xf] }
 0x12a   : > { %v1650_v11 = vpop.permute.xlu2 %1649  ;;  %1860 = vrot.lane.b32.xlu1 %v1781_v22, %s5359_s6  ;;  %v1658_v19 = vpop.permute.xlu0 %1657  ;;  %v2049_v22 = vrot.slane %v2048_v32, 4  ;;  %v2085_v9 = vrot.slane %v2083_v62, 5  ;;  %v1981_v32 = vld [vmem:[#allocation2 + $0x64] sm:$0xf] }
 0x12b   : > { %1740 = vst.msk [vmem:[#allocation3 + $0x18] sm:$0xf] %vm1733_vm1, %v1650_v11  ;;  %v1972_v11 = vld [vmem:[#allocation2 + $0x40] sm:$0xf] }
 0x12c   : > { %v1648_v55 = vpop.permute.xlu1 %1647  ;;  %1744 = vst.msk [vmem:[#allocation3 + $0x28] sm:$0xf] %vm1733_vm1, %v1658_v19  ;;  %v2113_v34 = vshll.u32 %v1972_v11, 16  ;;  %v2117_v18 = vshrl.u32 %v1972_v11, 16 }
 0x12d   : > { %1739 = vst.msk [vmem:[#allocation3 + $0x14] sm:$0xf] %vm1733_vm1, %v1648_v55  ;;  %v6246_v55 = vld [vmem:[#allocation2 + $0x34] sm:$0xf] }
 0x12e   : > { %v2089_v4 = vshll.u32 %v6246_v55, 16  ;;  %v6257_v14 = vrot.slane %v2113_v34, 5  ;;  %v2119_v51 = vrot.slane %v2117_v18, 4 }
 0x130   : > { %1850 = vrot.lane.b32.xlu2 %v1776_v56, %s5359_s6  ;;  %1876 = vrot.lane.b32.xlu0 %v1789_v58, %s5359_s6  ;;  %v2023_v56 = vrot.slane %v2021_v35, 4  ;;  %v1965_v58 = vld [vmem:[#allocation2 + $0x24] sm:$0xf]  ;;  %v6259_v24 = vrot.slane %v2089_v4, 5  ;;  %v2120_v30 = vor.u32 %v2119_v51, %v6257_v14  ;;  %v6280_v35 = vld [vmem:[#allocation2 + $0x58] sm:$0xf] }
 0x131   : > { %v2056_v0 = vshrl.u32 %v1965_v58, 16 }
 0x132   : > { %v1656_v10 = vpop.permute.xlu2 %1655  ;;  %1866 = vrot.lane.b32.xlu1 %v1784_v5, %s5359_s6  ;;  %v1664_v7 = vpop.permute.xlu0 %1663  ;;  %v1961_v5 = vld [vmem:[#allocation2 + $0x14] sm:$0x1]  ;;  %v2121_v36 = vrot.slane %v2120_v30, 4 }
 0x133   : > { %1743 = vst.msk [vmem:[#allocation3 + $0x24] sm:$0xf] %vm1733_vm1, %v1656_v10  ;;  %v1788_v10 = vld [vmem:[#allocation2 + $0x90] sm:$0xf]  ;;  %v2027_v6 = vshll.u32 %v1961_v5, 16  ;;  %v2161_v5 = vshll.u32 %v6280_v35, 16 }
 0x134   : > { %v1654_v2 = vpop.permute.xlu1 %1653  ;;  %1747 = vst.msk [vmem:[#allocation3 + $0x34] sm:$0xf] %vm1733_vm1, %v1664_v7  ;;  %v2054_v7 = vsel %vm5494_vm11, %v2049_v22, %v2053_v26  ;;  %v1974_v22 = vld [vmem:[#allocation2 + $0x48] sm:$0xf]  ;;  %v1794_v26 = vld [vmem:[#allocation2 + $0xb4] sm:$0xf] }
 0x135   : > { %1742 = vst.msk [vmem:[#allocation3 + $0x20] sm:$0xf] %vm1733_vm1, %v1654_v2  ;;  %v2086_v2 = vor.u32 %v2085_v9, %v2082_v53  ;;  %v2029_v52 = vrot.slane %v2027_v6, 5  ;;  %v2128_v34 = vshrl.u32 %v1974_v22, 16  ;;  %v2131_v18 = vshll.u32 %v1974_v22, 16 }
 0x136   : > { %v6296_v6 = vrot.slane %v2161_v5, 5 }
 0x137   : > { %v2087_v59 = vrot.slane %v2086_v2, 4  ;;  %v2130_v51 = vrot.slane %v2128_v34, 4 }
 0x138   : > { %1856 = vrot.lane.b32.xlu2 %v1779_v31, %s5359_s6  ;;  %1882 = vrot.lane.b32.xlu0 %v1792_v8, %s5359_s6  ;;  %v2059_v31 = vshll.u32 %v1965_v58, 16  ;;  %v1796_v8 = vld [vmem:[#allocation2 + $0xc0] sm:$0xf]  ;;  %v2189_v58 = vshrl.u32 %v1981_v32, 16 }
 0x13a   : > { %v1662_v33 = vpop.permute.xlu2 %1661  ;;  %1872 = vrot.lane.b32.xlu1 %v1787_v43, %s5359_s6  ;;  %v1670_v46 = vpop.permute.xlu0 %1669  ;;  %v2024_v43 = vor.u32 %v2023_v56, %v6228_v15  ;;  %v2155_v15 = vshll.u32 %v1977_v20, 16  ;;  %v2185_v56 = vshll.u32 %v1981_v32, 16 }
 0x13b   : > { %1746 = vst.msk [vmem:[#allocation3 + $0x30] sm:$0xf] %vm1733_vm1, %v1662_v33  ;;  %v1973_v33 = vld [vmem:[#allocation2 + $0x44] sm:$0x1] }
 0x13c   : > { %v1660_v40 = vpop.permute.xlu1 %1659  ;;  %1750 = vst.msk [vmem:[#allocation3 + $0x40] sm:$0xf] %vm1733_vm1, %v1670_v46  ;;  %v2025_v25 = vrot.slane %v2024_v43, 4  ;;  %v2123_v13 = vshll.u32 %v1973_v33, 16  ;;  %v1982_v33 = vld [vmem:[#allocation2 + $0x68] sm:$0x1] }
 0x13d   : > { %1745 = vst.msk [vmem:[#allocation3 + $0x2c] sm:$0xf] %vm1733_vm1, %v1660_v40  ;;  %v2058_v40 = vrot.slane %v2056_v0, 4 }
 0x13e   : > { %v2125_v38 = vrot.slane %v2123_v13, 5  ;;  %v2195_v13 = vshll.u32 %v1982_v33, 16 }
 0x140   : > { %1862 = vrot.lane.b32.xlu2 %v1782_v57, %s5359_s6  ;;  %1888 = vrot.lane.b32.xlu0 %v1795_v28, %s5359_s6  ;;  %v2061_v57 = vrot.slane %v2059_v31, 5  ;;  %v6263_v28 = vld [vmem:[#allocation2 + $0x28] sm:$0xf]  ;;  %v6294_v31 = vrot.slane %v2185_v56, 5 }
 0x141   : > { %v2065_v44 = vshll.u32 %v6263_v28, 16 }
 0x142   : > { %v1668_v29 = vpop.permute.xlu2 %1667  ;;  %1878 = vrot.lane.b32.xlu1 %v1790_v12, %s5359_s6  ;;  %v1676_v42 = vpop.permute.xlu0 %1675  ;;  %v2092_v12 = vsel %vm5494_vm11, %v2087_v59, %v6259_v24  ;;  %v2062_v23 = vor.u32 %v2061_v57, %v2058_v40  ;;  %v2133_v59 = vrot.slane %v2131_v18, 5  ;;  %v1986_v40 = vld [vmem:[#allocation2 + $0x78] sm:$0xf] }
 0x143   : > { %1749 = vst.msk [vmem:[#allocation3 + $0x3c] sm:$0xf] %vm1733_vm1, %v1668_v29  ;;  %v2030_v29 = vsel %vm5494_vm11, %v2025_v25, %v2029_v52  ;;  %v6301_v52 = vld [vmem:[#allocation2 + $0x4c] sm:$0xf] }
 0x144   : > { %v1666_v39 = vpop.permute.xlu1 %1665  ;;  %1753 = vst.msk [vmem:[#allocation3 + $0x4c] sm:$0xf] %vm1733_vm1, %v1676_v42  ;;  %v2093_v42 = vshrl.u32 %v6246_v55, 16  ;;  %v2063_v62 = vrot.slane %v2062_v23, 4  ;;  %v1970_v55 = vld [vmem:[#allocation2 + $0x38] sm:$0x1] }
 0x145   : > { %1748 = vst.msk [vmem:[#allocation3 + $0x38] sm:$0xf] %vm1733_vm1, %v1666_v39  ;;  %v1962_v39 = vld [vmem:[#allocation2 + $0x18] sm:$0xf]  ;;  %v2099_v2 = vshll.u32 %v1970_v55, 16  ;;  %v2137_v23 = vshll.u32 %v6301_v52, 16 }
 0x146   : > { %v2095_v53 = vrot.slane %v2093_v42, 4  ;;  %v2032_v9 = vshrl.u32 %v1962_v39, 16  ;;  %v2035_v11 = vshll.u32 %v1962_v39, 16  ;;  %v2165_v42 = vshrl.u32 %v6280_v35, 16  ;;  %v1979_v55 = vld [vmem:[#allocation2 + $0x5c] sm:$0x1] }
 0x147   : > { %v2101_v20 = vrot.slane %v2099_v2, 5 }
 0x148   : > { %1868 = vrot.lane.b32.xlu2 %v1785_v45, %s5359_s6  ;;  %2391 = vrot.lane.b32.xlu0 %v2020_v37, %s5360_s7  ;;  %v2154_v45 = vrot.slane %v2152_v50, 4  ;;  %v2157_v37 = vrot.slane %v2155_v15, 5  ;;  %v2034_v4 = vrot.slane %v2032_v9, 4  ;;  %v2037_v0 = vrot.slane %v2035_v11, 5  ;;  %v6318_v9 = vld [vmem:[#allocation2 + $0x7c] sm:$0xf] }
 0x149   : > { %v2224_v50 = vshrl.u32 %v1986_v40, 16  ;;  %v2227_v15 = vshll.u32 %v1986_v40, 16  ;;  %v1990_v11 = vld [vmem:[#allocation2 + $0x88] sm:$0xf]  ;;  %v2167_v56 = vrot.slane %v2165_v42, 4  ;;  %v2233_v2 = vshll.u32 %v6318_v9, 16 }
 0x14a   : > { %v1674_v19 = vpop.permute.xlu2 %1673  ;;  %1884 = vrot.lane.b32.xlu1 %v1793_v63, %s5359_s6  ;;  %v1682_v16 = vpop.permute.xlu0 %1681  ;;  %v6278_v63 = vrot.slane %v2065_v44, 5  ;;  %v2038_v25 = vor.u32 %v2037_v0, %v2034_v4  ;;  %v2261_v4 = vshrl.u32 %v1990_v11, 16 }
 0x14b   : > { %1752 = vst.msk [vmem:[#allocation3 + $0x48] sm:$0xf] %vm1733_vm1, %v1674_v19  ;;  %v6336_v40 = vrot.slane %v2233_v2, 5 }
 0x14c   : > { %v1672_v60 = vpop.permute.xlu1 %1671  ;;  %1756 = vst.msk [vmem:[#allocation3 + $0x58] sm:$0xf] %vm1733_vm1, %v1682_v16  ;;  %v2126_v16 = vsel %vm5494_vm11, %v2121_v36, %v2125_v38  ;;  %v1967_v36 = vld [vmem:[#allocation2 + $0x2c] sm:$0x1] }
 0x14d   : > { %1751 = vst.msk [vmem:[#allocation3 + $0x44] sm:$0xf] %vm1733_vm1, %v1672_v60  ;;  %v2158_v60 = vor.u32 %v2157_v37, %v2154_v45  ;;  %v2197_v45 = vrot.slane %v2195_v13, 5  ;;  %v1971_v37 = vld [vmem:[#allocation2 + $0x3c] sm:$0xf]  ;;  %v2075_v35 = vshll.u32 %v1967_v36, 16 }
 0x14e   : > { %v2107_v34 = vshll.u32 %v1971_v37, 16  ;;  %v1991_v13 = vld [vmem:[#allocation2 + $0x8c] sm:$0x1] }
 0x14f   : > { %v2159_v43 = vrot.slane %v2158_v60, 4 }
 0x150   : > { %1874 = vrot.lane.b32.xlu2 %v1788_v10, %s5359_s6  ;;  %2397 = vrot.lane.b32.xlu0 %v2054_v7, %s5360_s7  ;;  %v2068_v10 = vsel %vm5494_vm11, %v2063_v62, %v6278_v63  ;;  %v2096_v7 = vor.u32 %v2095_v53, %v6259_v24  ;;  %v1983_v62 = vld [vmem:[#allocation2 + $0x6c] sm:$0xf]  ;;  %v6316_v53 = vrot.slane %v2137_v23, 5  ;;  %v2109_v33 = vrot.slane %v2107_v34, 5 }
 0x151   : > { %v2200_v18 = vshrl.u32 %v1983_v62, 16  ;;  %v1999_v34 = vld [vmem:[#allocation2 + $0xac] sm:$0xf] }
 0x152   : > { %v1680_v46 = vpop.permute.xlu2 %1679  ;;  %1890 = vrot.lane.b32.xlu1 %v1796_v8, %s5359_s6  ;;  %v1688_v48 = vpop.permute.xlu0 %1687  ;;  %v2191_v8 = vrot.slane %v2189_v58, 4  ;;  %v2097_v57 = vrot.slane %v2096_v7, 4  ;;  %v2104_v58 = vshrl.u32 %v1971_v37, 16  ;;  %v2237_v37 = vshrl.u32 %v6318_v9, 16 }
 0x153   : > { %1755 = vst.msk [vmem:[#allocation3 + $0x54] sm:$0xf] %vm1733_vm1, %v1680_v46  ;;  %v2333_v3 = vshrl.u32 %v1999_v34, 16 }
 0x154   : > { %v1678_v27 = vpop.permute.xlu1 %1677  ;;  %1759 = vst.msk [vmem:[#allocation3 + $0x64] sm:$0xf] %vm1733_vm1, %v1688_v48  ;;  %v2069_v48 = vshrl.u32 %v6263_v28, 16  ;;  %v2192_v30 = vor.u32 %v2191_v8, %v6294_v31  ;;  %v1797_v28 = vld [vmem:[#allocation2 + $0xc4] sm:$0xf]  ;;  %v2102_v44 = vsel %vm5494_vm11, %v2097_v57, %v2101_v20  ;;  %v2077_v8 = vrot.slane %v2075_v35, 5 }
 0x155   : > { %1754 = vst.msk [vmem:[#allocation3 + $0x50] sm:$0xf] %vm1733_vm1, %v1678_v27  ;;  %v2263_v20 = vrot.slane %v2261_v4, 4  ;;  %v327_v35 = vld [vmem:[#allocation2 + $0xc8] sm:$0x1] }
 0x156   : > { %v2071_v38 = vrot.slane %v2069_v48, 4  ;;  %v2193_v39 = vrot.slane %v2192_v30, 4  ;;  %v2141_v30 = vshrl.u32 %v6301_v52, 16  ;;  %v328_v2 = vsel %vm5454_vm7, 0, %v327_v35 }
 0x157   : > { %329 = vst [vmem:[#allocation2 + $0xc8] sm:$0x1] %v328_v2  ;;  %vm3916_vm7 = vcmask 290048  }
 0x158   : > { %1880 = vrot.lane.b32.xlu2 %v1791_v49, %s5359_s6  ;;  %2403 = vrot.lane.b32.xlu0 %v2092_v12, %s5360_s7  ;;  %v2164_v49 = vsel %vm5494_vm11, %v2159_v43, %v6296_v6  ;;  %v2134_v12 = vor.u32 %v2133_v59, %v2130_v51  ;;  %v2198_v5 = vsel %vm5494_vm11, %v2193_v39, %v2197_v45  ;;  %v2171_v51 = vshll.u32 %v1979_v55, 16  ;;  %v6359_v55 = vld [vmem:[#allocation2 + $0xa0] sm:$0xf] }
 0x159   : > { %v2168_v43 = vor.u32 %v2167_v56, %v6296_v6  ;;  %v2106_v59 = vrot.slane %v2104_v58, 4 }
 0x15a   : > { %v1686_v61 = vpop.permute.xlu2 %1685  ;;  %2393 = vrot.lane.b32.xlu1 %v2030_v29, %s5360_s7  ;;  %v1694_v17 = vpop.permute.xlu0 %1693  ;;  %v2039_v29 = vrot.slane %v2038_v25, 4  ;;  %v2135_v32 = vrot.slane %v2134_v12, 4  ;;  %v1995_v25 = vld [vmem:[#allocation2 + $0x9c] sm:$0xf]  ;;  %v6343_v12 = vld [vmem:[#allocation2 + $0x70] sm:$0xf] }
 0x15b   : > { %1758 = vst.msk [vmem:[#allocation3 + $0x60] sm:$0xf] %vm1733_vm1, %v1686_v61  ;;  %v2226_v61 = vrot.slane %v2224_v50, 4  ;;  %v2209_v39 = vshll.u32 %v6343_v12, 16 }
 0x15c   : > { %v1684_v19 = vpop.permute.xlu1 %1683  ;;  %1762 = vst.msk [vmem:[#allocation3 + $0x70] sm:$0xf] %vm1733_vm1, %v1694_v17  ;;  %v2229_v17 = vrot.slane %v2227_v15, 5  ;;  %v2110_v15 = vor.u32 %v2109_v33, %v2106_v59 }
 0x15d   : > { %1757 = vst.msk [vmem:[#allocation3 + $0x5c] sm:$0xf] %vm1733_vm1, %v1684_v19  ;;  %v2044_v19 = vsel %vm5494_vm11, %v2039_v29, %v6232_v54  ;;  %v2257_v54 = vshll.u32 %v1990_v11, 16  ;;  %v2299_v29 = vshll.u32 %v1995_v25, 16  ;;  %v6362_v58 = vrot.slane %v2209_v39, 5 }
 0x15e   : > { %v2230_v7 = vor.u32 %v2229_v17, %v2226_v61  ;;  %v2143_v61 = vrot.slane %v2141_v30, 4  ;;  %v2111_v17 = vrot.slane %v2110_v15, 4 }
 0x15f   : > { %v6338_v57 = vrot.slane %v2257_v54, 5 }
 0x160   : > { %1886 = vrot.lane.b32.xlu2 %v1794_v26, %s5359_s6  ;;  %2409 = vrot.lane.b32.xlu0 %v2126_v16, %s5360_s7  ;;  %v2072_v16 = vor.u32 %v2071_v38, %v6278_v63  ;;  %v2140_v63 = vsel %vm5494_vm11, %v2135_v32, %v6316_v53  ;;  %v2267_v38 = vshll.u32 %v1991_v13, 16  ;;  %v1976_v32 = vld [vmem:[#allocation2 + $0x50] sm:$0x1]  ;;  %v635_v13 = vrot.slane %v6221_v21, 4 }
 0x161   : > { %v2264_v36 = vor.u32 %v2263_v20, %v6338_v57 }
 0x162   : > { %v1692_v46 = vpop.permute.xlu2 %1691  ;;  %2399 = vrot.lane.b32.xlu1 %v2068_v10, %s5360_s7  ;;  %v1700_v24 = vpop.permute.xlu0 %1699  ;;  %v2203_v10 = vshll.u32 %v1983_v62, 16  ;;  %v2073_v0 = vrot.slane %v2072_v16, 4  ;;  %v1980_v16 = vld [vmem:[#allocation2 + $0x60] sm:$0xf] }
 0x163   : > { %1761 = vst.msk [vmem:[#allocation3 + $0x6c] sm:$0xf] %vm1733_vm1, %v1692_v46  ;;  %v2202_v46 = vrot.slane %v2200_v18, 4  ;;  %v2265_v11 = vrot.slane %v2264_v36, 4  ;;  %v2144_v18 = vor.u32 %v2143_v61, %v6316_v53  ;;  %v2176_v4 = vshrl.u32 %v1980_v16, 16 }
 0x164   : > { %v1690_v27 = vpop.permute.xlu1 %1689  ;;  %1765 = vst.msk [vmem:[#allocation3 + $0x7c] sm:$0xf] %vm1733_vm1, %v1700_v24  ;;  %v2205_v48 = vrot.slane %v2203_v10, 5  ;;  %v2231_v24 = vrot.slane %v2230_v7, 4  ;;  %v2078_v52 = vsel %vm5494_vm11, %v2073_v0, %v2077_v8  ;;  %v2239_v10 = vrot.slane %v2237_v37, 4 }
 0x165   : > { %1760 = vst.msk [vmem:[#allocation3 + $0x68] sm:$0xf] %vm1733_vm1, %v1690_v27  ;;  %v1992_v7 = vld [vmem:[#allocation2 + $0x90] sm:$0xf]  ;;  %v2305_v8 = vshll.u32 %v6359_v55, 16 }
 0x166   : > { %v2206_v23 = vor.u32 %v2205_v48, %v2202_v46  ;;  %v2236_v42 = vsel %vm5494_vm11, %v2231_v24, %v6336_v40  ;;  %v2272_v33 = vshrl.u32 %v1992_v7, 16  ;;  %v2275_v46 = vshll.u32 %v1992_v7, 16  ;;  %v6389_v36 = vld [vmem:[#allocation2 + $0x94] sm:$0xf] }
 0x167   : > { %v2145_v48 = vrot.slane %v2144_v18, 4  ;;  %v2240_v20 = vor.u32 %v2239_v10, %v6336_v40 }
 0x168   : > { %1892 = vrot.lane.b32.xlu2 %v1797_v28, %s5359_s6  ;;  %2415 = vrot.lane.b32.xlu0 %v2164_v49, %s5360_s7  ;;  %v2169_v28 = vrot.slane %v2168_v43, 4  ;;  %v2173_v49 = vrot.slane %v2171_v51, 5  ;;  %v2207_v62 = vrot.slane %v2206_v23, 4  ;;  %v2116_v43 = vsel %vm5494_vm11, %v2111_v17, %v6257_v14  ;;  %s7232_s6 = scalar_lea.vmem [#allocation4], %s4767_s5 }
 0x169   : > { %v2329_v51 = vshll.u32 %v1999_v34, 16  ;;  %v2178_v14 = vrot.slane %v2176_v4, 4  ;;  %v2274_v40 = vrot.slane %v2272_v33, 4  ;;  %v2277_v23 = vrot.slane %v2275_v46, 5  ;;  %v1989_v34 = vld [vmem:[#allocation2 + $0x84] sm:$0xf] }
 0x16a   : > { %v1698_v22 = vpop.permute.xlu2 %1697  ;;  %2405 = vrot.lane.b32.xlu1 %v2102_v44, %s5360_s7  ;;  %v1835_v26 = vpop.permute.xlu0 %1834  ;;  %v2296_v44 = vshrl.u32 %v1995_v25, 16  ;;  %v2174_v45 = vsel %vm5494_vm11, %v2169_v28, %v2173_v49  ;;  %v2212_v59 = vsel %vm5494_vm11, %v2207_v62, %v6362_v58  ;;  %v2335_v49 = vrot.slane %v2333_v3, 4  ;;  %v1997_v4 = vld [vmem:[#allocation2 + $0xa4] sm:$0x1]  ;;  %v2001_v3 = vld [vmem:[#allocation2 + $0xb4] sm:$0xf] }
 0x16b   : > { %1764 = vst.msk [vmem:[#allocation3 + $0x78] sm:$0xf] %vm1733_vm1, %v1698_v22  ;;  %v6385_v28 = vrot.slane %v2329_v51, 5  ;;  %v2248_v51 = vshrl.u32 %v1989_v34, 16  ;;  %v2251_v33 = vshll.u32 %v1989_v34, 16 }
 0x16c   : > { %v1696_v60 = vpop.permute.xlu1 %1695  ;;  %1929 = vst.msk [vmem:[#allocation3 + $0x8] sm:$0xf] %vm1926_vm0, %v1835_v26  ;;  %v2298_v22 = vrot.slane %v2296_v44, 4  ;;  %v2301_v26 = vrot.slane %v2299_v29, 5  ;;  %v2000_v44 = vld [vmem:[#allocation2 + $0xb0] sm:$0x1] }
 0x16d   : > { %1763 = vst.msk [vmem:[#allocation3 + $0x74] sm:$0xf] %vm1733_vm1, %v1696_v60  ;;  %v2147_v60 = vshll.u32 %v1976_v32, 16  ;;  %v2004_v29 = vld [vmem:[#allocation2 + $0xc0] sm:$0xf]  ;;  %v2336_v32 = vor.u32 %v2335_v49, %v6385_v28  ;;  %v2339_v61 = vshll.u32 %v2000_v44, 16 }
 0x16e   : > { %v2302_v0 = vor.u32 %v2301_v26, %v2298_v22  ;;  %v2368_v17 = vshrl.u32 %v2004_v29, 16  ;;  %v2371_v62 = vshll.u32 %v2004_v29, 16  ;;  %v2278_v22 = vor.u32 %v2277_v23, %v2274_v40  ;;  %v795_v26 = vld [vmem:[#allocation2 + $0xc8] sm:$0x1]  ;;  %v6432_v23 = vld [vmem:[#allocation2 + $0x10] sm:$0xf] }
 0x16f   : > { %v2149_v24 = vrot.slane %v2147_v60, 5  ;;  %v2337_v60 = vrot.slane %v2336_v32, 4  ;;  %v2618_v32 = vrot.slane %v6432_v23, 5 }
 0x170   : > { %2395 = vrot.lane.b32.xlu2 %v2044_v19, %s5360_s7  ;;  %2421 = vrot.lane.b32.xlu0 %v2198_v5, %s5360_s7  ;;  %v2269_v19 = vrot.slane %v2267_v38, 5  ;;  %v1988_v5 = vld [vmem:[#allocation2 + $0x80] sm:$0x1]  ;;  %v2303_v30 = vrot.slane %v2302_v0, 4  ;;  %v2213_v38 = vshrl.u32 %v6343_v12, 16  ;;  %v2281_v12 = vshll.u32 %v6389_v36, 16 }
 0x171   : > { %v2243_v25 = vshll.u32 %v1988_v5, 16  ;;  %v2150_v39 = vsel %vm5494_vm11, %v2145_v48, %v2149_v24  ;;  %v2341_v5 = vrot.slane %v2339_v61, 5  ;;  %v2370_v18 = vrot.slane %v2368_v17, 4  ;;  %v2522_v61 = vld [vmem:[#allocation2 + $0x14] sm:$0x1] }
 0x172   : > { %v1833_v27 = vpop.permute.xlu2 %1832  ;;  %2411 = vrot.lane.b32.xlu1 %v2140_v63, %s5360_s7  ;;  %v1841_v6 = vpop.permute.xlu0 %1840  ;;  %v2179_v63 = vshll.u32 %v1980_v16, 16  ;;  %v2270_v53 = vsel %vm5494_vm11, %v2265_v11, %v2269_v19  ;;  %v2309_v11 = vshrl.u32 %v6359_v55, 16  ;;  %v796_v19 = vsel %vm5445_vm3, %v635_v13, %v795_v26 }
 0x173   : > { %1928 = vst.msk [vmem:[#allocation3 + $0x4] sm:$0xf] %vm1926_vm0, %v1833_v27  ;;  %v2373_v10 = vrot.slane %v2371_v62, 5  ;;  %v2279_v2 = vrot.slane %v2278_v22, 4  ;;  %v6409_v1 = vrot.slane %v2281_v12, 5  ;;  %v2253_v13 = vrot.slane %v2251_v33, 5 }
 0x174   : > { %v1831_v50 = vpop.permute.xlu1 %1830  ;;  %1932 = vst.msk [vmem:[#allocation3 + $0x14] sm:$0xf] %vm1926_vm0, %v1841_v6  ;;  %v2181_v27 = vrot.slane %v2179_v63, 5  ;;  %v6382_v6 = vrot.slane %v2305_v8, 5  ;;  %v2311_v63 = vrot.slane %v2309_v11, 4  ;;  %v2620_v11 = vrot.slane %v2618_v32, 4 }
 0x175   : > { %1927 = vst.msk [vmem:[#allocation3] sm:$0xf] %vm1926_vm0, %v1831_v50  ;;  %v2374_v46 = vor.u32 %v2373_v10, %v2370_v18  ;;  %vm2824_vm3 = vcmask 191648  }
 0x176   : > { %v2308_v37 = vsel %vm5494_vm11, %v2303_v30, %v6382_v6  ;;  %797 = vst [vmem:[#allocation2 + $0xc8] sm:$0x1] %v796_v19  ;;  %v2312_v24 = vor.u32 %v2311_v63, %v6382_v6  ;;  %v2250_v30 = vrot.slane %v2248_v51, 4  ;;  %v2621_v19 = vrot.slane %v2522_v61, 5 }
 0x177   : > { %v2375_v49 = vrot.slane %v2374_v46, 4 }
 0x178   : > { %2401 = vrot.lane.b32.xlu2 %v2078_v52, %s5360_s7  ;;  %2427 = vrot.lane.b32.xlu0 %v2236_v42, %s5360_s7  ;;  %v2241_v52 = vrot.slane %v2240_v20, 4  ;;  %v2245_v42 = vrot.slane %v2243_v25, 5  ;;  %v2315_v20 = vshll.u32 %v1997_v4, 16  ;;  %v2347_v25 = vshll.u32 %v2001_v3, 16 }
 0x179   : > { %v2313_v6 = vrot.slane %v2312_v24, 4  ;;  %v6476_v24 = vld [vmem:[#allocation2 + $0x34] sm:$0xf] }
 0x17a   : > { %v1839_v56 = vpop.permute.xlu2 %1838  ;;  %2417 = vrot.lane.b32.xlu1 %v2174_v45, %s5360_s7  ;;  %v1847_v9 = vpop.permute.xlu0 %1846  ;;  %v2182_v45 = vor.u32 %v2181_v27, %v2178_v14  ;;  %v2246_v35 = vsel %vm5494_vm11, %v2241_v52, %v2245_v42  ;;  %v2317_v44 = vrot.slane %v2315_v20, 5  ;;  %v2349_v52 = vrot.slane %v2347_v25, 5 }
 0x17b   : > { %1931 = vst.msk [vmem:[#allocation3 + $0x10] sm:$0xf] %vm1926_vm0, %v1839_v56  ;;  %v1985_v56 = vld [vmem:[#allocation2 + $0x74] sm:$0x1]  ;;  %v2285_v42 = vshrl.u32 %v6389_v36, 16 }
 0x17c   : > { %v1837_v54 = vpop.permute.xlu1 %1836  ;;  %1935 = vst.msk [vmem:[#allocation3 + $0x20] sm:$0xf] %vm1926_vm0, %v1847_v9  ;;  %v2183_v16 = vrot.slane %v2182_v45, 4  ;;  %v2215_v9 = vrot.slane %v2213_v38, 4  ;;  %v2254_v45 = vor.u32 %v2253_v13, %v2250_v30  ;;  %v2318_v36 = vsel %vm5494_vm11, %v2313_v6, %v2317_v44  ;;  %v6491_v6 = vld [vmem:[#allocation2 + $0x1c] sm:$0xf] }
 0x17d   : > { %1930 = vst.msk [vmem:[#allocation3 + $0xc] sm:$0xf] %vm1926_vm0, %v1837_v54  ;;  %v6411_v54 = vld [vmem:[#allocation2 + $0xc4] sm:$0xf]  ;;  %v2287_v12 = vrot.slane %v2285_v42, 4 }
 0x17e   : > { %v2188_v8 = vsel %vm5494_vm11, %v2183_v16, %v6294_v31  ;;  %v2377_v48 = vshll.u32 %v6411_v54, 16  ;;  %v2284_v31 = vsel %vm5494_vm11, %v2279_v2, %v6409_v1  ;;  %v2381_v17 = vshrl.u32 %v6411_v54, 16 }
 0x17f   : > { %v2255_v26 = vrot.slane %v2254_v45, 4  ;;  %v2288_v10 = vor.u32 %v2287_v12, %v6409_v1  ;;  %v2622_v54 = vsel %vm5900_vm14, %v2620_v11, %v2621_v19  ;;  %v2535_v12 = vld [vmem:[#allocation2 + $0x48] sm:$0xe]  ;;  %v2528_v11 = vld [vmem:[#allocation2 + $0x2c] sm:$0x1] }
 0x180   : > { %2407 = vrot.lane.b32.xlu2 %v2116_v43, %s5360_s7  ;;  %2433 = vrot.lane.b32.xlu0 %v2270_v53, %s5360_s7  ;;  %v2216_v43 = vor.u32 %v2215_v9, %v6362_v58  ;;  %v2219_v53 = vshll.u32 %v1985_v56, 16  ;;  %v2344_v58 = vshrl.u32 %v2001_v3, 16  ;;  %v1998_v9 = vld [vmem:[#allocation2 + $0xa8] sm:$0xf]  ;;  %v2383_v34 = vrot.slane %v2381_v17, 4 }
 0x181   : > { %v2260_v2 = vsel %vm5494_vm11, %v2255_v26, %v6338_v57  ;;  %v2320_v4 = vshrl.u32 %v1998_v9, 16  ;;  %v2323_v63 = vshll.u32 %v1998_v9, 16  ;;  %v2289_v51 = vrot.slane %v2288_v10, 4  ;;  %v2536_v26 = vld [vmem:[#allocation2 + $0x4c] sm:$0xf] }
 0x182   : > { %v1845_v50 = vpop.permute.xlu2 %1844  ;;  %2423 = vrot.lane.b32.xlu1 %v2212_v59, %s5360_s7  ;;  %v1853_v15 = vpop.permute.xlu0 %1852  ;;  %v2342_v59 = vsel %vm5494_vm11, %v2337_v60, %v2341_v5  ;;  %v2217_v14 = vrot.slane %v2216_v43, 4  ;;  %v2221_v27 = vrot.slane %v2219_v53, 5  ;;  %v2346_v29 = vrot.slane %v2344_v58, 4 }
 0x183   : > { %1934 = vst.msk [vmem:[#allocation3 + $0x1c] sm:$0xf] %vm1926_vm0, %v1845_v50  ;;  %v6429_v50 = vrot.slane %v2377_v48, 5  ;;  %v2322_v57 = vrot.slane %v2320_v4, 4  ;;  %v2540_v4 = vld [vmem:[#allocation2 + $0x5c] sm:$0x1] }
 0x184   : > { %v1843_v21 = vpop.permute.xlu1 %1842  ;;  %1938 = vst.msk [vmem:[#allocation3 + $0x2c] sm:$0xf] %vm1926_vm0, %v1853_v15  ;;  %v2350_v62 = vor.u32 %v2349_v52, %v2346_v29 }
 0x185   : > { %1933 = vst.msk [vmem:[#allocation3 + $0x18] sm:$0xf] %vm1926_vm0, %v1843_v21  ;;  %v6437_v21 = vld [vmem:[#allocation2 + $0xb8] sm:$0xf]  ;;  %v2384_v43 = vor.u32 %v2383_v34, %v6429_v50 }
 0x186   : > { %v2353_v22 = vshll.u32 %v6437_v21, 16  ;;  %v2351_v60 = vrot.slane %v2350_v62, 4  ;;  %v2357_v25 = vshrl.u32 %v6437_v21, 16 }
 0x187   : > { %v2385_v20 = vrot.slane %v2384_v43, 4 }
 0x188   : > { %2413 = vrot.lane.b32.xlu2 %v2150_v39, %s5360_s7  ;;  %2439 = vrot.lane.b32.xlu0 %v2308_v37, %s5360_s7  ;;  %v2222_v39 = vsel %vm5494_vm11, %v2217_v14, %v2221_v27  ;;  %v2380_v37 = vsel %vm5494_vm11, %v2375_v49, %v6429_v50  ;;  %v6456_v5 = vrot.slane %v2353_v22, 5  ;;  %v2639_v49 = vrot.slane %v6476_v24, 5  ;;  %v2531_v50 = vld [vmem:[#allocation2 + $0x38] sm:$0x1] }
 0x189   : > { %v2359_v29 = vrot.slane %v2357_v25, 4  ;;  %v2642_v42 = vrot.slane %v2531_v50, 5 }
 0x18a   : > { %v1851_v7 = vpop.permute.xlu2 %1850  ;;  %2429 = vrot.lane.b32.xlu1 %v2246_v35, %s5360_s7  ;;  %v1859_v55 = vpop.permute.xlu0 %1858  ;;  %v1994_v35 = vld [vmem:[#allocation2 + $0x98] sm:$0x1]  ;;  %v2356_v1 = vsel %vm5494_vm11, %v2351_v60, %v6456_v5  ;;  %v2641_v52 = vrot.slane %v2639_v49, 4 }
 0x18b   : > { %1937 = vst.msk [vmem:[#allocation3 + $0x28] sm:$0xf] %vm1926_vm0, %v1851_v7  ;;  %v2291_v7 = vshll.u32 %v1994_v35, 16  ;;  %v2360_v17 = vor.u32 %v2359_v29, %v6456_v5  ;;  %v6511_v5 = vld [vmem:[#allocation2 + $0x58] sm:$0xf] }
 0x18c   : > { %v1849_v0 = vpop.permute.xlu1 %1848  ;;  %1941 = vst.msk [vmem:[#allocation3 + $0x38] sm:$0xf] %vm1926_vm0, %v1859_v55  ;;  %v2006_v55 = vld [vmem:[#allocation2 + $0xc8] sm:$0x1]  ;;  %v2643_v22 = vsel %vm5900_vm14, %v2641_v52, %v2642_v42 }
 0x18d   : > { %1936 = vst.msk [vmem:[#allocation3 + $0x24] sm:$0xf] %vm1926_vm0, %v1849_v0  ;;  %v2526_v0 = vld [vmem:[#allocation2 + $0x24] sm:$0xe]  ;;  %v2387_v53 = vshll.u32 %v2006_v55, 16  ;;  %v2293_v3 = vrot.slane %v2291_v7, 5 }
 0x18e   : > { %v4788_v33 = vrot.slane %v2526_v0, 9  ;;  %v2361_v19 = vrot.slane %v2360_v17, 4  ;;  %v2532_v0 = vld [vmem:[#allocation2 + $0x3c] sm:$0xe] }
 0x18f   : > { %v2389_v58 = vrot.slane %v2387_v53, 5  ;;  %v2294_v27 = vsel %vm5494_vm11, %v2289_v51, %v2293_v3  ;;  %v2663_v53 = vrot.slane %v2540_v4, 5 }
 0x190   : > { %2419 = vrot.lane.b32.xlu2 %v2188_v8, %s5360_s7  ;;  %2445 = vrot.lane.b32.xlu0 %v2342_v59, %s5360_s7  ;;  %v6466_v8 = vld [vmem:[#allocation2 + $0x28] sm:$0xf]  ;;  %v2325_v59 = vrot.slane %v2323_v63, 5 }
 0x191   : > { %v2632_v46 = vrot.slane %v6466_v8, 5  ;;  %v6525_v8 = vld [vmem:[#allocation2 + $0x40] sm:$0xf] }
 0x192   : > { %v1857_v15 = vpop.permute.xlu2 %1856  ;;  %2435 = vrot.lane.b32.xlu1 %v2284_v31, %s5360_s7  ;;  %v1865_v40 = vpop.permute.xlu0 %1864  ;;  %v2326_v30 = vor.u32 %v2325_v59, %v2322_v57  ;;  %v4790_v57 = vrot.slane %v2532_v0, 9  ;;  %v2646_v59 = vrot.slane %v6525_v8, 5 }
 0x193   : > { %1940 = vst.msk [vmem:[#allocation3 + $0x34] sm:$0xf] %vm1926_vm0, %v1857_v15  ;;  %v2633_v13 = vsel %vm5900_vm14, %v4788_v33, %v2632_v46  ;;  %v2390_v15 = vsel %vm5494_vm11, %v2385_v20, %v2389_v58  ;;  %v2634_v34 = vrot.slane %v2632_v46, 4  ;;  %v2544_v20 = vld [vmem:[#allocation2 + $0x6c] sm:$0xe] }
 0x194   : > { %v1855_v38 = vpop.permute.xlu1 %1854  ;;  %1944 = vst.msk [vmem:[#allocation3 + $0x44] sm:$0xf] %vm1926_vm0, %v1865_v40  ;;  %v2523_v40 = vld [vmem:[#allocation2 + $0x18] sm:$0xe]  ;;  %v2327_v44 = vrot.slane %v2326_v30, 4  ;;  %v2647_v25 = vsel %vm5900_vm14, %v4790_v57, %v2646_v59  ;;  %v4794_v23 = vrot.slane %v2544_v20, 9 }
 0x195   : > { %1939 = vst.msk [vmem:[#allocation3 + $0x30] sm:$0xf] %vm1926_vm0, %v1855_v38  ;;  %v4787_v45 = vrot.slane %v2523_v40, 9  ;;  %v2545_v58 = vld [vmem:[#allocation2 + $0x70] sm:$0xf] }
 0x196   : > { %v6593_v57 = vld [vmem:[#allocation2 + $0x88] sm:$0xf] }
 0x198   : > { %2425 = vrot.lane.b32.xlu2 %v2222_v39, %s5360_s7  ;;  %2451 = vrot.lane.b32.xlu0 %v2380_v37, %s5360_s7  ;;  %v2003_v39 = vld [vmem:[#allocation2 + $0xbc] sm:$0x1]  ;;  %v2625_v37 = vrot.slane %v6491_v6, 5 }
 0x199   : > { %v2363_v62 = vshll.u32 %v2003_v39, 16 }
 0x19a   : > { %v1863_v16 = vpop.permute.xlu2 %1862  ;;  %2441 = vrot.lane.b32.xlu1 %v2318_v36, %s5360_s7  ;;  %v1871_v56 = vpop.permute.xlu0 %1870  ;;  %v2332_v36 = vsel %vm5494_vm11, %v2327_v44, %v6385_v28  ;;  %v2626_v35 = vsel %vm5900_vm14, %v4787_v45, %v2625_v37  ;;  %v2653_v28 = vrot.slane %v2536_v26, 5  ;;  %v2541_v45 = vld [vmem:[#allocation2 + $0x60] sm:$0xe] }
 0x19b   : > { %1943 = vst.msk [vmem:[#allocation3 + $0x40] sm:$0xf] %vm1926_vm0, %v1863_v16  ;;  %v2365_v16 = vrot.slane %v2363_v62, 5 }
 0x19c   : > { %v1861_v18 = vpop.permute.xlu1 %1860  ;;  %1947 = vst.msk [vmem:[#allocation3 + $0x50] sm:$0xf] %vm1926_vm0, %v1871_v56  ;;  %v4791_v56 = vrot.slane %v2535_v12, 9  ;;  %v2655_v40 = vrot.slane %v2653_v28, 4  ;;  %v4793_v12 = vrot.slane %v2541_v45, 9 }
 0x19d   : > { %1942 = vst.msk [vmem:[#allocation3 + $0x3c] sm:$0xf] %vm1926_vm0, %v1861_v18  ;;  %v2635_v18 = vrot.slane %v2528_v11, 5  ;;  %v2366_v7 = vsel %vm5494_vm11, %v2361_v19, %v2365_v16  ;;  %v2534_v16 = vld [vmem:[#allocation2 + $0x44] sm:$0x1] }
 0x19e   : > { %v2654_v55 = vsel %vm5900_vm14, %v4791_v56, %v2653_v28  ;;  %v2553_v56 = vld [vmem:[#allocation2 + $0x90] sm:$0xe]  ;;  %v2554_v28 = vld [vmem:[#allocation2 + $0x94] sm:$0xf] }
 0x19f   : > { %v2636_v63 = vsel %vm5900_vm14, %v2634_v34, %v2635_v18  ;;  %v2648_v34 = vrot.slane %v2646_v59, 4  ;;  %v2649_v18 = vrot.slane %v2534_v16, 5  ;;  %v4797_v24 = vrot.slane %v2553_v56, 9 }
 0x1a0   : > { %2431 = vrot.lane.b32.xlu2 %v2260_v2, %s5360_s7  ;;  %2730 = vrot.lane.b32.xlu0 %v2622_v54, %s5361_s8  ;;  %v2660_v2 = vrot.slane %v6511_v5, 5  ;;  %v2520_v54 = vld [vmem:[#allocation2 + $0xc] sm:$0xe] }
 0x1a1   : > { %v2650_v0 = vsel %vm5900_vm14, %v2648_v34, %v2649_v18  ;;  %v2552_v18 = vld [vmem:[#allocation2 + $0x8c] sm:$0x1] }
 0x1a2   : > { %v1869_v48 = vpop.permute.xlu2 %1868  ;;  %2447 = vrot.lane.b32.xlu1 %v2356_v1, %s5360_s7  ;;  %v1877_v31 = vpop.permute.xlu0 %1876  ;;  %v4786_v1 = vrot.slane %v2520_v54, 9  ;;  %v2662_v43 = vrot.slane %v2660_v2, 4 }
 0x1a3   : > { %1946 = vst.msk [vmem:[#allocation3 + $0x4c] sm:$0xf] %vm1926_vm0, %v1869_v48 }
 0x1a4   : > { %v1867_v14 = vpop.permute.xlu1 %1866  ;;  %1950 = vst.msk [vmem:[#allocation3 + $0x5c] sm:$0xf] %vm1926_vm0, %v1877_v31  ;;  %v2619_v46 = vsel %vm5900_vm14, %v4786_v1, %v2618_v32  ;;  %v2664_v48 = vsel %vm5900_vm14, %v2662_v43, %v2663_v53  ;;  %v2525_v31 = vld [vmem:[#allocation2 + $0x20] sm:$0x1]  ;;  %v2538_v43 = vld [vmem:[#allocation2 + $0x54] sm:$0xe] }
 0x1a5   : > { %1945 = vst.msk [vmem:[#allocation3 + $0x48] sm:$0xf] %vm1926_vm0, %v1867_v14  ;;  %v2537_v14 = vld [vmem:[#allocation2 + $0x50] sm:$0x1]  ;;  %v2628_v30 = vrot.slane %v2525_v31, 5  ;;  %v4792_v59 = vrot.slane %v2538_v43, 9 }
 0x1a6   : > { %v2656_v6 = vrot.slane %v2537_v14, 5  ;;  %v2558_v53 = vld [vmem:[#allocation2 + $0xa4] sm:$0x1]  ;;  %v2556_v43 = vld [vmem:[#allocation2 + $0x9c] sm:$0xe] }
 0x1a7   : > { %v2661_v14 = vsel %vm5900_vm14, %v4792_v59, %v2660_v2  ;;  %v3076_v59 = vld [vmem:[#allocation2 + $0x7c] sm:$0xf] }
 0x1a8   : > { %2437 = vrot.lane.b32.xlu2 %v2294_v27, %s5360_s7  ;;  %2736 = vrot.lane.b32.xlu0 %v2633_v13, %s5361_s8  ;;  %v2627_v27 = vrot.slane %v2625_v37, 4  ;;  %v2674_v13 = vrot.slane %v2545_v58, 5  ;;  %v2657_v39 = vsel %vm5900_vm14, %v2655_v40, %v2656_v6  ;;  %v6559_v37 = vld [vmem:[#allocation2 + $0x64] sm:$0xf]  ;;  %v2688_v58 = vrot.slane %v6593_v57, 5 }
 0x1a9   : > { %v2667_v26 = vrot.slane %v6559_v37, 5 }
 0x1aa   : > { %v1875_v38 = vpop.permute.xlu2 %1874  ;;  %2453 = vrot.lane.b32.xlu1 %v2390_v15, %s5360_s7  ;;  %v1883_v21 = vpop.permute.xlu0 %1882  ;;  %v6545_v15 = vld [vmem:[#allocation2 + $0x7c] sm:$0xf]  ;;  %v2629_v29 = vsel %vm5900_vm14, %v2627_v27, %v2628_v30  ;;  %v2675_v52 = vsel %vm5900_vm14, %v4794_v23, %v2674_v13  ;;  %v2676_v54 = vrot.slane %v2674_v13, 4  ;;  %v2543_v30 = vld [vmem:[#allocation2 + $0x68] sm:$0x1] }
 0x1ab   : > { %1949 = vst.msk [vmem:[#allocation3 + $0x58] sm:$0xf] %vm1926_vm0, %v1875_v38  ;;  %v2681_v42 = vrot.slane %v6545_v15, 5  ;;  %v2529_v38 = vld [vmem:[#allocation2 + $0x30] sm:$0xe]  ;;  %v2669_v40 = vrot.slane %v2667_v26, 4 }
 0x1ac   : > { %v1873_v61 = vpop.permute.xlu1 %1872  ;;  %1953 = vst.msk [vmem:[#allocation3 + $0x68] sm:$0xf] %vm1926_vm0, %v1883_v21  ;;  %v2549_v21 = vld [vmem:[#allocation2 + $0x80] sm:$0x1]  ;;  %v2562_v23 = vld [vmem:[#allocation2 + $0xb4] sm:$0xe] }
 0x1ad   : > { %1948 = vst.msk [vmem:[#allocation3 + $0x54] sm:$0xf] %vm1926_vm0, %v1873_v61  ;;  %v4789_v61 = vrot.slane %v2529_v38, 9  ;;  %v2684_v17 = vrot.slane %v2549_v21, 5  ;;  %v2563_v13 = vld [vmem:[#allocation2 + $0xb8] sm:$0xf] }
 0x1ae   : > { %v2670_v6 = vrot.slane %v2543_v30, 5  ;;  %v4800_v5 = vrot.slane %v2562_v23, 9 }
 0x1af   : > { %v2640_v11 = vsel %vm5900_vm14, %v4789_v61, %v2639_v49 }
 0x1b0   : > { %2443 = vrot.lane.b32.xlu2 %v2332_v36, %s5360_s7  ;;  %2742 = vrot.lane.b32.xlu0 %v2643_v22, %s5361_s8  ;;  %v2683_v36 = vrot.slane %v2681_v42, 4  ;;  %v2671_v45 = vsel %vm5900_vm14, %v2669_v40, %v2670_v6  ;;  %v2882_v40 = vld [vmem:[#allocation2 + $0xa8] sm:$0xf] }
 0x1b2   : > { %v1881_v9 = vpop.permute.xlu2 %1880  ;;  %2732 = vrot.lane.b32.xlu1 %v2626_v35, %s5361_s8  ;;  %v1889_v60 = vpop.permute.xlu0 %1888  ;;  %v2685_v19 = vsel %vm5900_vm14, %v2683_v36, %v2684_v17  ;;  %v2547_v36 = vld [vmem:[#allocation2 + $0x78] sm:$0xe]  ;;  %v2567_v17 = vld [vmem:[#allocation2 + $0xc8] sm:$0x1] }
 0x1b3   : > { %1952 = vst.msk [vmem:[#allocation3 + $0x64] sm:$0xf] %vm1926_vm0, %v1881_v9  ;;  %v2668_v9 = vsel %vm5900_vm14, %v4793_v12, %v2667_v26  ;;  %v2560_v12 = vld [vmem:[#allocation2 + $0xac] sm:$0xf]  ;;  %v4795_v26 = vrot.slane %v2547_v36, 9 }
 0x1b4   : > { %v1879_v10 = vpop.permute.xlu1 %1878  ;;  %1956 = vst.msk [vmem:[#allocation3 + $0x74] sm:$0xf] %vm1926_vm0, %v1889_v60  ;;  %v2546_v60 = vld [vmem:[#allocation2 + $0x74] sm:$0x1]  ;;  %v3087_v36 = vld [vmem:[#allocation2 + $0xa8] sm:$0xf] }
 0x1b5   : > { %1951 = vst.msk [vmem:[#allocation3 + $0x60] sm:$0xf] %vm1926_vm0, %v1879_v10  ;;  %v2695_v10 = vrot.slane %v2554_v28, 5  ;;  %v2677_v4 = vrot.slane %v2546_v60, 5  ;;  %v2709_v28 = vrot.slane %v2560_v12, 5  ;;  %v2682_v60 = vsel %vm5900_vm14, %v4795_v26, %v2681_v42 }
 0x1b6   : > { %v6684_v12 = vld [vmem:[#allocation2 + $0x7c] sm:$0xf]  ;;  %v2874_v26 = vld [vmem:[#allocation2 + $0x78] sm:$0xf] }
 0x1b7   : > { %v2696_v8 = vsel %vm5900_vm14, %v4797_v24, %v2695_v10  ;;  %v2697_v38 = vrot.slane %v2695_v10, 4  ;;  %v2564_v10 = vld [vmem:[#allocation2 + $0xbc] sm:$0x1] }
 0x1b8   : > { %2449 = vrot.lane.b32.xlu2 %v2366_v7, %s5360_s7  ;;  %2748 = vrot.lane.b32.xlu0 %v2654_v55, %s5361_s8  ;;  %v6579_v55 = vld [vmem:[#allocation2 + $0xa0] sm:$0xf]  ;;  %s4986_s7 = sshll.u32 %s5346_s15, 7  ;;  %s4658_s15 = sshll.u32 %s7232_s6, 4  ;;  %s4659_s15 = int_to_ptr.vmem [resolvable:$true] %s4658_s15 }
 0x1b9   : > { %v2702_v1 = vrot.slane %v6579_v55, 5 }
 0x1ba   : > { %v1887_v51 = vpop.permute.xlu2 %1886  ;;  %2738 = vrot.lane.b32.xlu1 %v2636_v63, %s5361_s8  ;;  %v2392_v3 = vpop.permute.xlu0 %2391 }
 0x1bb   : > { %1955 = vst.msk [vmem:[#allocation3 + $0x70] sm:$0xf] %vm1926_vm0, %v1887_v51  ;;  %v2678_v51 = vsel %vm5900_vm14, %v2676_v54, %v2677_v4  ;;  %v2719_v4 = vrot.slane %v2564_v10, 5 }
 0x1bc   : > { %v1885_v33 = vpop.permute.xlu1 %1884  ;;  %2488 = vst.msk [vmem:[#allocation3] sm:$0xf] %vm2487_vm2, %v2392_v3  ;;  %v2550_v3 = vld [vmem:[#allocation2 + $0x84] sm:$0xe] }
 0x1bd   : > { %1954 = vst.msk [vmem:[#allocation3 + $0x6c] sm:$0xf] %vm1926_vm0, %v1885_v33  ;;  %v2704_v33 = vrot.slane %v2702_v1, 4  ;;  %v4796_v20 = vrot.slane %v2550_v3, 9 }
 0x1c0   : > { %2728 = vrot.lane.b32.xlu2 %v2619_v46, %s5361_s8  ;;  %2754 = vrot.lane.b32.xlu0 %v2664_v48, %s5361_s8  ;;  %v2705_v46 = vrot.slane %v2558_v53, 5 }
 0x1c2   : > { %v1893_v50 = vpop.permute.xlu2 %1892  ;;  %2744 = vrot.lane.b32.xlu1 %v2647_v25, %s5361_s8  ;;  %v2398_v32 = vpop.permute.xlu0 %2397  ;;  %v2706_v27 = vsel %vm5900_vm14, %v2704_v33, %v2705_v46 }
 0x1c3   : > { %1958 = vst.msk [vmem:[#allocation3 + $0x7c] sm:$0xf] %vm1926_vm0, %v1893_v50  ;;  %v2689_v50 = vsel %vm5900_vm14, %v4796_v20, %v2688_v58  ;;  %v3305_v20 = vshrl.u32 %v3076_v59, 16 }
 0x1c4   : > { %v1891_v44 = vpop.permute.xlu1 %1890  ;;  %2491 = vst.msk [vmem:[#allocation3 + $0xc] sm:$0xf] %vm2487_vm2, %v2398_v32  ;;  %v2555_v32 = vld [vmem:[#allocation2 + $0x98] sm:$0x1] }
 0x1c5   : > { %1957 = vst.msk [vmem:[#allocation3 + $0x78] sm:$0xf] %vm1926_vm0, %v1891_v44  ;;  %v2716_v44 = vrot.slane %v2563_v13, 5  ;;  %v2698_v21 = vrot.slane %v2555_v32, 5  ;;  %v3307_v23 = vrot.slane %v3305_v20, 4 }
 0x1c6   : > { %v2862_v20 = vld [vmem:[#allocation2 + $0x30] sm:$0xf] }
 0x1c7   : > { %v2717_v37 = vsel %vm5900_vm14, %v4800_v5, %v2716_v44  ;;  %v2718_v42 = vrot.slane %v2716_v44, 4  ;;  %v2565_v44 = vld [vmem:[#allocation2 + $0xc0] sm:$0xe] }
 0x1c8   : > { %2734 = vrot.lane.b32.xlu2 %v2629_v29, %s5361_s8  ;;  %2760 = vrot.lane.b32.xlu0 %v2675_v52, %s5361_s8  ;;  %v6613_v52 = vld [vmem:[#allocation2 + $0xc4] sm:$0xf] }
 0x1c9   : > { %v2723_v61 = vrot.slane %v6613_v52, 5  ;;  %v2720_v53 = vsel %vm5900_vm14, %v2718_v42, %v2719_v4  ;;  %v3766_v52 = vrot.slane %v6684_v12, 5  ;;  %v2883_v42 = vld [vmem:[#allocation2 + $0xac] sm:$0xf] }
 0x1ca   : > { %v2396_v62 = vpop.permute.xlu2 %2395  ;;  %2750 = vrot.lane.b32.xlu1 %v2657_v39, %s5361_s8  ;;  %v2404_v22 = vpop.permute.xlu0 %2403 }
 0x1cb   : > { %2490 = vst.msk [vmem:[#allocation3 + $0x8] sm:$0xf] %vm2487_vm2, %v2396_v62  ;;  %v2699_v62 = vsel %vm5900_vm14, %v2697_v38, %v2698_v21 }
 0x1cc   : > { %v2394_v35 = vpop.permute.xlu1 %2393  ;;  %2494 = vst.msk [vmem:[#allocation3 + $0x18] sm:$0xf] %vm2487_vm2, %v2404_v22  ;;  %v2559_v22 = vld [vmem:[#allocation2 + $0xa8] sm:$0xe] }
 0x1cd   : > { %2489 = vst.msk [vmem:[#allocation3 + $0x4] sm:$0xf] %vm2487_vm2, %v2394_v35  ;;  %v2725_v35 = vrot.slane %v2723_v61, 4  ;;  %v4799_v56 = vrot.slane %v2559_v22, 9  ;;  %v3636_v22 = vld [vmem:[#allocation2 + $0x78] sm:$0xe] }
 0x1cf   : > { %v2710_v24 = vsel %vm5900_vm14, %v4799_v56, %v2709_v28 }
 0x1d0   : > { %2740 = vrot.lane.b32.xlu2 %v2640_v11, %s5361_s8  ;;  %2766 = vrot.lane.b32.xlu0 %v2685_v19, %s5361_s8  ;;  %v2726_v11 = vrot.slane %v2567_v17, 5 }
 0x1d2   : > { %v2402_v7 = vpop.permute.xlu2 %2401  ;;  %2756 = vrot.lane.b32.xlu1 %v2668_v9, %s5361_s8  ;;  %v2410_v49 = vpop.permute.xlu0 %2409  ;;  %v2727_v34 = vsel %vm5900_vm14, %v2725_v35, %v2726_v11  ;;  %v3388_v35 = vshrl.u32 %v3087_v36, 16  ;;  %v3391_v11 = vshll.u32 %v3087_v36, 16 }
 0x1d3   : > { %2493 = vst.msk [vmem:[#allocation3 + $0x14] sm:$0xf] %vm2487_vm2, %v2402_v7  ;;  %v2690_v7 = vrot.slane %v2688_v58, 4  ;;  %v2561_v58 = vld [vmem:[#allocation2 + $0xb0] sm:$0x1] }
 0x1d4   : > { %v2400_v63 = vpop.permute.xlu1 %2399  ;;  %2497 = vst.msk [vmem:[#allocation3 + $0x24] sm:$0xf] %vm2487_vm2, %v2410_v49  ;;  %v2691_v49 = vrot.slane %v2552_v18, 5 }
 0x1d5   : > { %2492 = vst.msk [vmem:[#allocation3 + $0x10] sm:$0xf] %vm2487_vm2, %v2400_v63 }
 0x1d8   : > { %2746 = vrot.lane.b32.xlu2 %v2650_v0, %s5361_s8  ;;  %2772 = vrot.lane.b32.xlu0 %v2696_v8, %s5361_s8  ;;  %v2692_v0 = vsel %vm5900_vm14, %v2690_v7, %v2691_v49  ;;  %v2860_v8 = vld [vmem:[#allocation2 + $0x24] sm:$0xf]  ;;  %v3650_v49 = vld [vmem:[#allocation2 + $0xb0] sm:$0x1] }
 0x1da   : > { %v2408_v48 = vpop.permute.xlu2 %2407  ;;  %2762 = vrot.lane.b32.xlu1 %v2678_v51, %s5361_s8  ;;  %v2416_v31 = vpop.permute.xlu0 %2415  ;;  %v4798_v51 = vrot.slane %v2556_v43, 9  ;;  %v3075_v43 = vld [vmem:[#allocation2 + $0x78] sm:$0xf] }
 0x1db   : > { %2496 = vst.msk [vmem:[#allocation3 + $0x20] sm:$0xf] %vm2487_vm2, %v2408_v48  ;;  %v2863_v48 = vld [vmem:[#allocation2 + $0x34] sm:$0xf] }
 0x1dc   : > { %v2406_v25 = vpop.permute.xlu1 %2405  ;;  %2500 = vst.msk [vmem:[#allocation3 + $0x30] sm:$0xf] %vm2487_vm2, %v2416_v31  ;;  %v2703_v46 = vsel %vm5900_vm14, %v4798_v51, %v2702_v1  ;;  %v3301_v31 = vshll.u32 %v3076_v59, 16  ;;  %v3052_v59 = vld [vmem:[#allocation2 + $0x1c] sm:$0xf] }
 0x1dd   : > { %2495 = vst.msk [vmem:[#allocation3 + $0x1c] sm:$0xf] %vm2487_vm2, %v2406_v25  ;;  %v2858_v25 = vld [vmem:[#allocation2 + $0x18] sm:$0xf] }
 0x1de   : > { %v6663_v30 = vrot.slane %v3301_v31, 5 }
 0x1e0   : > { %2752 = vrot.lane.b32.xlu2 %v2661_v14, %s5361_s8  ;;  %2778 = vrot.lane.b32.xlu0 %v2706_v27, %s5361_s8  ;;  %v2711_v14 = vrot.slane %v2709_v28, 4  ;;  %v2712_v27 = vrot.slane %v2561_v58, 5  ;;  %v3308_v6 = vor.u32 %v3307_v23, %v6663_v30  ;;  %v3051_v28 = vld [vmem:[#allocation2 + $0x18] sm:$0xf]  ;;  %v3109_v23 = vshll.u32 %v3052_v59, 16 }
 0x1e2   : > { %v2414_v29 = vpop.permute.xlu2 %2413  ;;  %2768 = vrot.lane.b32.xlu1 %v2689_v50, %s5361_s8  ;;  %v2422_v2 = vpop.permute.xlu0 %2421  ;;  %v3077_v50 = vld [vmem:[#allocation2 + $0x80] sm:$0x1]  ;;  %v2713_v32 = vsel %vm5900_vm14, %v2711_v14, %v2712_v27  ;;  %v3309_v38 = vrot.slane %v3308_v6, 4  ;;  %v3295_v14 = vshll.u32 %v3075_v43, 16 }
 0x1e3   : > { %2499 = vst.msk [vmem:[#allocation3 + $0x2c] sm:$0xf] %vm2487_vm2, %v2414_v29  ;;  %v3311_v5 = vshll.u32 %v3077_v50, 16  ;;  %v2861_v29 = vld [vmem:[#allocation2 + $0x28] sm:$0xf] }
 0x1e4   : > { %v2412_v39 = vpop.permute.xlu1 %2411  ;;  %2503 = vst.msk [vmem:[#allocation3 + $0x3c] sm:$0xf] %vm2487_vm2, %v2422_v2  ;;  %v4801_v2 = vrot.slane %v2565_v44, 9 }
 0x1e5   : > { %2498 = vst.msk [vmem:[#allocation3 + $0x28] sm:$0xf] %vm2487_vm2, %v2412_v39  ;;  %v3313_v21 = vrot.slane %v3311_v5, 5  ;;  %v3111_v5 = vrot.slane %v3109_v23, 5 }
 0x1e6   : > { %v2724_v17 = vsel %vm5900_vm14, %v4801_v2, %v2723_v61 }
 0x1e8   : > { %2758 = vrot.lane.b32.xlu2 %v2671_v45, %s5361_s8  ;;  %2784 = vrot.lane.b32.xlu0 %v2717_v37, %s5361_s8 }
 0x1ea   : > { %v2420_v19 = vpop.permute.xlu2 %2419  ;;  %2774 = vrot.lane.b32.xlu1 %v2699_v62, %s5361_s8  ;;  %v2428_v16 = vpop.permute.xlu0 %2427  ;;  %v3314_v62 = vsel %vm5494_vm11, %v3309_v38, %v3313_v21  ;;  %v3065_v21 = vld [vmem:[#allocation2 + $0x50] sm:$0x1] }
 0x1eb   : > { %2502 = vst.msk [vmem:[#allocation3 + $0x38] sm:$0xf] %vm2487_vm2, %v2420_v19  ;;  %v4810_v19 = vrot.slane %v3636_v22, 9 }
 0x1ec   : > { %v2418_v9 = vpop.permute.xlu1 %2417  ;;  %2506 = vst.msk [vmem:[#allocation3 + $0x48] sm:$0xf] %vm2487_vm2, %v2428_v16  ;;  %v6689_v16 = vld [vmem:[#allocation2 + $0xac] sm:$0xf] }
 0x1ed   : > { %2501 = vst.msk [vmem:[#allocation3 + $0x34] sm:$0xf] %vm2487_vm2, %v2418_v9  ;;  %v2859_v9 = vld [vmem:[#allocation2 + $0x1c] sm:$0xf]  ;;  %v3794_v10 = vrot.slane %v6689_v16, 5  ;;  %v3767_v7 = vsel %vm5900_vm14, %v4810_v19, %v3766_v52 }
 0x1ee   : > { %v3626_v16 = vld [vmem:[#allocation2 + $0x50] sm:$0x1] }
 0x1f0   : > { %2764 = vrot.lane.b32.xlu2 %v2682_v60, %s5361_s8  ;;  %2790 = vrot.lane.b32.xlu0 %v2727_v34, %s5361_s8  ;;  %v3390_v60 = vrot.slane %v3388_v35, 4  ;;  %v3393_v34 = vrot.slane %v3391_v11, 5  ;;  %v3215_v35 = vshll.u32 %v3065_v21, 16  ;;  %v3113_v11 = vshrl.u32 %v3052_v59, 16  ;;  %v3078_v59 = vld [vmem:[#allocation2 + $0x84] sm:$0xf] }
 0x1f2   : > { %v2426_v54 = vpop.permute.xlu2 %2425  ;;  %2780 = vrot.lane.b32.xlu1 %v2710_v24, %s5361_s8  ;;  %v2434_v15 = vpop.permute.xlu0 %2433  ;;  %v6694_v24 = vld [vmem:[#allocation2 + $0xac] sm:$0xf]  ;;  %v3394_v4 = vor.u32 %v3393_v34, %v3390_v60  ;;  %v3089_v60 = vld [vmem:[#allocation2 + $0xb0] sm:$0x1]  ;;  %v3115_v34 = vrot.slane %v3113_v11, 4 }
 0x1f3   : > { %2505 = vst.msk [vmem:[#allocation3 + $0x44] sm:$0xf] %vm2487_vm2, %v2426_v54  ;;  %v3100_v54 = vshrl.u32 %v3051_v28, 16 }
 0x1f4   : > { %v2424_v63 = vpop.permute.xlu1 %2423  ;;  %2509 = vst.msk [vmem:[#allocation3 + $0x54] sm:$0xf] %vm2487_vm2, %v2434_v15  ;;  %v3103_v15 = vshll.u32 %v3051_v28, 16 }
 0x1f5   : > { %2504 = vst.msk [vmem:[#allocation3 + $0x40] sm:$0xf] %vm2487_vm2, %v2424_v63  ;;  %v3397_v63 = vshll.u32 %v6694_v24, 16 }
 0x1f6   : > { %v3105_v51 = vrot.slane %v3103_v15, 5 }
 0x1f8   : > { %2770 = vrot.lane.b32.xlu2 %v2692_v0, %s5361_s8  ;;  %2926 = vrot.lane.b32.xlu0 %v2860_v8, %s5362_s9  ;;  %v3796_v0 = vrot.slane %v3794_v10, 4  ;;  %v3797_v8 = vrot.slane %v3650_v49, 5 }
 0x1fa   : > { %v2432_v3 = vpop.permute.xlu2 %2431  ;;  %2786 = vrot.lane.b32.xlu1 %v2720_v53, %s5361_s8  ;;  %v2440_v57 = vpop.permute.xlu0 %2439  ;;  %v3102_v53 = vrot.slane %v3100_v54, 4  ;;  %v3798_v58 = vsel %vm5900_vm14, %v3796_v0, %v3797_v8  ;;  %v3407_v54 = vshll.u32 %v3089_v60, 16  ;;  %v3116_v0 = vor.u32 %v3115_v34, %v3111_v5 }
 0x1fb   : > { %2508 = vst.msk [vmem:[#allocation3 + $0x50] sm:$0xf] %vm2487_vm2, %v2432_v3  ;;  %v3741_v34 = vrot.slane %v3626_v16, 5 }
 0x1fc   : > { %v2430_v33 = vpop.permute.xlu1 %2429  ;;  %2512 = vst.msk [vmem:[#allocation3 + $0x60] sm:$0xf] %vm2487_vm2, %v2440_v57  ;;  %v3106_v27 = vor.u32 %v3105_v51, %v3102_v53  ;;  %v3409_v53 = vrot.slane %v3407_v54, 5 }
 0x1fd   : > { %2507 = vst.msk [vmem:[#allocation3 + $0x4c] sm:$0xf] %vm2487_vm2, %v2430_v33  ;;  %v3064_v33 = vld [vmem:[#allocation2 + $0x4c] sm:$0xf] }
 0x1fe   : > { %v3107_v6 = vrot.slane %v3106_v27, 4 }
 0x200   : > { %2776 = vrot.lane.b32.xlu2 %v2703_v46, %s5361_s8  ;;  %2932 = vrot.lane.b32.xlu0 %v2863_v48, %s5362_s9  ;;  %v3395_v46 = vrot.slane %v3394_v4, 4  ;;  %v6709_v48 = vrot.slane %v3397_v63, 5  ;;  %v3112_v22 = vsel %vm5494_vm11, %v3107_v6, %v3111_v5  ;;  %v6746_v4 = vld [vmem:[#allocation2 + $0x4c] sm:$0xf]  ;;  %v2866_v63 = vld [vmem:[#allocation2 + $0x48] sm:$0xf] }
 0x201   : > { %v3079_v5 = vld [vmem:[#allocation2 + $0x88] sm:$0xf] }
 0x202   : > { %v2438_v13 = vpop.permute.xlu2 %2437  ;;  %2922 = vrot.lane.b32.xlu1 %v2858_v25, %s5362_s9  ;;  %v2446_v55 = vpop.permute.xlu0 %2445  ;;  %v3292_v25 = vshrl.u32 %v3075_v43, 16  ;;  %v3400_v50 = vsel %vm5494_vm11, %v3395_v46, %v6709_v48 }
 0x203   : > { %2511 = vst.msk [vmem:[#allocation3 + $0x5c] sm:$0xf] %vm2487_vm2, %v2438_v13  ;;  %v3205_v13 = vshll.u32 %v3064_v33, 16 }
 0x204   : > { %v2436_v1 = vpop.permute.xlu1 %2435  ;;  %2515 = vst.msk [vmem:[#allocation3 + $0x6c] sm:$0xf] %vm2487_vm2, %v2446_v55  ;;  %v3209_v55 = vshrl.u32 %v3064_v33, 16  ;;  %v3117_v33 = vrot.slane %v3116_v0, 4 }
 0x205   : > { %2510 = vst.msk [vmem:[#allocation3 + $0x58] sm:$0xf] %vm2487_vm2, %v2436_v1  ;;  %v3638_v1 = vld [vmem:[#allocation2 + $0x80] sm:$0x1]  ;;  %v6720_v44 = vrot.slane %v3205_v13, 5 }
 0x206   : > { %v3612_v13 = vld [vmem:[#allocation2 + $0x18] sm:$0xe] }
 0x208   : > { %2782 = vrot.lane.b32.xlu2 %v2713_v32, %s5361_s8  ;;  %2970 = vrot.lane.b32.xlu0 %v2882_v40, %s5362_s9  ;;  %v3294_v32 = vrot.slane %v3292_v25, 4  ;;  %v3297_v40 = vrot.slane %v3295_v14, 5  ;;  %v3316_v25 = vshrl.u32 %v3078_v59, 16  ;;  %v3319_v14 = vshll.u32 %v3078_v59, 16 }
 0x20a   : > { %v2444_v39 = vpop.permute.xlu2 %2443  ;;  %2928 = vrot.lane.b32.xlu1 %v2861_v29, %s5362_s9  ;;  %v2452_v45 = vpop.permute.xlu0 %2451  ;;  %v3211_v29 = vrot.slane %v3209_v55, 4  ;;  %v6763_v55 = vld [vmem:[#allocation2 + $0x1c] sm:$0xf] }
 0x20b   : > { %2514 = vst.msk [vmem:[#allocation3 + $0x68] sm:$0xf] %vm2487_vm2, %v2444_v39  ;;  %v3768_v39 = vrot.slane %v3766_v52, 4 }
 0x20c   : > { %v2442_v37 = vpop.permute.xlu1 %2441  ;;  %2518 = vst.msk [vmem:[#allocation3 + $0x78] sm:$0xf] %vm2487_vm2, %v2452_v45  ;;  %v3769_v45 = vrot.slane %v3638_v1, 5  ;;  %v3318_v1 = vrot.slane %v3316_v25, 4 }
 0x20d   : > { %2513 = vst.msk [vmem:[#allocation3 + $0x64] sm:$0xf] %vm2487_vm2, %v2442_v37  ;;  %v3401_v37 = vshrl.u32 %v6694_v24, 16  ;;  %v3053_v24 = vld [vmem:[#allocation2 + $0x20] sm:$0x1] }
 0x20e   : > { %v3770_v12 = vsel %vm5900_vm14, %v3768_v39, %v3769_v45  ;;  %v3119_v8 = vshll.u32 %v3053_v24, 16  ;;  %v2877_v45 = vld [vmem:[#allocation2 + $0x88] sm:$0xf]  ;;  %v2867_v24 = vld [vmem:[#allocation2 + $0x4c] sm:$0xf] }
 0x20f   : > { %v3403_v52 = vrot.slane %v3401_v37, 4 }
 0x210   : > { %2788 = vrot.lane.b32.xlu2 %v2724_v17, %s5361_s8  ;;  %3517 = vrot.lane.b32.xlu0 %v3314_v62, %s5363_s10  ;;  %v2875_v17 = vld [vmem:[#allocation2 + $0x7c] sm:$0xf]  ;;  %v3298_v62 = vor.u32 %v3297_v40, %v3294_v32  ;;  %v3121_v46 = vrot.slane %v3119_v8, 5  ;;  %v3321_v32 = vrot.slane %v3319_v14, 5 }
 0x211   : > { %v3404_v49 = vor.u32 %v3403_v52, %v6709_v48 }
 0x212   : > { %v2450_v61 = vpop.permute.xlu2 %2449  ;;  %2954 = vrot.lane.b32.xlu1 %v2874_v26, %s5362_s9  ;;  %v2731_v56 = vpop.permute.xlu0 %2730  ;;  %v3212_v26 = vor.u32 %v3211_v29, %v6720_v44  ;;  %v3299_v19 = vrot.slane %v3298_v62, 4  ;;  %v3122_v27 = vsel %vm5494_vm11, %v3117_v33, %v3121_v46  ;;  %v3091_v29 = vld [vmem:[#allocation2 + $0xb8] sm:$0xf]  ;;  %v3325_v62 = vshll.u32 %v3079_v5, 16  ;;  %v3614_v33 = vld [vmem:[#allocation2 + $0x20] sm:$0x1] }
 0x213   : > { %2517 = vst.msk [vmem:[#allocation3 + $0x74] sm:$0xf] %vm2487_vm2, %v2450_v61  ;;  %v3405_v43 = vrot.slane %v3404_v49, 4  ;;  %v3651_v46 = vld [vmem:[#allocation2 + $0xb4] sm:$0xe]  ;;  %v3713_v14 = vrot.slane %v3614_v33, 5 }
 0x214   : > { %v2448_v18 = vpop.permute.xlu1 %2447  ;;  %2826 = vst.msk [vmem:[#allocation3 + $0x4] sm:$0xf] %vm2824_vm3, %v2731_v56  ;;  %v3213_v61 = vrot.slane %v3212_v26, 4  ;;  %v3217_v56 = vrot.slane %v3215_v35, 5  ;;  %v3425_v26 = vshrl.u32 %v3091_v29, 16 }
 0x215   : > { %2516 = vst.msk [vmem:[#allocation3 + $0x70] sm:$0xf] %vm2487_vm2, %v2448_v18 }
 0x216   : > { %v3218_v15 = vsel %vm5494_vm11, %v3213_v61, %v3217_v56  ;;  %v3427_v61 = vrot.slane %v3425_v26, 4 }
 0x218   : > { %2924 = vrot.lane.b32.xlu2 %v2859_v9, %s5362_s9  ;;  %3852 = vrot.lane.b32.xlu0 %v3767_v7, %s5364_s11  ;;  %v3304_v7 = vsel %vm5494_vm11, %v3299_v19, %v6663_v30  ;;  %v3738_v30 = vrot.slane %v6746_v4, 5  ;;  %v3327_v19 = vrot.slane %v3325_v62, 5  ;;  %v3329_v4 = vshrl.u32 %v3079_v5, 16  ;;  %v3067_v62 = vld [vmem:[#allocation2 + $0x58] sm:$0xf] }
 0x21a   : > { %v2729_v3 = vpop.permute.xlu2 %2728  ;;  %2972 = vrot.lane.b32.xlu1 %v2883_v42, %s5362_s9  ;;  %v2737_v57 = vpop.permute.xlu0 %2736  ;;  %v3624_v42 = vld [vmem:[#allocation2 + $0x48] sm:$0xe]  ;;  %v3740_v60 = vrot.slane %v3738_v30, 4 }
 0x21b   : > { %2825 = vst.msk [vmem:[#allocation3] sm:$0xf] %vm2824_vm3, %v2729_v3  ;;  %v4806_v51 = vrot.slane %v3624_v42, 9 }
 0x21c   : > { %v2454_v31 = vpop.permute.xlu1 %2453  ;;  %2829 = vst.msk [vmem:[#allocation3 + $0x10] sm:$0xf] %vm2824_vm3, %v2737_v57  ;;  %v3742_v42 = vsel %vm5900_vm14, %v3740_v60, %v3741_v34  ;;  %v3653_v34 = vld [vmem:[#allocation2 + $0xbc] sm:$0x1] }
 0x21d   : > { %2519 = vst.msk [vmem:[#allocation3 + $0x7c] sm:$0xf] %vm2487_vm2, %v2454_v31  ;;  %v3410_v31 = vsel %vm5494_vm11, %v3405_v43, %v3409_v53 }
 0x220   : > { %2930 = vrot.lane.b32.xlu2 %v2862_v20, %s5362_s9  ;;  %3870 = vrot.lane.b32.xlu0 %v3798_v58, %s5364_s11  ;;  %v3648_v20 = vld [vmem:[#allocation2 + $0xa8] sm:$0xe]  ;;  %v3739_v58 = vsel %vm5900_vm14, %v4806_v51, %v3738_v30  ;;  %v3331_v51 = vrot.slane %v3329_v4, 4 }
 0x221   : > { %v4814_v23 = vrot.slane %v3648_v20, 9 }
 0x222   : > { %v2735_v2 = vpop.permute.xlu2 %2734  ;;  %3531 = vrot.lane.b32.xlu1 %v3400_v50, %s5363_s10  ;;  %v2743_v38 = vpop.permute.xlu0 %2742  ;;  %v3063_v50 = vld [vmem:[#allocation2 + $0x48] sm:$0xf]  ;;  %v3332_v20 = vor.u32 %v3331_v51, %v3327_v19  ;;  %v2885_v51 = vld [vmem:[#allocation2 + $0xb8] sm:$0xf] }
 0x223   : > { %2828 = vst.msk [vmem:[#allocation3 + $0xc] sm:$0xf] %vm2824_vm3, %v2735_v2  ;;  %v4802_v2 = vrot.slane %v3612_v13, 9  ;;  %v3795_v39 = vsel %vm5900_vm14, %v4814_v23, %v3794_v10  ;;  %v3196_v37 = vshrl.u32 %v3063_v50, 16 }
 0x224   : > { %v2733_v36 = vpop.permute.xlu1 %2732  ;;  %2832 = vst.msk [vmem:[#allocation3 + $0x1c] sm:$0xf] %vm2824_vm3, %v2743_v38  ;;  %v3710_v38 = vrot.slane %v6763_v55, 5  ;;  %v3066_v55 = vld [vmem:[#allocation2 + $0x54] sm:$0xf] }
 0x225   : > { %2827 = vst.msk [vmem:[#allocation3 + $0x8] sm:$0xf] %vm2824_vm3, %v2733_v36  ;;  %v3199_v36 = vshll.u32 %v3063_v50, 16  ;;  %v3198_v10 = vrot.slane %v3196_v37, 4  ;;  %v3333_v50 = vrot.slane %v3332_v20, 4  ;;  %v3220_v5 = vshrl.u32 %v3066_v55, 16 }
 0x226   : > { %v3711_v35 = vsel %vm5900_vm14, %v4802_v2, %v3710_v38  ;;  %v3712_v25 = vrot.slane %v3710_v38, 4  ;;  %v3639_v38 = vld [vmem:[#allocation2 + $0x84] sm:$0xe] }
 0x227   : > { %v4811_v26 = vrot.slane %v3639_v38, 9 }
 0x228   : > { %2956 = vrot.lane.b32.xlu2 %v2875_v17, %s5362_s9  ;;  %3483 = vrot.lane.b32.xlu0 %v3112_v22, %s5363_s10  ;;  %v3322_v17 = vor.u32 %v3321_v32, %v3318_v1  ;;  %v3421_v22 = vshll.u32 %v3091_v29, 16  ;;  %v3223_v29 = vshll.u32 %v3066_v55, 16 }
 0x22a   : > { %v2741_v28 = vpop.permute.xlu2 %2740  ;;  %3854 = vrot.lane.b32.xlu1 %v3770_v12, %s5364_s11  ;;  %v2749_v9 = vpop.permute.xlu0 %2748  ;;  %v3201_v12 = vrot.slane %v3199_v36, 5  ;;  %v3323_v11 = vrot.slane %v3322_v17, 4  ;;  %v6778_v52 = vrot.slane %v3421_v22, 5  ;;  %v3090_v17 = vld [vmem:[#allocation2 + $0xb4] sm:$0xf] }
 0x22b   : > { %2831 = vst.msk [vmem:[#allocation3 + $0x18] sm:$0xf] %vm2824_vm3, %v2741_v28  ;;  %v2876_v22 = vld [vmem:[#allocation2 + $0x84] sm:$0xf] }
 0x22c   : > { %v2739_v18 = vpop.permute.xlu1 %2738  ;;  %2835 = vst.msk [vmem:[#allocation3 + $0x28] sm:$0xf] %vm2824_vm3, %v2749_v9  ;;  %v3092_v9 = vld [vmem:[#allocation2 + $0xbc] sm:$0x1]  ;;  %v3328_v49 = vsel %vm5494_vm11, %v3323_v11, %v3327_v19  ;;  %v3428_v54 = vor.u32 %v3427_v61, %v6778_v52  ;;  %v3412_v11 = vshrl.u32 %v3090_v17, 16  ;;  %v3415_v19 = vshll.u32 %v3090_v17, 16 }
 0x22d   : > { %2830 = vst.msk [vmem:[#allocation3 + $0x14] sm:$0xf] %vm2824_vm3, %v2739_v18 }
 0x22e   : > { %v3429_v0 = vrot.slane %v3428_v54, 4 }
 0x230   : > { %3515 = vrot.lane.b32.xlu2 %v3304_v7, %s5363_s10  ;;  %3501 = vrot.lane.b32.xlu0 %v3218_v15, %s5363_s10  ;;  %v3202_v7 = vor.u32 %v3201_v12, %v3198_v10  ;;  %v3431_v15 = vshll.u32 %v3092_v9, 16  ;;  %v2869_v10 = vld [vmem:[#allocation2 + $0x58] sm:$0xf]  ;;  %v3054_v12 = vld [vmem:[#allocation2 + $0x24] sm:$0xf] }
 0x231   : > { %v3124_v9 = vshrl.u32 %v3054_v12, 16  ;;  %v3127_v60 = vshll.u32 %v3054_v12, 16 }
 0x232   : > { %v2747_v3 = vpop.permute.xlu2 %2746  ;;  %2938 = vrot.lane.b32.xlu1 %v2866_v63, %s5362_s9  ;;  %v2755_v57 = vpop.permute.xlu0 %2754  ;;  %v3203_v63 = vrot.slane %v3202_v7, 4  ;;  %v3433_v8 = vrot.slane %v3431_v15, 5 }
 0x233   : > { %2834 = vst.msk [vmem:[#allocation3 + $0x24] sm:$0xf] %vm2824_vm3, %v2747_v3  ;;  %v3080_v3 = vld [vmem:[#allocation2 + $0x8c] sm:$0x1] }
 0x234   : > { %v2745_v48 = vpop.permute.xlu1 %2744  ;;  %2838 = vst.msk [vmem:[#allocation3 + $0x34] sm:$0xf] %vm2824_vm3, %v2755_v57  ;;  %v3208_v57 = vsel %vm5494_vm11, %v3203_v63, %v6720_v44  ;;  %v3434_v59 = vsel %vm5494_vm11, %v3429_v0, %v3433_v8  ;;  %v3804_v63 = vrot.slane %v3653_v34, 5  ;;  %v3126_v0 = vrot.slane %v3124_v9, 4 }
 0x235   : > { %2833 = vst.msk [vmem:[#allocation3 + $0x20] sm:$0xf] %vm2824_vm3, %v2745_v48  ;;  %v6800_v48 = vld [vmem:[#allocation2 + $0xb8] sm:$0xf]  ;;  %v3129_v8 = vrot.slane %v3127_v60, 5 }
 0x236   : > { %v3801_v23 = vrot.slane %v6800_v48, 5 }
 0x237   : > { %v3130_v48 = vor.u32 %v3129_v8, %v3126_v0  ;;  %v3081_v8 = vld [vmem:[#allocation2 + $0x90] sm:$0xf] }
 0x238   : > { %3533 = vrot.lane.b32.xlu2 %v3410_v31, %s5363_s10  ;;  %3836 = vrot.lane.b32.xlu0 %v3739_v58, %s5364_s11  ;;  %v2884_v31 = vld [vmem:[#allocation2 + $0xb4] sm:$0xf]  ;;  %v3335_v58 = vshll.u32 %v3080_v3, 16  ;;  %v3803_v4 = vrot.slane %v3801_v23, 4 }
 0x23a   : > { %v2753_v40 = vpop.permute.xlu2 %2752  ;;  %3485 = vrot.lane.b32.xlu1 %v3122_v27, %s5363_s10  ;;  %v2761_v6 = vpop.permute.xlu0 %2760  ;;  %v4815_v27 = vrot.slane %v3651_v46, 9  ;;  %v3337_v1 = vrot.slane %v3335_v58, 5  ;;  %v3805_v33 = vsel %vm5900_vm14, %v3803_v4, %v3804_v63  ;;  %v3233_v46 = vshrl.u32 %v3067_v62, 16 }
 0x23b   : > { %2837 = vst.msk [vmem:[#allocation3 + $0x30] sm:$0xf] %vm2824_vm3, %v2753_v40  ;;  %v3714_v40 = vsel %vm5900_vm14, %v3712_v25, %v3713_v14 }
 0x23c   : > { %v2751_v21 = vpop.permute.xlu1 %2750  ;;  %2841 = vst.msk [vmem:[#allocation3 + $0x40] sm:$0xf] %vm2824_vm3, %v2761_v6  ;;  %v3802_v6 = vsel %vm5900_vm14, %v4815_v27, %v3801_v23  ;;  %v3338_v2 = vsel %vm5494_vm11, %v3333_v50, %v3337_v1  ;;  %v3131_v23 = vrot.slane %v3130_v48, 4  ;;  %v3068_v50 = vld [vmem:[#allocation2 + $0x5c] sm:$0x1] }
 0x23d   : > { %2836 = vst.msk [vmem:[#allocation3 + $0x2c] sm:$0xf] %vm2824_vm3, %v2751_v21  ;;  %v6817_v21 = vld [vmem:[#allocation2 + $0x88] sm:$0xf] }
 0x240   : > { %3868 = vrot.lane.b32.xlu2 %v3795_v39, %s5364_s11  ;;  %2960 = vrot.lane.b32.xlu0 %v2877_v45, %s5362_s9  ;;  %v3222_v39 = vrot.slane %v3220_v5, 4  ;;  %v3225_v45 = vrot.slane %v3223_v29, 5  ;;  %v3239_v29 = vshll.u32 %v3068_v50, 16 }
 0x242   : > { %v2759_v56 = vpop.permute.xlu2 %2758  ;;  %3820 = vrot.lane.b32.xlu1 %v3711_v35, %s5364_s11  ;;  %v2767_v28 = vpop.permute.xlu0 %2766  ;;  %v3773_v35 = vrot.slane %v6817_v21, 5  ;;  %v3226_v61 = vor.u32 %v3225_v45, %v3222_v39  ;;  %v3093_v45 = vld [vmem:[#allocation2 + $0xc0] sm:$0xf] }
 0x243   : > { %2840 = vst.msk [vmem:[#allocation3 + $0x3c] sm:$0xf] %vm2824_vm3, %v2759_v56  ;;  %v3229_v56 = vshll.u32 %v3067_v62, 16 }
 0x244   : > { %v2757_v18 = vpop.permute.xlu1 %2756  ;;  %2844 = vst.msk [vmem:[#allocation3 + $0x4c] sm:$0xf] %vm2824_vm3, %v2767_v28  ;;  %v3774_v28 = vsel %vm5900_vm14, %v4811_v26, %v3773_v35  ;;  %v3227_v7 = vrot.slane %v3226_v61, 4  ;;  %v3436_v26 = vshrl.u32 %v3093_v45, 16 }
 0x245   : > { %2839 = vst.msk [vmem:[#allocation3 + $0x38] sm:$0xf] %vm2824_vm3, %v2757_v18  ;;  %v3414_v18 = vrot.slane %v3412_v11, 4  ;;  %v3627_v11 = vld [vmem:[#allocation2 + $0x54] sm:$0xe] }
 0x248   : > { %2940 = vrot.lane.b32.xlu2 %v2867_v24, %s5362_s9  ;;  %3519 = vrot.lane.b32.xlu0 %v3328_v49, %s5363_s10  ;;  %v3417_v24 = vrot.slane %v3415_v19, 5  ;;  %v3231_v49 = vrot.slane %v3229_v56, 5  ;;  %v6876_v19 = vld [vmem:[#allocation2 + $0x58] sm:$0xf]  ;;  %v3056_v56 = vld [vmem:[#allocation2 + $0x2c] sm:$0x1] }
 0x249   : > { %v3143_v0 = vshll.u32 %v3056_v56, 16 }
 0x24a   : > { %v2765_v43 = vpop.permute.xlu2 %2764  ;;  %3838 = vrot.lane.b32.xlu1 %v3742_v42, %s5364_s11  ;;  %v2773_v53 = vpop.permute.xlu0 %2772  ;;  %v6831_v42 = vld [vmem:[#allocation2 + $0x28] sm:$0xf]  ;;  %v3232_v3 = vsel %vm5494_vm11, %v3227_v7, %v3231_v49  ;;  %v2868_v7 = vld [vmem:[#allocation2 + $0x54] sm:$0xf] }
 0x24b   : > { %2843 = vst.msk [vmem:[#allocation3 + $0x48] sm:$0xf] %vm2824_vm3, %v2765_v43  ;;  %v3145_v48 = vrot.slane %v3143_v0, 5 }
 0x24c   : > { %v2763_v30 = vpop.permute.xlu1 %2762  ;;  %2847 = vst.msk [vmem:[#allocation3 + $0x58] sm:$0xf] %vm2824_vm3, %v2773_v53  ;;  %v3055_v53 = vld [vmem:[#allocation2 + $0x28] sm:$0xf] }
 0x24d   : > { %2842 = vst.msk [vmem:[#allocation3 + $0x44] sm:$0xf] %vm2824_vm3, %v2763_v30  ;;  %v3418_v30 = vor.u32 %v3417_v24, %v3414_v18  ;;  %v3137_v17 = vshrl.u32 %v3055_v53, 16  ;;  %v6879_v24 = vld [vmem:[#allocation2 + $0xc4] sm:$0xf] }
 0x24f   : > { %v3419_v20 = vrot.slane %v3418_v30, 4  ;;  %v3139_v61 = vrot.slane %v3137_v17, 4  ;;  %v4969_v30 = vld [vmem:[%s7379_s1 + $0x8] sm:$0xff]  ;;  %v3058_v17 = vld [vmem:[#allocation2 + $0x34] sm:$0xf] }
 0x250   : > { %3499 = vrot.lane.b32.xlu2 %v3208_v57, %s5363_s10  ;;  %3537 = vrot.lane.b32.xlu0 %v3434_v59, %s5363_s10  ;;  %v3717_v57 = vrot.slane %v6831_v42, 5  ;;  %v3617_v59 = vld [vmem:[#allocation2 + $0x2c] sm:$0x1] }
 0x251   : > { %v3720_v25 = vrot.slane %v3617_v59, 5  ;;  %v3424_v1 = vsel %vm5494_vm11, %v3419_v20, %v6778_v52  ;;  %v3340_v59 = vshrl.u32 %v3081_v8, 16 }
 0x252   : > { %v2771_v44 = vpop.permute.xlu2 %2770  ;;  %2974 = vrot.lane.b32.xlu1 %v2884_v31, %s5362_s9  ;;  %v2779_v13 = vpop.permute.xlu0 %2778  ;;  %v3133_v31 = vshll.u32 %v3055_v53, 16  ;;  %v3719_v58 = vrot.slane %v3717_v57, 4 }
 0x253   : > { %2846 = vst.msk [vmem:[#allocation3 + $0x54] sm:$0xf] %vm2824_vm3, %v2771_v44 }
 0x254   : > { %v2769_v32 = vpop.permute.xlu1 %2768  ;;  %2850 = vst.msk [vmem:[#allocation3 + $0x64] sm:$0xf] %vm2824_vm3, %v2779_v13  ;;  %v6847_v44 = vrot.slane %v3133_v31, 5  ;;  %v3235_v13 = vrot.slane %v3233_v46, 4 }
 0x255   : > { %2845 = vst.msk [vmem:[#allocation3 + $0x50] sm:$0xf] %vm2824_vm3, %v2769_v32  ;;  %v3721_v32 = vsel %vm5900_vm14, %v3719_v58, %v3720_v25  ;;  %v4968_v58 = vld [vmem:[%s7379_s1] sm:$0xff] }
 0x256   : > { %v3236_v5 = vor.u32 %v3235_v13, %v3231_v49  ;;  %v4807_v49 = vrot.slane %v3627_v11, 9  ;;  %v3140_v63 = vor.u32 %v3139_v61, %v6847_v44  ;;  %v3161_v11 = vshrl.u32 %v3058_v17, 16  ;;  %v3629_v61 = vld [vmem:[#allocation2 + $0x5c] sm:$0x1] }
 0x258   : > { %3822 = vrot.lane.b32.xlu2 %v3714_v40, %s5364_s11  ;;  %3872 = vrot.lane.b32.xlu0 %v3802_v6, %s5364_s11  ;;  %v3641_v40 = vld [vmem:[#allocation2 + $0x8c] sm:$0x1]  ;;  %v3136_v6 = vsel %vm5494_vm11, %v3131_v23, %v6847_v44  ;;  %v3141_v46 = vrot.slane %v3140_v63, 4  ;;  %v3342_v23 = vrot.slane %v3340_v59, 4 }
 0x259   : > { %v3776_v38 = vrot.slane %v3641_v40, 5  ;;  %v3615_v40 = vld [vmem:[#allocation2 + $0x24] sm:$0xe] }
 0x25a   : > { %v2777_v37 = vpop.permute.xlu2 %2776  ;;  %3521 = vrot.lane.b32.xlu1 %v3338_v2, %s5363_s10  ;;  %v2785_v36 = vpop.permute.xlu0 %2784  ;;  %v3775_v2 = vrot.slane %v3773_v35, 4  ;;  %v3439_v35 = vshll.u32 %v3093_v45, 16  ;;  %v3146_v50 = vsel %vm5494_vm11, %v3141_v46, %v3145_v48  ;;  %v3083_v48 = vld [vmem:[#allocation2 + $0x98] sm:$0x1] }
 0x25b   : > { %2849 = vst.msk [vmem:[#allocation3 + $0x60] sm:$0xf] %vm2824_vm3, %v2777_v37  ;;  %v3237_v37 = vrot.slane %v3236_v5, 4  ;;  %v2879_v5 = vld [vmem:[#allocation2 + $0x94] sm:$0xf] }
 0x25c   : > { %v2775_v16 = vpop.permute.xlu1 %2774  ;;  %2853 = vst.msk [vmem:[#allocation3 + $0x70] sm:$0xf] %vm2824_vm3, %v2785_v36  ;;  %v3241_v36 = vrot.slane %v3239_v29, 5  ;;  %v3777_v21 = vsel %vm5900_vm14, %v3775_v2, %v3776_v38  ;;  %v3441_v9 = vrot.slane %v3439_v35, 5  ;;  %v3449_v29 = vshrl.u32 %v6879_v24, 16 }
 0x25d   : > { %2848 = vst.msk [vmem:[#allocation3 + $0x5c] sm:$0xf] %vm2824_vm3, %v2775_v16  ;;  %v3953_v16 = vld [vmem:[%s7379_s1 + $0x10] sm:$0x3]  ;;  %v3095_v35 = vld [vmem:[#allocation2 + $0xc8] sm:$0x1] }
 0x25e   : > { %v3995_v12 = vunpack.c.l.b16 %v3953_v16 }
 0x260   : > { %2958 = vrot.lane.b32.xlu2 %v2876_v22, %s5362_s9  ;;  %2944 = vrot.lane.b32.xlu0 %v2869_v10, %s5362_s9  ;;  %v2878_v22 = vld [vmem:[#allocation2 + $0x90] sm:$0xf]  ;;  %v3242_v10 = vsel %vm5494_vm11, %v3237_v37, %v3241_v36  ;;  %v3998_v60 = vpack.c.b16 %v3995_v12, %v3995_v12  ;;  %v3157_v12 = vshll.u32 %v3058_v17, 16 }
 0x262   : > { %v2783_v54 = vpop.permute.xlu2 %2782  ;;  %3856 = vrot.lane.b32.xlu1 %v3774_v28, %s5364_s11  ;;  %v2791_v15 = vpop.permute.xlu0 %2790  ;;  %v3438_v28 = vrot.slane %v3436_v26, 4 }
 0x263   : > { %2852 = vst.msk [vmem:[#allocation3 + $0x6c] sm:$0xf] %vm2824_vm3, %v2783_v54  ;;  %v3745_v54 = vrot.slane %v6876_v19, 5 }
 0x264   : > { %v2781_v43 = vpop.permute.xlu1 %2780  ;;  %2856 = vst.msk [vmem:[#allocation3 + $0x7c] sm:$0xf] %vm2824_vm3, %v2791_v15  ;;  %v4016_v15 = vsel %vm4014_vm5, %v3998_v60, 0  ;;  %v3442_v53 = vor.u32 %v3441_v9, %v3438_v28  ;;  %v3455_v9 = vshll.u32 %v3095_v35, 16  ;;  %v6941_v60 = vrot.slane %v3157_v12, 5 }
 0x265   : > { %2851 = vst.msk [vmem:[#allocation3 + $0x68] sm:$0xf] %vm2824_vm3, %v2781_v43  ;;  %4523 = vmatpush.bf16.msra.mxu3 %v4016_v15  ;;  %4356 = vmatpush.bf16.msra.mxu2 %v4016_v15  ;;  %v2887_v43 = vld [vmem:[#allocation2 + $0xc4] sm:$0xf]  ;;  %v3747_v42 = vrot.slane %v3745_v54, 4 }
 0x266   : > { %4023 = vmatpush.bf16.msra.mxu0 %v4016_v15  ;;  %4189 = vmatpush.bf16.msra.mxu1 %v4016_v15  ;;  %v3443_v31 = vrot.slane %v3442_v53, 4  ;;  %v3457_v15 = vrot.slane %v3455_v9, 5  ;;  %v3654_v53 = vld [vmem:[#allocation2 + $0xc0] sm:$0xe]  ;;  %v3642_v35 = vld [vmem:[#allocation2 + $0x90] sm:$0xe] }
 0x267   : > { %v3632_v12 = vld [vmem:[#allocation2 + $0x68] sm:$0x1] }
 0x268   : > { %2976 = vrot.lane.b32.xlu2 %v2885_v51, %s5362_s9  ;;  %3503 = vrot.lane.b32.xlu0 %v3232_v3, %s5363_s10  ;;  %v3445_v51 = vshll.u32 %v6879_v24, 16  ;;  %v3746_v3 = vsel %vm5900_vm14, %v4807_v49, %v3745_v54  ;;  %v2870_v54 = vld [vmem:[#allocation2 + $0x60] sm:$0xf] }
 0x269   : > { %4524 = vmatpush.bf16.msra.mxu3 %v4969_v30  ;;  %4357 = vmatpush.bf16.msra.mxu2 %v4969_v30 }
 0x26a   : > { %v2789_v14 = vpop.permute.xlu2 %2788  ;;  %3874 = vrot.lane.b32.xlu1 %v3805_v33, %s5364_s11  ;;  %v2927_v27 = vpop.permute.xlu0 %2926  ;;  %v3343_v33 = vshll.u32 %v3081_v8, 16  ;;  %v6896_v20 = vrot.slane %v3445_v51, 5  ;;  %4024 = vmatpush.bf16.msra.mxu0 %v4969_v30  ;;  %v6955_v51 = vld [vmem:[#allocation2 + $0xc4] sm:$0xf] }
 0x26b   : > { %2855 = vst.msk [vmem:[#allocation3 + $0x78] sm:$0xf] %vm2824_vm3, %v2789_v14  ;;  %4190 = vmatpush.bf16.msra.mxu1 %v4969_v30 }
 0x26c   : > { %v2787_v55 = vpop.permute.xlu1 %2786  ;;  %3021 = vst.msk [vmem:[#allocation3 + $0x8] sm:$0xf] %vm3018_vm4, %v2927_v27  ;;  %v6902_v27 = vld [vmem:[#allocation2 + $0x94] sm:$0xf]  ;;  %v3345_v44 = vrot.slane %v3343_v33, 5 }
 0x26d   : > { %2854 = vst.msk [vmem:[#allocation3 + $0x74] sm:$0xf] %vm2824_vm3, %v2787_v55  ;;  %v6906_v55 = vld [vmem:[#allocation2 + $0x94] sm:$0xf]  ;;  %4525 = vmatpush.bf16.msra.mxu3 %v4968_v58  ;;  %4358 = vmatpush.bf16.msra.mxu2 %v4968_v58 }
 0x26e   : > { %4025 = vmatpush.bf16.msra.mxu0 %v4968_v58  ;;  %v3346_v2 = vor.u32 %v3345_v44, %v3342_v23  ;;  %v3349_v38 = vshll.u32 %v6906_v55, 16  ;;  %v3353_v63 = vshrl.u32 %v6906_v55, 16  ;;  %v3359_v44 = vshll.u32 %v3083_v48, 16  ;;  %v3618_v55 = vld [vmem:[#allocation2 + $0x30] sm:$0xe] }
 0x26f   : > { %4191 = vmatpush.bf16.msra.mxu1 %v4968_v58 }
 0x270   : > { %3535 = vrot.lane.b32.xlu2 %v3424_v1, %s5363_s10  ;;  %3826 = vrot.lane.b32.xlu0 %v3721_v32, %s5364_s11  ;;  %v3448_v1 = vsel %vm5494_vm11, %v3443_v31, %v6896_v20  ;;  %v3780_v32 = vrot.slane %v6902_v27, 5  ;;  %v3355_v30 = vrot.slane %v3353_v63, 4  ;;  %v4816_v31 = vrot.slane %v3654_v53, 9  ;;  %v3656_v63 = vld [vmem:[#allocation2 + $0xc8] sm:$0x1] }
 0x272   : > { %v2925_v39 = vpop.permute.xlu2 %2924  ;;  %3487 = vrot.lane.b32.xlu1 %v3136_v6, %s5363_s10  ;;  %v2933_v52 = vpop.permute.xlu0 %2932  ;;  %v3644_v6 = vld [vmem:[#allocation2 + $0x98] sm:$0x1] }
 0x273   : > { %3020 = vst.msk [vmem:[#allocation3 + $0x4] sm:$0xf] %vm3018_vm4, %v2925_v39  ;;  %v4803_v39 = vrot.slane %v3615_v40, 9  ;;  %v3783_v45 = vrot.slane %v3644_v6, 5 }
 0x274   : > { %v2923_v62 = vpop.permute.xlu1 %2922  ;;  %3024 = vst.msk [vmem:[#allocation3 + $0x14] sm:$0xf] %vm3018_vm4, %v2933_v52  ;;  %v3782_v52 = vrot.slane %v3780_v32, 4 }
 0x275   : > { %3019 = vst.msk [vmem:[#allocation3] sm:$0xf] %vm3018_vm4, %v2923_v62  ;;  %v3347_v62 = vrot.slane %v3346_v2, 4  ;;  %v3718_v16 = vsel %vm5900_vm14, %v4803_v39, %v3717_v57  ;;  %v3748_v57 = vrot.slane %v3629_v61, 5  ;;  %v4804_v2 = vrot.slane %v3618_v55, 9 }
 0x277   : > { %v3749_v19 = vsel %vm5900_vm14, %v3747_v42, %v3748_v57  ;;  %v3755_v42 = vrot.slane %v3632_v12, 5  ;;  %v3057_v57 = vld [vmem:[#allocation2 + $0x30] sm:$0xf] }
 0x278   : > { %3858 = vrot.lane.b32.xlu2 %v3777_v21, %s5364_s11  ;;  %2962 = vrot.lane.b32.xlu0 %v2878_v22, %s5362_s9  ;;  %v6923_v21 = vrot.slane %v3349_v38, 5  ;;  %v3451_v22 = vrot.slane %v3449_v29, 4  ;;  %v3361_v29 = vrot.slane %v3359_v44, 5 }
 0x27a   : > { %v2931_v34 = vpop.permute.xlu2 %2930  ;;  %3505 = vrot.lane.b32.xlu1 %v3242_v10, %s5363_s10  ;;  %v2971_v18 = vpop.permute.xlu0 %2970  ;;  %v3784_v10 = vsel %vm5900_vm14, %v3782_v52, %v3783_v45  ;;  %v3352_v56 = vsel %vm5494_vm11, %v3347_v62, %v6923_v21  ;;  %v3452_v28 = vor.u32 %v3451_v22, %v6896_v20  ;;  %v3808_v20 = vrot.slane %v6955_v51, 5  ;;  %v6980_v22 = vld [vmem:[#allocation2 + $0x64] sm:$0xf] }
 0x27b   : > { %3023 = vst.msk [vmem:[#allocation3 + $0x10] sm:$0xf] %vm3018_vm4, %v2931_v34  ;;  %v3163_v34 = vrot.slane %v3161_v11, 4  ;;  %v3356_v23 = vor.u32 %v3355_v30, %v6923_v21  ;;  %v2871_v11 = vld [vmem:[#allocation2 + $0x64] sm:$0xf]  ;;  %v3257_v51 = vshrl.u32 %v6980_v22, 16 }
 0x27c   : > { %v2929_v4 = vpop.permute.xlu1 %2928  ;;  %3043 = vst.msk [vmem:[#allocation3 + $0x60] sm:$0xf] %vm3018_vm4, %v2971_v18  ;;  %v3453_v49 = vrot.slane %v3452_v28, 4  ;;  %v4812_v28 = vrot.slane %v3642_v35, 9  ;;  %v3810_v27 = vrot.slane %v3808_v20, 4 }
 0x27d   : > { %3022 = vst.msk [vmem:[#allocation3 + $0xc] sm:$0xf] %vm3018_vm4, %v2929_v4  ;;  %v3164_v0 = vor.u32 %v3163_v34, %v6941_v60  ;;  %v3620_v30 = vld [vmem:[#allocation2 + $0x38] sm:$0x1]  ;;  %v7038_v35 = vld [vmem:[#allocation2 + $0xa0] sm:$0xf] }
 0x280   : > { %2942 = vrot.lane.b32.xlu2 %v2868_v7, %s5362_s9  ;;  %2980 = vrot.lane.b32.xlu0 %v2887_v43, %s5362_s9  ;;  %v3059_v7 = vld [vmem:[#allocation2 + $0x38] sm:$0x1]  ;;  %v3458_v43 = vsel %vm5494_vm11, %v3453_v49, %v3457_v15 }
 0x281   : > { %v3167_v8 = vshll.u32 %v3059_v7, 16 }
 0x282   : > { %v2957_v25 = vpop.permute.xlu2 %2956  ;;  %3840 = vrot.lane.b32.xlu1 %v3746_v3, %s5364_s11  ;;  %v3518_v14 = vpop.permute.xlu0 %3517  ;;  %v3165_v3 = vrot.slane %v3164_v0, 4  ;;  %v3151_v0 = vshll.u32 %v3057_v57, 16 }
 0x283   : > { %3036 = vst.msk [vmem:[#allocation3 + $0x44] sm:$0xf] %vm3018_vm4, %v2957_v25  ;;  %v3169_v59 = vrot.slane %v3167_v8, 5  ;;  %v3069_v25 = vld [vmem:[#allocation2 + $0x60] sm:$0xf] }
 0x284   : > { %v2955_v13 = vpop.permute.xlu1 %2954  ;;  %3597 = vst.msk [vmem:[#allocation3 + $0x44] sm:$0xf] %vm3579_vm6, %v3518_v14  ;;  %v2886_v14 = vld [vmem:[#allocation2 + $0xc0] sm:$0xf]  ;;  %v3244_v40 = vshrl.u32 %v3069_v25, 16  ;;  %v3247_v6 = vshll.u32 %v3069_v25, 16 }
 0x285   : > { %3035 = vst.msk [vmem:[#allocation3 + $0x40] sm:$0xf] %vm3018_vm4, %v2955_v13  ;;  %v3170_v13 = vsel %vm5494_vm11, %v3165_v3, %v3169_v59  ;;  %v3153_v59 = vrot.slane %v3151_v0, 5  ;;  %v2889_v0 = vld [vmem:[#allocation2 + $0xd0] sm:$0xf] }
 0x286   : > { %v3249_v17 = vrot.slane %v3247_v6, 5  ;;  %v3259_v6 = vrot.slane %v3257_v51, 4 }
 0x288   : > { %3489 = vrot.lane.b32.xlu2 %v3146_v50, %s5363_s10  ;;  %3539 = vrot.lane.b32.xlu0 %v3448_v1, %s5363_s10  ;;  %v6965_v50 = vld [vmem:[#allocation2 + $0x34] sm:$0xf]  ;;  %v3809_v1 = vsel %vm5900_vm14, %v4816_v31, %v3808_v20 }
 0x289   : > { %v3724_v38 = vrot.slane %v6965_v50, 5 }
 0x28a   : > { %v3516_v37 = vpop.permute.xlu2 %3515  ;;  %2964 = vrot.lane.b32.xlu1 %v2879_v5, %s5362_s9  ;;  %v3853_v36 = vpop.permute.xlu0 %3852  ;;  %v3357_v5 = vrot.slane %v3356_v23, 4 }
 0x28b   : > { %3596 = vst.msk [vmem:[#allocation3 + $0x40] sm:$0xf] %vm3579_vm6, %v3516_v37  ;;  %v6975_v37 = vld [vmem:[#allocation2 + $0x64] sm:$0xf]  ;;  %v3726_v25 = vrot.slane %v3724_v38, 4 }
 0x28c   : > { %v2973_v26 = vpop.permute.xlu1 %2972  ;;  %3933 = vst.msk [vmem:[#allocation3 + $0x40] sm:$0xf] %vm3916_vm7, %v3853_v36  ;;  %v3246_v36 = vrot.slane %v3244_v40, 4 }
 0x28d   : > { %3044 = vst.msk [vmem:[#allocation3 + $0x64] sm:$0xf] %vm3018_vm4, %v2973_v26  ;;  %v3362_v26 = vsel %vm5494_vm11, %v3357_v5, %v3361_v29 }
 0x28e   : > { %v3250_v61 = vor.u32 %v3249_v17, %v3246_v36  ;;  %v3096_v36 = vld [vmem:[#allocation2 + $0xcc] sm:$0xf] }
 0x28f   : > { %v3460_v12 = vshrl.u32 %v3096_v36, 16 }
 0x290   : > { %3824 = vrot.lane.b32.xlu2 %v3718_v16, %s5364_s11  ;;  %3862 = vrot.lane.b32.xlu0 %v3784_v10, %s5364_s11  ;;  %v3725_v16 = vsel %vm5900_vm14, %v4804_v2, %v3724_v38  ;;  %v3752_v10 = vrot.slane %v6975_v37, 5  ;;  %v3251_v7 = vrot.slane %v3250_v61, 4  ;;  %v3647_v37 = vld [vmem:[#allocation2 + $0xa4] sm:$0x1] }
 0x292   : > { %v3534_v18 = vpop.permute.xlu2 %3533  ;;  %3523 = vrot.lane.b32.xlu1 %v3352_v56, %s5363_s10  ;;  %v3871_v24 = vpop.permute.xlu0 %3870  ;;  %v3253_v56 = vshll.u32 %v6980_v22, 16  ;;  %v3754_v9 = vrot.slane %v3752_v10, 4 }
 0x293   : > { %3605 = vst.msk [vmem:[#allocation3 + $0x64] sm:$0xf] %vm3579_vm6, %v3534_v18 }
 0x294   : > { %v3532_v4 = vpop.permute.xlu1 %3531  ;;  %3942 = vst.msk [vmem:[#allocation3 + $0x64] sm:$0xf] %vm3916_vm7, %v3871_v24  ;;  %v3085_v24 = vld [vmem:[#allocation2 + $0xa0] sm:$0xf]  ;;  %v6996_v49 = vrot.slane %v3253_v56, 5 }
 0x295   : > { %3604 = vst.msk [vmem:[#allocation3 + $0x60] sm:$0xf] %vm3579_vm6, %v3532_v4  ;;  %v3781_v4 = vsel %vm5900_vm14, %v4812_v28, %v3780_v32  ;;  %v3373_v8 = vshll.u32 %v3085_v24, 16  ;;  %v3811_v32 = vrot.slane %v3656_v63, 5  ;;  %v3787_v28 = vrot.slane %v7038_v35, 5 }
 0x296   : > { %v3256_v53 = vsel %vm5494_vm11, %v3251_v7, %v6996_v49  ;;  %v3630_v63 = vld [vmem:[#allocation2 + $0x60] sm:$0xe] }
 0x297   : > { %v3812_v23 = vsel %vm5900_vm14, %v3810_v27, %v3811_v32 }
 0x298   : > { %3842 = vrot.lane.b32.xlu2 %v3749_v19, %s5364_s11  ;;  %2946 = vrot.lane.b32.xlu0 %v2870_v54, %s5362_s9  ;;  %v3148_v19 = vshrl.u32 %v3057_v57, 16  ;;  %v3756_v54 = vsel %vm5900_vm14, %v3754_v9, %v3755_v42  ;;  %v7043_v9 = vld [vmem:[#allocation2 + $0xd0] sm:$0xf] }
 0x29a   : > { %v3869_v33 = vpop.permute.xlu2 %3868  ;;  %3541 = vrot.lane.b32.xlu1 %v3458_v43, %s5363_s10  ;;  %v3484_v46 = vpop.permute.xlu0 %3483  ;;  %v3377_v43 = vshrl.u32 %v3085_v24, 16  ;;  %v3150_v3 = vrot.slane %v3148_v19, 4 }
 0x29b   : > { %3941 = vst.msk [vmem:[#allocation3 + $0x60] sm:$0xf] %vm3916_vm7, %v3869_v33  ;;  %v7013_v33 = vrot.slane %v3373_v8, 5 }
 0x29c   : > { %v3855_v58 = vpop.permute.xlu1 %3854  ;;  %3580 = vst.msk [vmem:[#allocation3] sm:$0xf] %vm3579_vm6, %v3484_v46  ;;  %v3379_v46 = vrot.slane %v3377_v43, 4  ;;  %v3154_v44 = vor.u32 %v3153_v59, %v3150_v3  ;;  %v3084_v59 = vld [vmem:[#allocation2 + $0x9c] sm:$0xf] }
 0x29d   : > { %3934 = vst.msk [vmem:[#allocation3 + $0x44] sm:$0xf] %vm3916_vm7, %v3855_v58  ;;  %v3086_v58 = vld [vmem:[#allocation2 + $0xa4] sm:$0x1]  ;;  %v3364_v51 = vshrl.u32 %v3084_v59, 16 }
 0x29e   : > { %v3380_v55 = vor.u32 %v3379_v46, %v7013_v33  ;;  %v3383_v50 = vshll.u32 %v3086_v58, 16  ;;  %v3155_v40 = vrot.slane %v3154_v44, 4  ;;  %v3061_v46 = vld [vmem:[#allocation2 + $0x40] sm:$0xf] }
 0x29f   : > { %v3185_v44 = vshrl.u32 %v3061_v46, 16 }
 0x2a0   : > { %2978 = vrot.lane.b32.xlu2 %v2886_v14, %s5362_s9  ;;  %3493 = vrot.lane.b32.xlu0 %v3170_v13, %s5363_s10  ;;  %v3727_v14 = vrot.slane %v3620_v30, 5  ;;  %v2888_v13 = vld [vmem:[#allocation2 + $0xcc] sm:$0xf]  ;;  %v3381_v5 = vrot.slane %v3380_v55, 4  ;;  %v3385_v29 = vrot.slane %v3383_v50, 5  ;;  %v3160_v17 = vsel %vm5494_vm11, %v3155_v40, %v6941_v60 }
 0x2a2   : > { %v2941_v39 = vpop.permute.xlu2 %2940  ;;  %3876 = vrot.lane.b32.xlu1 %v3809_v1, %s5364_s11  ;;  %v4982_v52 = vld [vmem:[#allocation3 + $0x60] sm:$0xff]  ;;  %v3502_v45 = vpop.permute.xlu0 %3501  ;;  %v3728_v1 = vsel %vm5900_vm14, %v3726_v25, %v3727_v14  ;;  %v3386_v22 = vsel %vm5494_vm11, %v3381_v5, %v3385_v29  ;;  %v3062_v5 = vld [vmem:[#allocation2 + $0x44] sm:$0x1]  ;;  %v3789_v29 = vrot.slane %v3787_v28, 4 }
 0x2a3   : > { %3028 = vst.msk [vmem:[#allocation3 + $0x24] sm:$0xf] %vm3018_vm4, %v2941_v39  ;;  %4942 = vmatmul.msk.bf16.vlgmr.msra.gmra.mxu3 %vm4001_vm8, %v4982_v52  ;;  %v3071_v39 = vld [vmem:[#allocation2 + $0x68] sm:$0x1] }
 0x2a4   : > { %v2939_v62 = vpop.permute.xlu1 %2938  ;;  %3589 = vst.msk [vmem:[#allocation3 + $0x24] sm:$0xf] %vm3579_vm6, %v3502_v45  ;;  %v4978_v21 = vld [vmem:[#allocation3 + $0x40] sm:$0xff] }
 0x2a5   : > { %3027 = vst.msk [vmem:[#allocation3 + $0x20] sm:$0xf] %vm3018_vm4, %v2939_v62  ;;  %4906 = vmatmul.msk.bf16.vlgmr.msra.gmra.mxu2 %vm4001_vm8, %v4978_v21  ;;  %v3260_v62 = vor.u32 %v3259_v6, %v6996_v49  ;;  %v3263_v21 = vshll.u32 %v3071_v39, 16  ;;  %v3097_v49 = vld [vmem:[#allocation2 + $0xd0] sm:$0xf] }
 0x2a6   : > { %v3469_v43 = vshll.u32 %v3097_v49, 16  ;;  %v2881_v39 = vld [vmem:[#allocation2 + $0xa0] sm:$0xf] }
 0x2a7   : > { %v3261_v61 = vrot.slane %v3260_v62, 4  ;;  %v3265_v60 = vrot.slane %v3263_v21, 5  ;;  %v3191_v62 = vshll.u32 %v3062_v5, 16 }
 0x2a8   : > { %3525 = vrot.lane.b32.xlu2 %v3362_v26, %s5363_s10  ;;  %3828 = vrot.lane.b32.xlu0 %v3725_v16, %s5364_s11  ;;  %v3645_v26 = vld [vmem:[#allocation2 + $0x9c] sm:$0xe] }
 0x2a9   : > { %v2880_v16 = vld [vmem:[#allocation2 + $0x9c] sm:$0xf]  ;;  %v4813_v56 = vrot.slane %v3645_v26, 9 }
 0x2aa   : > { %v3500_v34 = vpop.permute.xlu2 %3499  ;;  %2948 = vrot.lane.b32.xlu1 %v2871_v11, %s5362_s9  ;;  %v3837_v18 = vpop.permute.xlu0 %3836  ;;  %v3463_v11 = vshll.u32 %v3096_v36, 16  ;;  %v2872_v36 = vld [vmem:[#allocation2 + $0x6c] sm:$0xf] }
 0x2ab   : > { %3588 = vst.msk [vmem:[#allocation3 + $0x20] sm:$0xf] %vm3579_vm6, %v3500_v34  ;;  %v3462_v34 = vrot.slane %v3460_v12, 4  ;;  %v3788_v19 = vsel %vm5900_vm14, %v4813_v56, %v3787_v28  ;;  %v3072_v28 = vld [vmem:[#allocation2 + $0x6c] sm:$0xf] }
 0x2ac   : > { %v3486_v15 = vpop.permute.xlu1 %3485  ;;  %3925 = vst.msk [vmem:[#allocation3 + $0x20] sm:$0xf] %vm3916_vm7, %v3837_v18  ;;  %v3465_v18 = vrot.slane %v3463_v11, 5 }
 0x2ad   : > { %3581 = vst.msk [vmem:[#allocation3 + $0x4] sm:$0xf] %vm3579_vm6, %v3486_v15  ;;  %v3815_v15 = vrot.slane %v7043_v9, 5 }
 0x2ae   : > { %v3466_v8 = vor.u32 %v3465_v18, %v3462_v34 }
 0x2af   : > { %v3817_v27 = vrot.slane %v3815_v15, 4 }
 0x2b0   : > { %3860 = vrot.lane.b32.xlu2 %v3781_v4, %s5364_s11  ;;  %3846 = vrot.lane.b32.xlu0 %v3756_v54, %s5364_s11  ;;  %v3266_v4 = vsel %vm5494_vm11, %v3261_v61, %v3265_v60  ;;  %v3659_v54 = vld [vmem:[#allocation2 + $0xd4] sm:$0x1] }
 0x2b1   : > { %v3818_v32 = vrot.slane %v3659_v54, 5  ;;  %v3098_v61 = vld [vmem:[#allocation2 + $0xd4] sm:$0x1] }
 0x2b2   : > { %v3823_v48 = vpop.permute.xlu2 %3822  ;;  %3507 = vrot.lane.b32.xlu1 %v3256_v53, %s5363_s10  ;;  %v2961_v31 = vpop.permute.xlu0 %2960  ;;  %v4808_v53 = vrot.slane %v3630_v63, 9  ;;  %v3479_v34 = vshll.u32 %v3098_v61, 16  ;;  %v3271_v63 = vshll.u32 %v3072_v28, 16 }
 0x2b3   : > { %3918 = vst.msk [vmem:[#allocation3 + $0x4] sm:$0xf] %vm3916_vm7, %v3823_v48  ;;  %v3467_v48 = vrot.slane %v3466_v8, 4  ;;  %v3819_v14 = vsel %vm5900_vm14, %v3817_v27, %v3818_v32 }
 0x2b4   : > { %v3821_v20 = vpop.permute.xlu1 %3820  ;;  %3038 = vst.msk [vmem:[#allocation3 + $0x4c] sm:$0xf] %vm3018_vm4, %v2961_v31  ;;  %v7061_v31 = vrot.slane %v3469_v43, 5  ;;  %v3753_v25 = vsel %vm5900_vm14, %v4808_v53, %v3752_v10  ;;  %v3366_v10 = vrot.slane %v3364_v51, 4  ;;  %v3481_v54 = vrot.slane %v3479_v34, 5 }
 0x2b5   : > { %3917 = vst.msk [vmem:[#allocation3] sm:$0xf] %vm3916_vm7, %v3821_v20  ;;  %v3367_v20 = vshll.u32 %v3084_v59, 16  ;;  %v7101_v53 = vld [vmem:[#allocation2 + $0x70] sm:$0xf]  ;;  %v3273_v32 = vrot.slane %v3271_v63, 5 }
 0x2b6   : > { %v3073_v59 = vld [vmem:[#allocation2 + $0x70] sm:$0xf] }
 0x2b7   : > { %v3369_v55 = vrot.slane %v3367_v20, 5  ;;  %v3277_v20 = vshll.u32 %v3073_v59, 16 }
 0x2b8   : > { %3878 = vrot.lane.b32.xlu2 %v3812_v23, %s5364_s11  ;;  %2982 = vrot.lane.b32.xlu0 %v2888_v13, %s5362_s9  ;;  %v3181_v23 = vshll.u32 %v3061_v46, 16  ;;  %v3472_v13 = vsel %vm5494_vm11, %v3467_v48, %v7061_v31 }
 0x2ba   : > { %v2959_v2 = vpop.permute.xlu2 %2958  ;;  %3830 = vrot.lane.b32.xlu1 %v3728_v1, %s5364_s11  ;;  %v3520_v38 = vpop.permute.xlu0 %3519  ;;  %v7076_v50 = vrot.slane %v3181_v23, 5  ;;  %v3187_v1 = vrot.slane %v3185_v44, 4 }
 0x2bb   : > { %3037 = vst.msk [vmem:[#allocation3 + $0x48] sm:$0xf] %vm3018_vm4, %v2959_v2  ;;  %v3790_v2 = vrot.slane %v3647_v37, 5 }
 0x2bc   : > { %v3839_v52 = vpop.permute.xlu1 %3838  ;;  %3598 = vst.msk [vmem:[#allocation3 + $0x48] sm:$0xf] %vm3579_vm6, %v3520_v38  ;;  %v4970_v45 = vld [vmem:[#allocation3] sm:$0xff] }
 0x2bd   : > { %3926 = vst.msk [vmem:[#allocation3 + $0x24] sm:$0xf] %vm3916_vm7, %v3839_v52  ;;  %4842 = vmatmul.msk.bf16.vlgmr.msra.gmra.mxu0 %vm4001_vm8, %v4970_v45  ;;  %v3473_v52 = vshrl.u32 %v3097_v49, 16  ;;  %v3370_v45 = vor.u32 %v3369_v55, %v3366_v10  ;;  %v3791_v21 = vsel %vm5900_vm14, %v3789_v29, %v3790_v2  ;;  %v2864_v49 = vld [vmem:[#allocation2 + $0x3c] sm:$0xf] }
 0x2be   : > { %v3060_v55 = vld [vmem:[#allocation2 + $0x3c] sm:$0xf] }
 0x2bf   : > { %v3475_v26 = vrot.slane %v3473_v52, 4  ;;  %v3172_v2 = vshrl.u32 %v3060_v55, 16  ;;  %v3623_v52 = vld [vmem:[#allocation2 + $0x44] sm:$0x1] }
 0x2c0   : > { %3491 = vrot.lane.b32.xlu2 %v3160_v17, %s5363_s10  ;;  %3529 = vrot.lane.b32.xlu0 %v3386_v22, %s5363_s10  ;;  %v3188_v17 = vor.u32 %v3187_v1, %v7076_v50  ;;  %v3371_v22 = vrot.slane %v3370_v45, 4 }
 0x2c1   : > { %v3174_v45 = vrot.slane %v3172_v2, 4 }
 0x2c2   : > { %v2977_v42 = vpop.permute.xlu2 %2976  ;;  %2966 = vrot.lane.b32.xlu1 %v2880_v16, %s5362_s9  ;;  %v3538_v57 = vpop.permute.xlu0 %3537  ;;  %v3189_v35 = vrot.slane %v3188_v17, 4  ;;  %v3193_v16 = vrot.slane %v3191_v62, 5 }
 0x2c3   : > { %3046 = vst.msk [vmem:[#allocation3 + $0x6c] sm:$0xf] %vm3018_vm4, %v2977_v42  ;;  %v3376_v42 = vsel %vm5494_vm11, %v3371_v22, %v7013_v33 }
 0x2c4   : > { %v2975_v24 = vpop.permute.xlu1 %2974  ;;  %3607 = vst.msk [vmem:[#allocation3 + $0x6c] sm:$0xf] %vm3579_vm6, %v3538_v57  ;;  %v4974_v7 = vld [vmem:[#allocation3 + $0x20] sm:$0xff]  ;;  %v3476_v57 = vor.u32 %v3475_v26, %v7061_v31  ;;  %v3194_v18 = vsel %vm5494_vm11, %v3189_v35, %v3193_v16  ;;  %v3759_v31 = vrot.slane %v7101_v53, 5  ;;  %v3281_v26 = vshrl.u32 %v3073_v59, 16 }
 0x2c5   : > { %3045 = vst.msk [vmem:[#allocation3 + $0x68] sm:$0xf] %vm3018_vm4, %v2975_v24  ;;  %4870 = vmatmul.msk.bf16.vlgmr.msra.gmra.mxu1 %vm4001_vm8, %v4974_v7  ;;  %v3621_v24 = vld [vmem:[#allocation2 + $0x3c] sm:$0xe]  ;;  %v3622_v7 = vld [vmem:[#allocation2 + $0x40] sm:$0xf] }
 0x2c6   : > { %v4805_v33 = vrot.slane %v3621_v24, 9  ;;  %v3761_v44 = vrot.slane %v3759_v31, 4  ;;  %v2865_v35 = vld [vmem:[#allocation2 + $0x40] sm:$0xf]  ;;  %v3283_v61 = vrot.slane %v3281_v26, 4 }
 0x2c8   : > { %3509 = vrot.lane.b32.xlu2 %v3266_v4, %s5363_s10  ;;  %3864 = vrot.lane.b32.xlu0 %v3788_v19, %s5364_s11  ;;  %v3268_v4 = vshrl.u32 %v3072_v28, 16  ;;  %v3477_v19 = vrot.slane %v3476_v57, 4  ;;  %v3074_v28 = vld [vmem:[#allocation2 + $0x74] sm:$0x1] }
 0x2c9   : > { %v3287_v24 = vshll.u32 %v3074_v28, 16 }
 0x2ca   : > { %v3536_v30 = vpop.permute.xlu2 %3535  ;;  %2984 = vrot.lane.b32.xlu1 %v2889_v0, %s5362_s9  ;;  %v3873_v3 = vpop.permute.xlu0 %3872  ;;  %v3731_v0 = vrot.slane %v3622_v7, 5  ;;  %v3270_v27 = vrot.slane %v3268_v4, 4  ;;  %v3482_v46 = vsel %vm5494_vm11, %v3477_v19, %v3481_v54  ;;  %v3633_v54 = vld [vmem:[#allocation2 + $0x6c] sm:$0xe] }
 0x2cb   : > { %3606 = vst.msk [vmem:[#allocation3 + $0x68] sm:$0xf] %vm3579_vm6, %v3536_v30 }
 0x2cc   : > { %v3522_v58 = vpop.permute.xlu1 %3521  ;;  %3943 = vst.msk [vmem:[#allocation3 + $0x68] sm:$0xf] %vm3916_vm7, %v3873_v3  ;;  %v3732_v48 = vsel %vm5900_vm14, %v4805_v33, %v3731_v0  ;;  %v3274_v51 = vor.u32 %v3273_v32, %v3270_v27  ;;  %v3733_v62 = vrot.slane %v3731_v0, 4  ;;  %v4809_v33 = vrot.slane %v3633_v54, 9 }
 0x2cd   : > { %3599 = vst.msk [vmem:[#allocation3 + $0x4c] sm:$0xf] %vm3579_vm6, %v3522_v58  ;;  %v3657_v58 = vld [vmem:[#allocation2 + $0xcc] sm:$0xe] }
 0x2ce   : > { %v4817_v23 = vrot.slane %v3657_v58, 9  ;;  %v3275_v1 = vrot.slane %v3274_v51, 4  ;;  %v3760_v27 = vsel %vm5900_vm14, %v4809_v33, %v3759_v31 }
 0x2d0   : > { %3844 = vrot.lane.b32.xlu2 %v3753_v25, %s5364_s11  ;;  %3882 = vrot.lane.b32.xlu0 %v3819_v14, %s5364_s11  ;;  %v3635_v25 = vld [vmem:[#allocation2 + $0x74] sm:$0x1]  ;;  %v2873_v14 = vld [vmem:[#allocation2 + $0x70] sm:$0xf]  ;;  %v3816_v5 = vsel %vm5900_vm14, %v4817_v23, %v3815_v15 }
 0x2d2   : > { %v3859_v40 = vpop.permute.xlu2 %3858  ;;  %3543 = vrot.lane.b32.xlu1 %v3472_v13, %s5363_s10  ;;  %v2945_v6 = vpop.permute.xlu0 %2944  ;;  %v3762_v13 = vrot.slane %v3635_v25, 5  ;;  %v7173_v25 = vld [vmem:[%s7380_s2] ss:$0 sm:$0xff] }
 0x2d3   : > { %3936 = vst.msk [vmem:[#allocation3 + $0x4c] sm:$0xf] %vm3916_vm7, %v3859_v40  ;;  %v3279_v40 = vrot.slane %v3277_v20, 5 }
 0x2d4   : > { %v3857_v38 = vpop.permute.xlu1 %3856  ;;  %3030 = vst.msk [vmem:[#allocation3 + $0x2c] sm:$0xf] %vm3018_vm4, %v2945_v6  ;;  %v3763_v29 = vsel %vm5900_vm14, %v3761_v44, %v3762_v13 }
 0x2d5   : > { %3935 = vst.msk [vmem:[#allocation3 + $0x48] sm:$0xf] %vm3916_vm7, %v3857_v38  ;;  %v3175_v38 = vshll.u32 %v3060_v55, 16 }
 0x2d8   : > { %2968 = vrot.lane.b32.xlu2 %v2881_v39, %s5362_s9  ;;  %2950 = vrot.lane.b32.xlu0 %v2872_v36, %s5362_s9  ;;  %v3280_v39 = vsel %vm5494_vm11, %v3275_v1, %v3279_v40  ;;  %v3177_v36 = vrot.slane %v3175_v38, 5 }
 0x2da   : > { %v2943_v12 = vpop.permute.xlu2 %2942  ;;  %3866 = vrot.lane.b32.xlu1 %v3791_v21, %s5364_s11  ;;  %v3504_v11 = vpop.permute.xlu0 %3503  ;;  %v3734_v21 = vrot.slane %v3623_v52, 5  ;;  %v3178_v16 = vor.u32 %v3177_v36, %v3174_v45 }
 0x2db   : > { %3029 = vst.msk [vmem:[#allocation3 + $0x28] sm:$0xf] %vm3018_vm4, %v2943_v12 }
 0x2dc   : > { %v3875_v60 = vpop.permute.xlu1 %3874  ;;  %3590 = vst.msk [vmem:[#allocation3 + $0x28] sm:$0xf] %vm3579_vm6, %v3504_v11  ;;  %v4979_v56 = vld [vmem:[#allocation3 + $0x48] sm:$0xff]  ;;  %v3735_v12 = vsel %vm5900_vm14, %v3733_v62, %v3734_v21  ;;  %v3179_v11 = vrot.slane %v3178_v16, 4 }
 0x2dd   : > { %3944 = vst.msk [vmem:[#allocation3 + $0x6c] sm:$0xf] %vm3916_vm7, %v3875_v60  ;;  %4907 = vmatmul.msk.bf16.gmra.mxu2 %vm4001_vm8, %v4979_v56 }
 0x2de   : > { %v3184_v34 = vsel %vm5494_vm11, %v3179_v11, %v7076_v50 }
 0x2e0   : > { %3527 = vrot.lane.b32.xlu2 %v3376_v42, %s5363_s10  ;;  %3497 = vrot.lane.b32.xlu0 %v3194_v18, %s5363_s10  ;;  %v3284_v18 = vor.u32 %v3283_v61, %v3279_v40 }
 0x2e2   : > { %v3490_v8 = vpop.permute.xlu2 %3489  ;;  %2934 = vrot.lane.b32.xlu1 %v2864_v49, %s5362_s9  ;;  %v3827_v43 = vpop.permute.xlu0 %3826  ;;  %v3285_v7 = vrot.slane %v3284_v18, 4  ;;  %v3289_v49 = vrot.slane %v3287_v24, 5 }
 0x2e3   : > { %3583 = vst.msk [vmem:[#allocation3 + $0xc] sm:$0xf] %vm3579_vm6, %v3490_v8 }
 0x2e4   : > { %v3488_v30 = vpop.permute.xlu1 %3487  ;;  %3920 = vst.msk [vmem:[#allocation3 + $0xc] sm:$0xf] %vm3916_vm7, %v3827_v43  ;;  %v4983_v3 = vld [vmem:[#allocation3 + $0x68] sm:$0xff]  ;;  %v3290_v50 = vsel %vm5494_vm11, %v3285_v7, %v3289_v49 }
 0x2e5   : > { %3582 = vst.msk [vmem:[#allocation3 + $0x8] sm:$0xf] %vm3579_vm6, %v3488_v30  ;;  %4943 = vmatmul.msk.bf16.gmra.mxu3 %vm4001_vm8, %v4983_v3 }
 0x2e8   : > { %3545 = vrot.lane.b32.xlu2 %v3482_v46, %s5363_s10  ;;  %3832 = vrot.lane.b32.xlu0 %v3732_v48, %s5364_s11 }
 0x2ea   : > { %v3825_v37 = vpop.permute.xlu2 %3824  ;;  %2952 = vrot.lane.b32.xlu1 %v2873_v14, %s5362_s9  ;;  %v2963_v10 = vpop.permute.xlu0 %2962 }
 0x2eb   : > { %3919 = vst.msk [vmem:[#allocation3 + $0x8] sm:$0xf] %vm3916_vm7, %v3825_v37 }
 0x2ec   : > { %v3506_v6 = vpop.permute.xlu1 %3505  ;;  %3039 = vst.msk [vmem:[#allocation3 + $0x50] sm:$0xf] %vm3018_vm4, %v2963_v10 }
 0x2ed   : > { %3591 = vst.msk [vmem:[#allocation3 + $0x2c] sm:$0xf] %vm3579_vm6, %v3506_v6 }
 0x2f0   : > { %3880 = vrot.lane.b32.xlu2 %v3816_v5, %s5364_s11  ;;  %3850 = vrot.lane.b32.xlu0 %v3763_v29, %s5364_s11 }
 0x2f2   : > { %v3843_v17 = vpop.permute.xlu2 %3842  ;;  %3511 = vrot.lane.b32.xlu1 %v3280_v39, %s5363_s10  ;;  %v4971_v9 = vld [vmem:[#allocation3 + $0x8] sm:$0xff]  ;;  %v2981_v15 = vpop.permute.xlu0 %2980 }
 0x2f3   : > { %3928 = vst.msk [vmem:[#allocation3 + $0x2c] sm:$0xf] %vm3916_vm7, %v3843_v17  ;;  %4843 = vmatmul.msk.bf16.gmra.mxu0 %vm4001_vm8, %v4971_v9 }
 0x2f4   : > { %v3841_v22 = vpop.permute.xlu1 %3840  ;;  %3048 = vst.msk [vmem:[#allocation3 + $0x74] sm:$0xf] %vm3018_vm4, %v2981_v15 }
 0x2f5   : > { %3927 = vst.msk [vmem:[#allocation3 + $0x28] sm:$0xf] %vm3916_vm7, %v3841_v22 }
 0x2f8   : > { %2936 = vrot.lane.b32.xlu2 %v2865_v35, %s5362_s9 }
 0x2fa   : > { %v2979_v60 = vpop.permute.xlu2 %2978  ;;  %3834 = vrot.lane.b32.xlu1 %v3735_v12, %s5364_s11  ;;  %v3540_v56 = vpop.permute.xlu0 %3539 }
 0x2fb   : > { %3047 = vst.msk [vmem:[#allocation3 + $0x70] sm:$0xf] %vm3018_vm4, %v2979_v60 }
 0x2fc   : > { %v2965_v42 = vpop.permute.xlu1 %2964  ;;  %3608 = vst.msk [vmem:[#allocation3 + $0x70] sm:$0xf] %vm3579_vm6, %v3540_v56  ;;  %v4975_v57 = vld [vmem:[#allocation3 + $0x28] sm:$0xff] }
 0x2fd   : > { %3040 = vst.msk [vmem:[#allocation3 + $0x54] sm:$0xf] %vm3018_vm4, %v2965_v42  ;;  %4871 = vmatmul.msk.bf16.gmra.mxu1 %vm4001_vm8, %v4975_v57 }
 0x300   : > { %3495 = vrot.lane.b32.xlu2 %v3184_v34, %s5363_s10 }
 0x302   : > { %v3526_v4 = vpop.permute.xlu2 %3525  ;;  %v3863_v63 = vpop.permute.xlu0 %3862 }
 0x303   : > { %3601 = vst.msk [vmem:[#allocation3 + $0x54] sm:$0xf] %vm3579_vm6, %v3526_v4 }
 0x304   : > { %v3524_v19 = vpop.permute.xlu1 %3523  ;;  %3938 = vst.msk [vmem:[#allocation3 + $0x54] sm:$0xf] %vm3916_vm7, %v3863_v63 }
 0x305   : > { %3600 = vst.msk [vmem:[#allocation3 + $0x50] sm:$0xf] %vm3579_vm6, %v3524_v19 }
 0x308   : > { %3513 = vrot.lane.b32.xlu2 %v3290_v50, %s5363_s10  ;;  %s4657_s10 = scalar_lea.hbm %s7381_s3, %s4986_s7 }
 0x30a   : > { %v3861_v0 = vpop.permute.xlu2 %3860  ;;  %v2947_v8 = vpop.permute.xlu0 %2946 }
 0x30b   : > { %3937 = vst.msk [vmem:[#allocation3 + $0x50] sm:$0xf] %vm3916_vm7, %v3861_v0 }
 0x30c   : > { %v3542_v43 = vpop.permute.xlu1 %3541  ;;  %3031 = vst.msk [vmem:[#allocation3 + $0x30] sm:$0xf] %vm3018_vm4, %v2947_v8 }
 0x30d   : > { %3609 = vst.msk [vmem:[#allocation3 + $0x74] sm:$0xf] %vm3579_vm6, %v3542_v43 }
 0x310   : > { %3848 = vrot.lane.b32.xlu2 %v3760_v27, %s5364_s11  ;;  %s4660_s11 = sshll.u32 %s4657_s10, 4  ;;  %s4661_s11 = int_to_ptr.hbm [resolvable:$true] %s4660_s11 }
 0x311   : > { %s5290_s19 = sshra.s32 %s4661_s11, 4  ;;  %s5291_s19 = int_to_ptr.hbm [resolvable:$true] %s5290_s19 }
 0x312   : > { %v3879_v41 = vpop.permute.xlu2 %3878  ;;  %v4980_v32 = vld [vmem:[#allocation3 + $0x50] sm:$0xff]  ;;  %v3494_v30 = vpop.permute.xlu0 %3493  ;;  %s5292_s21 = scalar_lea.hbm %s5291_s19, 128  ;;  %p5297_p1 = scmp.lt.s32.totalorder %s5291_s19, %s7381_s3 }
 0x313   : > { %3946 = vst.msk [vmem:[#allocation3 + $0x74] sm:$0xf] %vm3916_vm7, %v3879_v41  ;;  %4908 = vmatmul.msk.bf16.gmra.mxu2 %vm4001_vm8, %v4980_v32  ;;  %p5293_p12 = scmp.ne.s32.totalorder %s5291_s19, %s5292_s21  ;;  %p5298_p2 = scmp.lt.s32.totalorder %s5296_s27, %s5292_s21 }
 0x314   : > { %v3877_v3 = vpop.permute.xlu1 %3876  ;;  %3585 = vst.msk [vmem:[#allocation3 + $0x14] sm:$0xf] %vm3579_vm6, %v3494_v30 }
 0x315   : > { %3945 = vst.msk [vmem:[#allocation3 + $0x70] sm:$0xf] %vm3916_vm7, %v3877_v3  ;;  %p5294_p13 = pnand %p5293_p12, %p5426_p4  ;;  %p5299_p3 = por %p5298_p2, %p5297_p1 }
 0x317   : > { %p5295_p0 = pneg %p5294_p13 }
 0x319   : > { %p5300_p5 = pnand %p5299_p3, %p5295_p0 }
 0x31a   : > { %v3492_v59 = vpop.permute.xlu2 %3491  ;;  %v3829_v46 = vpop.permute.xlu0 %3828 }
 0x31b   : > { %3584 = vst.msk [vmem:[#allocation3 + $0x10] sm:$0xf] %vm3579_vm6, %v3492_v59 }
 0x31c   : > { %v2949_v47 = vpop.permute.xlu1 %2948  ;;  %3921 = vst.msk [vmem:[#allocation3 + $0x10] sm:$0xf] %vm3916_vm7, %v3829_v46  ;;  %v4984_v53 = vld [vmem:[#allocation3 + $0x70] sm:$0xff] }
 0x31d   : > { %3032 = vst.msk [vmem:[#allocation3 + $0x34] sm:$0xf] %vm3018_vm4, %v2949_v47  ;;  %4944 = vmatmul.msk.bf16.gmra.mxu3 %vm4001_vm8, %v4984_v53 }
 0x322   : > { %v3510_v48 = vpop.permute.xlu2 %3509  ;;  %v3847_v31 = vpop.permute.xlu0 %3846 }
 0x323   : > { %3593 = vst.msk [vmem:[#allocation3 + $0x34] sm:$0xf] %vm3579_vm6, %v3510_v48 }
 0x324   : > { %v3508_v58 = vpop.permute.xlu1 %3507  ;;  %3930 = vst.msk [vmem:[#allocation3 + $0x34] sm:$0xf] %vm3916_vm7, %v3847_v31 }
 0x325   : > { %3592 = vst.msk [vmem:[#allocation3 + $0x30] sm:$0xf] %vm3579_vm6, %v3508_v58 }
 0x326   : > { %v4527_v14 = vpop.f32.mrf.mxu3 }
 0x327   : > { %v7178_v51 = vadd.f32 %v7173_v25, %v4527_v14 }
 0x328   : > { %v4360_v20 = vpop.f32.mrf.mxu2 }
 0x329   : > { %v4547_v23 = vmin.f32 %v7178_v51, 20.0  ;;  %v7182_v13 = vadd.f32 %v7173_v25, %v4360_v20 }
 0x32a   : > { %v3845_v44 = vpop.permute.xlu2 %3844  ;;  %v2983_v37 = vpop.permute.xlu0 %2982 }
 0x32b   : > { %3929 = vst.msk [vmem:[#allocation3 + $0x30] sm:$0xf] %vm3916_vm7, %v3845_v44  ;;  %v4555_v10 = vmul.f32 1.442695, %v4547_v23  ;;  %v4380_v55 = vmin.f32 %v7182_v13, 20.0 }
 0x32c   : > { %v3831_v1 = vpop.permute.xlu1 %3830  ;;  %3049 = vst.msk [vmem:[#allocation3 + $0x78] sm:$0xf] %vm3018_vm4, %v2983_v37 }
 0x32d   : > { %3922 = vst.msk [vmem:[#allocation3 + $0x14] sm:$0xf] %vm3916_vm7, %v3831_v1  ;;  %5148 = vpow2.f32 %v4555_v10  ;;  %v4388_v40 = vmul.f32 1.442695, %v4380_v55 }
 0x32e   : > { %v4529_v6 = vpop.f32.mrf.mxu3 }
 0x32f   : > { %5150 = vpow2.f32 %v4388_v40  ;;  %v7189_v5 = vadd.f32 %v7173_v25, %v4529_v6 }
 0x330   : > { %v4362_v29 = vpop.f32.mrf.mxu2 }
 0x331   : > { %v4548_v2 = vmin.f32 %v7189_v5, 20.0  ;;  %v7193_v52 = vadd.f32 %v7173_v25, %v4362_v29 }
 0x332   : > { %v2969_v38 = vpop.permute.xlu2 %2968  ;;  %v4976_v39 = vld [vmem:[#allocation3 + $0x30] sm:$0xff]  ;;  %v3530_v45 = vpop.permute.xlu0 %3529 }
 0x333   : > { %3042 = vst.msk [vmem:[#allocation3 + $0x5c] sm:$0xf] %vm3018_vm4, %v2969_v38  ;;  %v5149_v36 = vpop.eup %5148  ;;  %v4557_v17 = vmul.f32 1.442695, %v4548_v2  ;;  %4872 = vmatmul.msk.bf16.gmra.mxu1 %vm4001_vm8, %v4976_v39  ;;  %v4381_v9 = vmin.f32 %v7193_v52, 20.0 }
 0x334   : > { %v2967_v15 = vpop.permute.xlu1 %2966  ;;  %3603 = vst.msk [vmem:[#allocation3 + $0x5c] sm:$0xf] %vm3579_vm6, %v3530_v45  ;;  %v4972_v62 = vld [vmem:[#allocation3 + $0x10] sm:$0xff]  ;;  %v4571_v21 = vadd.f32 1.0, %v5149_v36 }
 0x335   : > { %3041 = vst.msk [vmem:[#allocation3 + $0x58] sm:$0xf] %vm3018_vm4, %v2967_v15  ;;  %v5151_v22 = vpop.eup %5150  ;;  %5152 = vpow2.f32 %v4557_v17  ;;  %v4390_v26 = vmul.f32 1.442695, %v4381_v9  ;;  %4844 = vmatmul.msk.bf16.gmra.mxu0 %vm4001_vm8, %v4972_v62 }
 0x336   : > { %v4404_v35 = vadd.f32 1.0, %v5151_v22  ;;  %v4579_v16 = vmul.f32 %v4571_v21, %v4571_v21 }
 0x337   : > { %5154 = vpow2.f32 %v4390_v26 }
 0x338   : > { %v4412_v12 = vmul.f32 %v4404_v35, %v4404_v35  ;;  %v4603_v28 = vadd.f32 1.0, %v4579_v16  ;;  %v4946_v27 = vadd.f32 -1.0, %v4579_v16 }
 0x33a   : > { %v3528_v11 = vpop.permute.xlu2 %3527  ;;  %v3865_v61 = vpop.permute.xlu0 %3864  ;;  %v4436_v34 = vadd.f32 1.0, %v4412_v12  ;;  %5156 = vrcp.f32 %v4603_v28  ;;  %v4910_v59 = vadd.f32 -1.0, %v4412_v12  ;;  %v4595_v14 = vmul.f32 %v4946_v27, %v7178_v51 }
 0x33b   : > { %3602 = vst.msk [vmem:[#allocation3 + $0x58] sm:$0xf] %vm3579_vm6, %v3528_v11  ;;  %v4027_v60 = vpop.f32.mrf.mxu0  ;;  %v5153_v56 = vpop.eup %5152 }
 0x33c   : > { %v7203_v42 = vadd.f32 %v7173_v25, %v4027_v60  ;;  %v2985_v57 = vpop.permute.xlu1 %2984  ;;  %3939 = vst.msk [vmem:[#allocation3 + $0x58] sm:$0xf] %vm3916_vm7, %v3865_v61  ;;  %v4572_v18 = vadd.f32 1.0, %v5153_v56  ;;  %5158 = vrcp.f32 %v4436_v34  ;;  %v4428_v10 = vmul.f32 %v4910_v59, %v7182_v13 }
 0x33d   : > { %3050 = vst.msk [vmem:[#allocation3 + $0x7c] sm:$0xf] %vm3018_vm4, %v2985_v57  ;;  %v5155_v24 = vpop.eup %5154 }
 0x33e   : > { %v4047_v7 = vmin.f32 %v7203_v42, 20.0  ;;  %v4580_v49 = vmul.f32 %v4572_v18, %v4572_v18  ;;  %v4405_v4 = vadd.f32 1.0, %v5155_v24 }
 0x340   : > { %v4055_v63 = vmul.f32 1.442695, %v4047_v7  ;;  %v4604_v19 = vadd.f32 1.0, %v4580_v49  ;;  %v4413_v50 = vmul.f32 %v4405_v4, %v4405_v4  ;;  %v4947_v41 = vadd.f32 -1.0, %v4580_v49  ;;  %v5157_v46 = vpop.eup %5156 }
 0x341   : > { %v4619_v1 = vmul.f32 %v5157_v46, %v4595_v14 }
 0x342   : > { %5160 = vpow2.f32 %v4055_v63  ;;  %v3546_v54 = vpop.permute.xlu2 %3545  ;;  %v3883_v33 = vpop.permute.xlu0 %3882  ;;  %v4437_v0 = vadd.f32 1.0, %v4413_v50  ;;  %v4911_v47 = vadd.f32 -1.0, %v4413_v50  ;;  %v4596_v20 = vmul.f32 %v4947_v41, %v7189_v5 }
 0x343   : > { %5162 = vrcp.f32 %v4604_v19  ;;  %3611 = vst.msk [vmem:[#allocation3 + $0x7c] sm:$0xf] %vm3579_vm6, %v3546_v54  ;;  %v4029_v8 = vpop.f32.mrf.mxu0  ;;  %v4193_v43 = vpop.f32.mrf.mxu1 }
 0x344   : > { %v7210_v32 = vadd.f32 %v7173_v25, %v4029_v8  ;;  %v7213_v30 = vadd.f32 %v7173_v25, %v4193_v43  ;;  %v3544_v3 = vpop.permute.xlu1 %3543  ;;  %3948 = vst.msk [vmem:[#allocation3 + $0x7c] sm:$0xf] %vm3916_vm7, %v3883_v33  ;;  %5164 = vrcp.f32 %v4437_v0  ;;  %v5159_v31 = vpop.eup %5158  ;;  %v4429_v6 = vmul.f32 %v4911_v47, %v7193_v52 }
 0x345   : > { %3610 = vst.msk [vmem:[#allocation3 + $0x78] sm:$0xf] %vm3579_vm6, %v3544_v3  ;;  %v4452_v39 = vmul.f32 %v5159_v31, %v4428_v10 }
 0x346   : > { %v4048_v53 = vmin.f32 %v7210_v32, 20.0  ;;  %v4213_v48 = vmin.f32 %v7213_v30, 20.0 }
 0x348   : > { %v5161_v58 = vpop.eup %5160  ;;  %v4057_v23 = vmul.f32 1.442695, %v4048_v53  ;;  %v4221_v44 = vmul.f32 1.442695, %v4213_v48 }
 0x349   : > { %v5163_v37 = vpop.eup %5162  ;;  %v4071_v55 = vadd.f32 1.0, %v5161_v58 }
 0x34a   : > { %v4620_v40 = vmul.f32 %v5163_v37, %v4596_v20  ;;  %5166 = vpow2.f32 %v4057_v23  ;;  %v3881_v29 = vpop.permute.xlu2 %3880  ;;  %v2951_v2 = vpop.permute.xlu0 %2950 }
 0x34b   : > { %v5165_v38 = vpop.eup %5164  ;;  %5168 = vpow2.f32 %v4221_v44  ;;  %3947 = vst.msk [vmem:[#allocation3 + $0x78] sm:$0xf] %vm3916_vm7, %v3881_v29  ;;  %v4195_v51 = vpop.f32.mrf.mxu1  ;;  %v4079_v17 = vmul.f32 %v4071_v55, %v4071_v55 }
 0x34c   : > { %v5050_v5 = vpack.c.bf16 %v4620_v40, %v4619_v1  ;;  %v4453_v45 = vmul.f32 %v5165_v38, %v4429_v6  ;;  %v7228_v36 = vadd.f32 %v7173_v25, %v4195_v51  ;;  %v3867_v13 = vpop.permute.xlu1 %3866  ;;  %3033 = vst.msk [vmem:[#allocation3 + $0x38] sm:$0xf] %vm3018_vm4, %v2951_v2 }
 0x34d   : > { %3940 = vst.msk [vmem:[#allocation3 + $0x5c] sm:$0xf] %vm3916_vm7, %v3867_v13  ;;  %v4103_v22 = vadd.f32 1.0, %v4079_v17  ;;  %v4846_v18 = vadd.f32 -1.0, %v4079_v17 }
 0x34e   : > { %5078 = vst [vmem:[%s7232_s6 + $0x60] sm:$0xff] %v5050_v5   ;;  %v5030_v52 = vpack.c.bf16 %v4453_v45, %v4452_v39  ;;  %v4214_v9 = vmin.f32 %v7228_v36, 20.0 }
 0x34f   : > { %v4095_v54 = vmul.f32 %v4846_v18, %v7203_v42 }
 0x350   : > { %v5167_v15 = vpop.eup %5166  ;;  %5074 = vst [vmem:[%s7232_s6 + $0x40] sm:$0xff] %v5030_v52   ;;  %v4223_v62 = vmul.f32 1.442695, %v4214_v9 }
 0x351   : > { %v5169_v21 = vpop.eup %5168  ;;  %v4072_v26 = vadd.f32 1.0, %v5167_v15 }
 0x352   : > { %v4237_v35 = vadd.f32 1.0, %v5169_v21  ;;  %5170 = vpow2.f32 %v4223_v62  ;;  %v2937_v16 = vpop.permute.xlu2 %2936  ;;  %v4985_v12 = vld [vmem:[#allocation3 + $0x78] sm:$0xff]  ;;  %v3498_v11 = vpop.permute.xlu0 %3497 }
 0x353   : > { %v4080_v61 = vmul.f32 %v4072_v26, %v4072_v26  ;;  %3026 = vst.msk [vmem:[#allocation3 + $0x1c] sm:$0xf] %vm3018_vm4, %v2937_v16  ;;  %4945 = vmatmul.msk.bf16.gmra.mxu3 %vm4001_vm8, %v4985_v12  ;;  %5172 = vrcp.f32 %v4103_v22 }
 0x354   : > { %v2935_v60 = vpop.permute.xlu1 %2934  ;;  %3587 = vst.msk [vmem:[#allocation3 + $0x1c] sm:$0xf] %vm3579_vm6, %v3498_v11  ;;  %v4981_v56 = vld [vmem:[#allocation3 + $0x58] sm:$0xff]  ;;  %v4245_v57 = vmul.f32 %v4237_v35, %v4237_v35 }
 0x355   : > { %v4104_v28 = vadd.f32 1.0, %v4080_v61  ;;  %3025 = vst.msk [vmem:[#allocation3 + $0x18] sm:$0xf] %vm3018_vm4, %v2935_v60  ;;  %4909 = vmatmul.msk.bf16.gmra.mxu2 %vm4001_vm8, %v4981_v56  ;;  %v4847_v24 = vadd.f32 -1.0, %v4080_v61 }
 0x356   : > { %v4269_v7 = vadd.f32 1.0, %v4245_v57  ;;  %v4874_v59 = vadd.f32 -1.0, %v4245_v57 }
 0x357   : > { %5174 = vrcp.f32 %v4104_v28  ;;  %v4096_v33 = vmul.f32 %v4847_v24, %v7210_v32 }
 0x358   : > { %v5171_v34 = vpop.eup %5170  ;;  %5176 = vrcp.f32 %v4269_v7  ;;  %v4261_v31 = vmul.f32 %v4874_v59, %v7213_v30 }
 0x359   : > { %v4238_v49 = vadd.f32 1.0, %v5171_v34  ;;  %v5173_v19 = vpop.eup %5172 }
 0x35a   : > { %v3496_v4 = vpop.permute.xlu2 %3495  ;;  %v3833_v63 = vpop.permute.xlu0 %3832  ;;  %v4119_v27 = vmul.f32 %v5173_v19, %v4095_v54 }
 0x35b   : > { %v4246_v50 = vmul.f32 %v4238_v49, %v4238_v49  ;;  %3586 = vst.msk [vmem:[#allocation3 + $0x18] sm:$0xf] %vm3579_vm6, %v3496_v4 }
 0x35c   : > { %v2953_v0 = vpop.permute.xlu1 %2952  ;;  %3923 = vst.msk [vmem:[#allocation3 + $0x18] sm:$0xf] %vm3916_vm7, %v3833_v63 }
 0x35d   : > { %v5175_v8 = vpop.eup %5174  ;;  %v4270_v43 = vadd.f32 1.0, %v4246_v50  ;;  %3034 = vst.msk [vmem:[#allocation3 + $0x3c] sm:$0xf] %vm3018_vm4, %v2953_v0  ;;  %v4875_v46 = vadd.f32 -1.0, %v4246_v50 }
 0x35e   : > { %v4120_v41 = vmul.f32 %v5175_v8, %v4096_v33  ;;  %v5177_v48 = vpop.eup %5176 }
 0x35f   : > { %5178 = vrcp.f32 %v4270_v43  ;;  %v4262_v58 = vmul.f32 %v4875_v46, %v7228_v36  ;;  %v4285_v44 = vmul.f32 %v5177_v48, %v4261_v31 }
 0x360   : > { %v4990_v3 = vpack.c.bf16 %v4120_v41, %v4119_v27  ;;  %v4365_v47 = vpop.f32.mrf.mxu2 }
 0x361   : > { %v7249_v42 = vadd.f32 %v7173_v25, %v4365_v47 }
 0x362   : > { %4991 = vst [vmem:[%s7232_s6] sm:$0xff] %v4990_v3   ;;  %v3514_v53 = vpop.permute.xlu2 %3513  ;;  %v3851_v32 = vpop.permute.xlu0 %3850 }
 0x363   : > { %3595 = vst.msk [vmem:[#allocation3 + $0x3c] sm:$0xf] %vm3579_vm6, %v3514_v53  ;;  %v4382_v14 = vmin.f32 %v7249_v42, 20.0 }
 0x364   : > { %v3512_v20 = vpop.permute.xlu1 %3511  ;;  %3932 = vst.msk [vmem:[#allocation3 + $0x3c] sm:$0xf] %vm3916_vm7, %v3851_v32 }
 0x365   : > { %v5179_v23 = vpop.eup %5178  ;;  %3594 = vst.msk [vmem:[#allocation3 + $0x38] sm:$0xf] %vm3579_vm6, %v3512_v20  ;;  %v4392_v10 = vmul.f32 1.442695, %v4382_v14 }
 0x366   : > { %v4286_v37 = vmul.f32 %v5179_v23, %v4262_v58 }
 0x367   : > { %5180 = vpow2.f32 %v4392_v10 }
 0x368   : > { %v5010_v55 = vpack.c.bf16 %v4286_v37, %v4285_v44  ;;  %v4367_v1 = vpop.f32.mrf.mxu2  ;;  %v4532_v40 = vpop.f32.mrf.mxu3 }
 0x369   : > { %v4368_v30 = vadd.f32 %v7173_v25, %v4367_v1  ;;  %v7260_v29 = vadd.f32 %v7173_v25, %v4532_v40 }
 0x36a   : > { %5070 = vst [vmem:[%s7232_s6 + $0x20] sm:$0xff] %v5010_v55   ;;  %v3849_v6 = vpop.permute.xlu2 %3848 }
 0x36b   : > { %3931 = vst.msk [vmem:[#allocation3 + $0x38] sm:$0xf] %vm3916_vm7, %v3849_v6  ;;  %v4383_v2 = vmin.f32 %v4368_v30, 20.0  ;;  %v4549_v38 = vmin.f32 %v7260_v29, 20.0 }
 0x36c   : > { %v3835_v51 = vpop.permute.xlu1 %3834 }
 0x36d   : > { %3924 = vst.msk [vmem:[#allocation3 + $0x1c] sm:$0xf] %vm3916_vm7, %v3835_v51  ;;  %v5181_v39 = vpop.eup %5180  ;;  %v4394_v5 = vmul.f32 1.442695, %v4383_v2  ;;  %v4559_v45 = vmul.f32 1.442695, %v4549_v38 }
 0x36e   : > { %v4406_v36 = vadd.f32 1.0, %v5181_v39 }
 0x36f   : > { %5182 = vpow2.f32 %v4394_v5 }
 0x370   : > { %5184 = vpow2.f32 %v4559_v45  ;;  %v4032_v13 = vpop.f32.mrf.mxu0  ;;  %v4534_v17 = vpop.f32.mrf.mxu3  ;;  %v4414_v52 = vmul.f32 %v4406_v36, %v4406_v36 }
 0x371   : > { %v7266_v9 = vadd.f32 %v7173_v25, %v4032_v13  ;;  %v7269_v62 = vadd.f32 %v7173_v25, %v4534_v17 }
 0x372   : > { %v4977_v15 = vld [vmem:[#allocation3 + $0x38] sm:$0xff]  ;;  %v4438_v16 = vadd.f32 1.0, %v4414_v52  ;;  %v4912_v4 = vadd.f32 -1.0, %v4414_v52 }
 0x373   : > { %v4049_v21 = vmin.f32 %v7266_v9, 20.0  ;;  %4873 = vmatmul.msk.bf16.gmra.mxu1 %vm4001_vm8, %v4977_v15  ;;  %v4550_v22 = vmin.f32 %v7269_v62, 20.0 }
 0x374   : > { %v4973_v26 = vld [vmem:[#allocation3 + $0x18] sm:$0xff]  ;;  %v4430_v3 = vmul.f32 %v4912_v4, %v7249_v42 }
 0x375   : > { %v5183_v35 = vpop.eup %5182  ;;  %v4059_v12 = vmul.f32 1.442695, %v4049_v21  ;;  %v4561_v11 = vmul.f32 1.442695, %v4550_v22  ;;  %4845 = vmatmul.msk.bf16.gmra.mxu0 %vm4001_vm8, %v4973_v26 }
 0x376   : > { %v5185_v61 = vpop.eup %5184  ;;  %v4407_v60 = vadd.f32 1.0, %v5183_v35 }
 0x377   : > { %v4573_v56 = vadd.f32 1.0, %v5185_v61  ;;  %5186 = vpow2.f32 %v4059_v12 }
 0x378   : > { %v4415_v28 = vmul.f32 %v4407_v60, %v4407_v60  ;;  %5188 = vpow2.f32 %v4561_v11  ;;  %v4034_v57 = vpop.f32.mrf.mxu0 }
 0x379   : > { %5190 = vrcp.f32 %v4438_v16  ;;  %v7276_v34 = vadd.f32 %v7173_v25, %v4034_v57  ;;  %v4581_v7 = vmul.f32 %v4573_v56, %v4573_v56 }
 0x37a   : > { %v4439_v18 = vadd.f32 1.0, %v4415_v28  ;;  %v4198_v24 = vpop.f32.mrf.mxu1  ;;  %v4913_v50 = vadd.f32 -1.0, %v4415_v28 }
 0x37b   : > { %v4050_v49 = vmin.f32 %v7276_v34, 20.0  ;;  %v7280_v63 = vadd.f32 %v7173_v25, %v4198_v24  ;;  %v4605_v27 = vadd.f32 1.0, %v4581_v7  ;;  %v4948_v10 = vadd.f32 -1.0, %v4581_v7 }
 0x37c   : > { %5192 = vrcp.f32 %v4439_v18  ;;  %v4431_v46 = vmul.f32 %v4913_v50, %v4368_v30 }
 0x37d   : > { %v5187_v19 = vpop.eup %5186  ;;  %v4061_v54 = vmul.f32 1.442695, %v4050_v49  ;;  %v4215_v8 = vmin.f32 %v7280_v63, 20.0  ;;  %v4597_v51 = vmul.f32 %v4948_v10, %v7260_v29 }
 0x37e   : > { %v5189_v33 = vpop.eup %5188  ;;  %v4073_v0 = vadd.f32 1.0, %v5187_v19 }
 0x37f   : > { %v5191_v43 = vpop.eup %5190  ;;  %v4574_v41 = vadd.f32 1.0, %v5189_v33  ;;  %5194 = vpow2.f32 %v4061_v54  ;;  %v4225_v59 = vmul.f32 1.442695, %v4215_v8 }
 0x380   : > { %v4454_v32 = vmul.f32 %v5191_v43, %v4430_v3  ;;  %v4081_v48 = vmul.f32 %v4073_v0, %v4073_v0 }
 0x381   : > { %v4582_v47 = vmul.f32 %v4574_v41, %v4574_v41  ;;  %5196 = vpow2.f32 %v4225_v59 }
 0x382   : > { %v5193_v53 = vpop.eup %5192  ;;  %v4200_v31 = vpop.f32.mrf.mxu1  ;;  %5198 = vrcp.f32 %v4605_v27  ;;  %v4105_v42 = vadd.f32 1.0, %v4081_v48  ;;  %v4848_v52 = vadd.f32 -1.0, %v4081_v48 }
 0x383   : > { %v4455_v58 = vmul.f32 %v5193_v53, %v4431_v46  ;;  %v4606_v14 = vadd.f32 1.0, %v4582_v47  ;;  %v4201_v20 = vadd.f32 %v7173_v25, %v4200_v31  ;;  %v4949_v55 = vadd.f32 -1.0, %v4582_v47 }
 0x384   : > { %v4097_v29 = vmul.f32 %v4848_v52, %v7266_v9 }
 0x385   : > { %v5195_v23 = vpop.eup %5194  ;;  %v5035_v44 = vpack.c.bf16 %v4455_v58, %v4454_v32  ;;  %5200 = vrcp.f32 %v4606_v14  ;;  %v4216_v37 = vmin.f32 %v4201_v20, 20.0  ;;  %v4598_v39 = vmul.f32 %v4949_v55, %v7269_v62 }
 0x386   : > { %v4074_v1 = vadd.f32 1.0, %v5195_v23 }
 0x387   : > { %5075 = vst [vmem:[%s7232_s6 + $0x48] sm:$0xff] %v5035_v44   ;;  %v4227_v40 = vmul.f32 1.442695, %v4216_v37  ;;  %v5197_v6 = vpop.eup %5196 }
 0x388   : > { %v4082_v30 = vmul.f32 %v4074_v1, %v4074_v1  ;;  %v5199_v2 = vpop.eup %5198  ;;  %v4239_v38 = vadd.f32 1.0, %v5197_v6 }
 0x389   : > { %5202 = vpow2.f32 %v4227_v40  ;;  %v4621_v36 = vmul.f32 %v5199_v2, %v4597_v51 }
 0x38a   : > { %5204 = vrcp.f32 %v4105_v42  ;;  %v4106_v5 = vadd.f32 1.0, %v4082_v30  ;;  %v4247_v17 = vmul.f32 %v4239_v38, %v4239_v38  ;;  %v4849_v15 = vadd.f32 -1.0, %v4082_v30 }
 0x38b   : > { %v5201_v45 = vpop.eup %5200 }
 0x38c   : > { %v4622_v13 = vmul.f32 %v5201_v45, %v4598_v39  ;;  %5206 = vrcp.f32 %v4106_v5  ;;  %v4271_v35 = vadd.f32 1.0, %v4247_v17  ;;  %v4098_v12 = vmul.f32 %v4849_v15, %v7276_v34 }
 0x38d   : > { %v4876_v18 = vadd.f32 -1.0, %v4247_v17 }
 0x38e   : > { %v5055_v21 = vpack.c.bf16 %v4622_v13, %v4621_v36  ;;  %5208 = vrcp.f32 %v4271_v35 }
 0x38f   : > { %v5203_v22 = vpop.eup %5202  ;;  %v4263_v9 = vmul.f32 %v4876_v18, %v7280_v63 }
 0x390   : > { %v5205_v26 = vpop.eup %5204  ;;  %5079 = vst [vmem:[%s7232_s6 + $0x68] sm:$0xff] %v5055_v21   ;;  %v4240_v16 = vadd.f32 1.0, %v5203_v22 }
 0x391   : > { %v4121_v61 = vmul.f32 %v5205_v26, %v4097_v29 }
 0x392   : > { %v5207_v62 = vpop.eup %5206  ;;  %v4248_v11 = vmul.f32 %v4240_v16, %v4240_v16 }
 0x393   : > { %v4122_v60 = vmul.f32 %v5207_v62, %v4098_v12 }
 0x394   : > { %v4272_v56 = vadd.f32 1.0, %v4248_v11  ;;  %v4877_v24 = vadd.f32 -1.0, %v4248_v11  ;;  %v5209_v4 = vpop.eup %5208 }
 0x395   : > { %v4995_v28 = vpack.c.bf16 %v4122_v60, %v4121_v61  ;;  %v4287_v54 = vmul.f32 %v5209_v4, %v4263_v9 }
 0x396   : > { %5210 = vrcp.f32 %v4272_v56  ;;  %v4370_v57 = vpop.f32.mrf.mxu2  ;;  %v4264_v34 = vmul.f32 %v4877_v24, %v4201_v20 }
 0x397   : > { %5067 = vst [vmem:[%s7232_s6 + $0x8] sm:$0xff] %v4995_v28   ;;  %v4371_v7 = vadd.f32 %v7173_v25, %v4370_v57 }
 0x399   : > { %v4384_v49 = vmin.f32 %v4371_v7, 20.0 }
 0x39b   : > { %v4396_v19 = vmul.f32 1.442695, %v4384_v49 }
 0x39c   : > { %v5211_v50 = vpop.eup %5210 }
 0x39d   : > { %v4288_v33 = vmul.f32 %v5211_v50, %v4264_v34  ;;  %5212 = vpow2.f32 %v4396_v19 }
 0x39e   : > { %v4372_v0 = vpop.f32.mrf.mxu2 }
 0x39f   : > { %v5015_v8 = vpack.c.bf16 %v4288_v33, %v4287_v54  ;;  %v4373_v43 = vadd.f32 %v7173_v25, %v4372_v0 }
 0x3a0   : > { %v4537_v27 = vpop.f32.mrf.mxu3 }
 0x3a1   : > { %5071 = vst [vmem:[%s7232_s6 + $0x28] sm:$0xff] %v5015_v8   ;;  %v4385_v41 = vmin.f32 %v4373_v43, 20.0  ;;  %v7297_v3 = vadd.f32 %v7173_v25, %v4537_v27 }
 0x3a3   : > { %v5213_v59 = vpop.eup %5212  ;;  %v4398_v46 = vmul.f32 1.442695, %v4385_v41  ;;  %v4551_v63 = vmin.f32 %v7297_v3, 20.0 }
 0x3a4   : > { %v4408_v47 = vadd.f32 1.0, %v5213_v59 }
 0x3a5   : > { %5214 = vpow2.f32 %v4398_v46  ;;  %v4563_v53 = vmul.f32 1.442695, %v4551_v63 }
 0x3a6   : > { %v4416_v32 = vmul.f32 %v4408_v47, %v4408_v47 }
 0x3a7   : > { %5216 = vpow2.f32 %v4563_v53 }
 0x3a8   : > { %v4539_v48 = vpop.f32.mrf.mxu3  ;;  %v4440_v20 = vadd.f32 1.0, %v4416_v32  ;;  %v4914_v2 = vadd.f32 -1.0, %v4416_v32 }
 0x3a9   : > { %v4540_v31 = vadd.f32 %v7173_v25, %v4539_v48 }
 0x3aa   : > { %v4432_v15 = vmul.f32 %v4914_v2, %v4371_v7 }
 0x3ab   : > { %v5215_v58 = vpop.eup %5214  ;;  %v4552_v14 = vmin.f32 %v4540_v31, 20.0 }
 0x3ac   : > { %v4409_v23 = vadd.f32 1.0, %v5215_v58 }
 0x3ad   : > { %v5217_v44 = vpop.eup %5216  ;;  %v4565_v37 = vmul.f32 1.442695, %v4552_v14 }
 0x3ae   : > { %v4417_v10 = vmul.f32 %v4409_v23, %v4409_v23  ;;  %v4575_v42 = vadd.f32 1.0, %v5217_v44 }
 0x3af   : > { %5218 = vpow2.f32 %v4565_v37 }
 0x3b0   : > { %5220 = vrcp.f32 %v4440_v20  ;;  %v4441_v55 = vadd.f32 1.0, %v4417_v10  ;;  %v4203_v1 = vpop.f32.mrf.mxu1  ;;  %v4583_v6 = vmul.f32 %v4575_v42, %v4575_v42  ;;  %v4915_v38 = vadd.f32 -1.0, %v4417_v10 }
 0x3b1   : > { %v7302_v40 = vadd.f32 %v7173_v25, %v4203_v1 }
 0x3b2   : > { %5222 = vrcp.f32 %v4441_v55  ;;  %v4037_v30 = vpop.f32.mrf.mxu0  ;;  %v4607_v17 = vadd.f32 1.0, %v4583_v6  ;;  %v4433_v21 = vmul.f32 %v4915_v38, %v4373_v43  ;;  %v4950_v18 = vadd.f32 -1.0, %v4583_v6 }
 0x3b3   : > { %v4217_v51 = vmin.f32 %v7302_v40, 20.0  ;;  %v7306_v39 = vadd.f32 %v7173_v25, %v4037_v30 }
 0x3b4   : > { %v4599_v54 = vmul.f32 %v4950_v18, %v7297_v3 }
 0x3b5   : > { %v5219_v5 = vpop.eup %5218  ;;  %v4229_v45 = vmul.f32 1.442695, %v4217_v51  ;;  %v4051_v36 = vmin.f32 %v7306_v39, 20.0 }
 0x3b6   : > { %v5221_v13 = vpop.eup %5220  ;;  %v4576_v52 = vadd.f32 1.0, %v5219_v5 }
 0x3b7   : > { %5224 = vpow2.f32 %v4229_v45  ;;  %v4063_v22 = vmul.f32 1.442695, %v4051_v36  ;;  %v4456_v29 = vmul.f32 %v5221_v13, %v4432_v15 }
 0x3b8   : > { %v5223_v26 = vpop.eup %5222  ;;  %v4584_v35 = vmul.f32 %v4576_v52, %v4576_v52  ;;  %v4205_v16 = vpop.f32.mrf.mxu1 }
 0x3b9   : > { %v4457_v12 = vmul.f32 %v5223_v26, %v4433_v21  ;;  %5226 = vpow2.f32 %v4063_v22  ;;  %v4206_v62 = vadd.f32 %v7173_v25, %v4205_v16 }
 0x3ba   : > { %5228 = vrcp.f32 %v4607_v17  ;;  %v4608_v11 = vadd.f32 1.0, %v4584_v35  ;;  %v4039_v61 = vpop.f32.mrf.mxu0  ;;  %v4951_v24 = vadd.f32 -1.0, %v4584_v35 }
 0x3bb   : > { %v5040_v60 = vpack.c.bf16 %v4457_v12, %v4456_v29  ;;  %v4218_v56 = vmin.f32 %v4206_v62, 20.0  ;;  %v4040_v28 = vadd.f32 %v7173_v25, %v4039_v61 }
 0x3bc   : > { %5230 = vrcp.f32 %v4608_v11  ;;  %v4600_v33 = vmul.f32 %v4951_v24, %v4540_v31 }
 0x3bd   : > { %v5225_v57 = vpop.eup %5224  ;;  %5076 = vst [vmem:[%s7232_s6 + $0x50] sm:$0xff] %v5040_v60   ;;  %v4231_v7 = vmul.f32 1.442695, %v4218_v56  ;;  %v4052_v49 = vmin.f32 %v4040_v28, 20.0 }
 0x3be   : > { %v4241_v4 = vadd.f32 1.0, %v5225_v57 }
 0x3bf   : > { %v5227_v9 = vpop.eup %5226  ;;  %5232 = vpow2.f32 %v4231_v7  ;;  %v4065_v34 = vmul.f32 1.442695, %v4052_v49 }
 0x3c0   : > { %v5229_v19 = vpop.eup %5228  ;;  %v4075_v50 = vadd.f32 1.0, %v5227_v9  ;;  %v4249_v8 = vmul.f32 %v4241_v4, %v4241_v4 }
 0x3c1   : > { %5234 = vpow2.f32 %v4065_v34  ;;  %v4623_v43 = vmul.f32 %v5229_v19, %v4599_v54 }
 0x3c2   : > { %v5231_v0 = vpop.eup %5230  ;;  %v4083_v41 = vmul.f32 %v4075_v50, %v4075_v50  ;;  %v4273_v63 = vadd.f32 1.0, %v4249_v8  ;;  %v4878_v31 = vadd.f32 -1.0, %v4249_v8 }
 0x3c3   : > { %v4624_v27 = vmul.f32 %v5231_v0, %v4600_v33 }
 0x3c4   : > { %v4107_v32 = vadd.f32 1.0, %v4083_v41  ;;  %5236 = vrcp.f32 %v4273_v63  ;;  %v4850_v44 = vadd.f32 -1.0, %v4083_v41  ;;  %v4265_v55 = vmul.f32 %v4878_v31, %v7302_v40 }
 0x3c5   : > { %v5233_v59 = vpop.eup %5232  ;;  %v5060_v46 = vpack.c.bf16 %v4624_v27, %v4623_v43 }
 0x3c6   : > { %v4242_v47 = vadd.f32 1.0, %v5233_v59  ;;  %5238 = vrcp.f32 %v4107_v32  ;;  %v4099_v2 = vmul.f32 %v4850_v44, %v7306_v39 }
 0x3c7   : > { %v5235_v53 = vpop.eup %5234  ;;  %5080 = vst [vmem:[%s7232_s6 + $0x70] sm:$0xff] %v5060_v46  }
 0x3c8   : > { %v4250_v48 = vmul.f32 %v4242_v47, %v4242_v47  ;;  %v4076_v58 = vadd.f32 1.0, %v5235_v53 }
 0x3ca   : > { %v4274_v14 = vadd.f32 1.0, %v4250_v48  ;;  %v4084_v20 = vmul.f32 %v4076_v58, %v4076_v58  ;;  %v4879_v23 = vadd.f32 -1.0, %v4250_v48  ;;  %v5237_v10 = vpop.eup %5236 }
 0x3cb   : > { %v4289_v30 = vmul.f32 %v5237_v10, %v4265_v55 }
 0x3cc   : > { %5240 = vrcp.f32 %v4274_v14  ;;  %v4108_v3 = vadd.f32 1.0, %v4084_v20  ;;  %v4851_v37 = vadd.f32 -1.0, %v4084_v20  ;;  %v5239_v42 = vpop.eup %5238  ;;  %v4266_v1 = vmul.f32 %v4879_v23, %v4206_v62 }
 0x3cd   : > { %v4123_v45 = vmul.f32 %v5239_v42, %v4099_v2 }
 0x3ce   : > { %5242 = vrcp.f32 %v4108_v3  ;;  %v4100_v51 = vmul.f32 %v4851_v37, %v4040_v28 }
 0x3d2   : > { %v5241_v6 = vpop.eup %5240 }
 0x3d3   : > { %v4290_v38 = vmul.f32 %v5241_v6, %v4266_v1 }
 0x3d4   : > { %v5243_v5 = vpop.eup %5242 }
 0x3d5   : > { %v5020_v36 = vpack.c.bf16 %v4290_v38, %v4289_v30  ;;  %v4124_v13 = vmul.f32 %v5243_v5, %v4100_v51 }
 0x3d6   : > { %v4542_v17 = vpop.f32.mrf.mxu3 }
 0x3d7   : > { %5072 = vst [vmem:[%s7232_s6 + $0x30] sm:$0xff] %v5020_v36   ;;  %v5000_v52 = vpack.c.bf16 %v4124_v13, %v4123_v45  ;;  %v4543_v15 = vadd.f32 %v7173_v25, %v4542_v17 }
 0x3d8   : > { %v4375_v21 = vpop.f32.mrf.mxu2 }
 0x3d9   : > { %5068 = vst [vmem:[%s7232_s6 + $0x10] sm:$0xff] %v5000_v52   ;;  %v4553_v40 = vmin.f32 %v4543_v15, 20.0  ;;  %v4376_v22 = vadd.f32 %v7173_v25, %v4375_v21 }
 0x3db   : > { %v4567_v26 = vmul.f32 1.442695, %v4553_v40  ;;  %v4386_v35 = vmin.f32 %v4376_v22, 20.0 }
 0x3dd   : > { %5244 = vpow2.f32 %v4567_v26  ;;  %v4400_v39 = vmul.f32 1.442695, %v4386_v35 }
 0x3de   : > { %v4544_v16 = vpop.f32.mrf.mxu3 }
 0x3df   : > { %5246 = vpow2.f32 %v4400_v39  ;;  %v4545_v29 = vadd.f32 %v7173_v25, %v4544_v16 }
 0x3e0   : > { %v4377_v12 = vpop.f32.mrf.mxu2 }
 0x3e1   : > { %v4554_v62 = vmin.f32 %v4545_v29, 20.0  ;;  %v4378_v11 = vadd.f32 %v7173_v25, %v4377_v12 }
 0x3e3   : > { %v5245_v61 = vpop.eup %5244  ;;  %v4569_v60 = vmul.f32 1.442695, %v4554_v62  ;;  %v4387_v56 = vmin.f32 %v4378_v11, 20.0 }
 0x3e4   : > { %v4577_v28 = vadd.f32 1.0, %v5245_v61 }
 0x3e5   : > { %v5247_v57 = vpop.eup %5246  ;;  %5248 = vpow2.f32 %v4569_v60  ;;  %v4402_v18 = vmul.f32 1.442695, %v4387_v56 }
 0x3e6   : > { %v4410_v24 = vadd.f32 1.0, %v5247_v57  ;;  %v4585_v7 = vmul.f32 %v4577_v28, %v4577_v28 }
 0x3e7   : > { %5250 = vpow2.f32 %v4402_v18 }
 0x3e8   : > { %v4418_v49 = vmul.f32 %v4410_v24, %v4410_v24  ;;  %v4609_v9 = vadd.f32 1.0, %v4585_v7  ;;  %v4952_v41 = vadd.f32 -1.0, %v4585_v7 }
 0x3ea   : > { %v4442_v50 = vadd.f32 1.0, %v4418_v49  ;;  %5252 = vrcp.f32 %v4609_v9  ;;  %v4916_v32 = vadd.f32 -1.0, %v4418_v49  ;;  %v4601_v3 = vmul.f32 %v4952_v41, %v4543_v15 }
 0x3eb   : > { %v5249_v4 = vpop.eup %5248 }
 0x3ec   : > { %v4578_v34 = vadd.f32 1.0, %v5249_v4  ;;  %5254 = vrcp.f32 %v4442_v50  ;;  %v4434_v42 = vmul.f32 %v4916_v32, %v4376_v22 }
 0x3ed   : > { %v5251_v19 = vpop.eup %5250 }
 0x3ee   : > { %v4586_v54 = vmul.f32 %v4578_v34, %v4578_v34  ;;  %v4411_v33 = vadd.f32 1.0, %v5251_v19 }
 0x3f0   : > { %v4610_v0 = vadd.f32 1.0, %v4586_v54  ;;  %v4419_v8 = vmul.f32 %v4411_v33, %v4411_v33  ;;  %v4208_v43 = vpop.f32.mrf.mxu1  ;;  %v4953_v63 = vadd.f32 -1.0, %v4586_v54  ;;  %v5253_v48 = vpop.eup %5252 }
 0x3f1   : > { %v7323_v27 = vadd.f32 %v7173_v25, %v4208_v43  ;;  %v4625_v10 = vmul.f32 %v5253_v48, %v4601_v3 }
 0x3f2   : > { %5256 = vrcp.f32 %v4610_v0  ;;  %v4443_v59 = vadd.f32 1.0, %v4419_v8  ;;  %v4042_v46 = vpop.f32.mrf.mxu0  ;;  %v4917_v58 = vadd.f32 -1.0, %v4419_v8  ;;  %v5255_v31 = vpop.eup %5254  ;;  %v4602_v23 = vmul.f32 %v4953_v63, %v4545_v29 }
 0x3f3   : > { %v4219_v47 = vmin.f32 %v7323_v27, 20.0  ;;  %v7327_v53 = vadd.f32 %v7173_v25, %v4042_v46  ;;  %v4458_v38 = vmul.f32 %v5255_v31, %v4434_v42 }
 0x3f4   : > { %5258 = vrcp.f32 %v4443_v59  ;;  %v4435_v6 = vmul.f32 %v4917_v58, %v4378_v11 }
 0x3f5   : > { %v4233_v14 = vmul.f32 1.442695, %v4219_v47  ;;  %v4053_v20 = vmin.f32 %v7327_v53, 20.0 }
 0x3f7   : > { %5260 = vpow2.f32 %v4233_v14  ;;  %v4067_v44 = vmul.f32 1.442695, %v4053_v20 }
 0x3f8   : > { %v5257_v37 = vpop.eup %5256  ;;  %v4210_v55 = vpop.f32.mrf.mxu1 }
 0x3f9   : > { %v4626_v1 = vmul.f32 %v5257_v37, %v4602_v23  ;;  %5262 = vpow2.f32 %v4067_v44  ;;  %v4211_v30 = vadd.f32 %v7173_v25, %v4210_v55 }
 0x3fa   : > { %v5259_v2 = vpop.eup %5258  ;;  %v4044_v51 = vpop.f32.mrf.mxu0 }
 0x3fb   : > { %v5065_v5 = vpack.c.bf16 %v4626_v1, %v4625_v10  ;;  %v4459_v45 = vmul.f32 %v5259_v2, %v4435_v6  ;;  %v4220_v36 = vmin.f32 %v4211_v30, 20.0  ;;  %v4045_v13 = vadd.f32 %v7173_v25, %v4044_v51 }
 0x3fd   : > { %v5261_v17 = vpop.eup %5260  ;;  %5081 = vst [vmem:[%s7232_s6 + $0x78] sm:$0xff] %v5065_v5   ;;  %v5045_v52 = vpack.c.bf16 %v4459_v45, %v4458_v38  ;;  %v4235_v15 = vmul.f32 1.442695, %v4220_v36  ;;  %v4054_v21 = vmin.f32 %v4045_v13, 20.0 }
 0x3fe   : > { %v4243_v40 = vadd.f32 1.0, %v5261_v17 }
 0x3ff   : > { %v5263_v22 = vpop.eup %5262  ;;  %5077 = vst [vmem:[%s7232_s6 + $0x58] sm:$0xff] %v5045_v52   ;;  %5264 = vpow2.f32 %v4235_v15  ;;  %v4069_v26 = vmul.f32 1.442695, %v4054_v21 }
 0x400   : > { %v4077_v35 = vadd.f32 1.0, %v5263_v22  ;;  %v4251_v39 = vmul.f32 %v4243_v40, %v4243_v40 }
 0x401   : > { %5266 = vpow2.f32 %v4069_v26 }
 0x402   : > { %v4085_v16 = vmul.f32 %v4077_v35, %v4077_v35  ;;  %v4275_v12 = vadd.f32 1.0, %v4251_v39  ;;  %v4880_v18 = vadd.f32 -1.0, %v4251_v39 }
 0x404   : > { %v4109_v25 = vadd.f32 1.0, %v4085_v16  ;;  %5268 = vrcp.f32 %v4275_v12  ;;  %v4852_v7 = vadd.f32 -1.0, %v4085_v16  ;;  %v4267_v34 = vmul.f32 %v4880_v18, %v7323_v27 }
 0x405   : > { %v5265_v29 = vpop.eup %5264 }
 0x406   : > { %v4244_v62 = vadd.f32 1.0, %v5265_v29  ;;  %5270 = vrcp.f32 %v4109_v25  ;;  %v4101_v33 = vmul.f32 %v4852_v7, %v7327_v53 }
 0x407   : > { %v5267_v11 = vpop.eup %5266 }
 0x408   : > { %v4252_v61 = vmul.f32 %v4244_v62, %v4244_v62  ;;  %v4078_v60 = vadd.f32 1.0, %v5267_v11 }
 0x40a   : > { %v4276_v56 = vadd.f32 1.0, %v4252_v61  ;;  %v4086_v28 = vmul.f32 %v4078_v60, %v4078_v60  ;;  %v4881_v24 = vadd.f32 -1.0, %v4252_v61  ;;  %v5269_v4 = vpop.eup %5268 }
 0x40b   : > { %v4291_v54 = vmul.f32 %v5269_v4, %v4267_v34 }
 0x40c   : > { %5272 = vrcp.f32 %v4276_v56  ;;  %v4110_v57 = vadd.f32 1.0, %v4086_v28  ;;  %v4853_v49 = vadd.f32 -1.0, %v4086_v28  ;;  %v5271_v9 = vpop.eup %5270  ;;  %v4268_v19 = vmul.f32 %v4881_v24, %v4211_v30 }
 0x40d   : > { %v4125_v41 = vmul.f32 %v5271_v9, %v4101_v33 }
 0x40e   : > { %5274 = vrcp.f32 %v4110_v57  ;;  %v4102_v8 = vmul.f32 %v4853_v49, %v4045_v13 }
 0x412   : > { %v5273_v50 = vpop.eup %5272 }
 0x413   : > { %v4292_v0 = vmul.f32 %v5273_v50, %v4268_v19 }
 0x414   : > { %v5275_v43 = vpop.eup %5274 }
 0x415   : > { %v5025_v59 = vpack.c.bf16 %v4292_v0, %v4291_v54  ;;  %v4126_v27 = vmul.f32 %v5275_v43, %v4102_v8 }
 0x417   : > { %5073 = vst [vmem:[%s7232_s6 + $0x38] sm:$0xff] %v5025_v59   ;;  %v5005_v46 = vpack.c.bf16 %v4126_v27, %v4125_v41 }
 0x419   : > { %5069 = vst [vmem:[%s7232_s6 + $0x18] sm:$0xff] %v5005_v46  }
 0x41a   : > { %5303 = shalt.err (!%p5300_p5)
}
 0x41b   : > { %s5365_s30 = smov 64  }
 0x41c   : > { %5082 = dma.vmem_to_hbm [thread:$0]  (%p5426_p4), %s4659_s15, 2048, %s4661_s11, %s4645_s18, %s5365_s30, %s5365_s30, %s5357_s4  }
 0x41d PF: > { %p5088_p6 = scmp.ge.s32.totalorder %s5354_s17, 2  ;;  %s4675_s5 = sand.u32 1, %s5334_s12  }
 0x41e   : > { %s4676_s6 = scalar_lea.sflag [#allocation5], %s4675_s5 }
 0x41f   : > { %p5085_p7 = pnand %p5088_p6, %p5433_p8 }
 0x421   : > { %p5086_p9 = pneg %p5085_p7 }
 0x423   : > { %5329 = dma.done.wait (%p5086_p9), %s4676_s6, 2048  }
 0x424   : > { %5331 = vsyncadd (%p5086_p9), %s4676_s6, 4294965248  ;;  %s16_s17 = sadd.s32 1, %s5354_s17   ;;  %s7396_s12 = smov %s5338_s13 }
 0x425   : > { %p13_p10 = scmp.ge.s32.totalorder %s16_s17, 4   ;;  %s7397_s13 = smov %s5342_s14 }
 0x426   : > { %s7398_s14 = smov %s5439_s25  ;;  %s7399_s15 = smov %s5350_s16 }
 0x427   : > { %s7400_s16 = smov %s7402_s20  ;;  %15 = sbr.rel (!%p13_p10) target bundleno = 4 (0x4), region = 86 }
 0x42c   :  { %4682 = vsyncpa [#allocation5], 1 }
 0x42d   :  { %4684 = vsyncpa [#allocation5 + $0x1], 1 }

</bundles_post_ra>
